<compile_context>
chip_gen: v5e
topology: v5e:2x2
jax: 0.10.0
libtpu: 0.0.40
codegen_flags: <defaults>
</compile_context>

<pallas_src>
import math
import functools

import jax
import jax.numpy as jnp
from jax.experimental import pallas as pl
from jax.experimental.pallas import tpu as pltpu


# ---------------------------------------------------------------------------
# Tiling helpers
# ---------------------------------------------------------------------------
def _row_tile(n_rows, row_bytes, budget_bytes=2 * 1024 * 1024, align=8):
    """Largest row tile that divides n_rows, keeps one block under
    `budget_bytes` (~2 MiB -> ~6 live double-buffered blocks fit v7x's 32 MiB
    scoped VMEM) and respects the sublane rule (multiple of `align`, unless it
    spans the whole axis)."""
    max_rows = max(1, budget_bytes // max(int(row_bytes), 1))
    if n_rows <= max_rows:
        return n_rows
    for t in range(min(n_rows, max_rows), 0, -1):
        if n_rows % t == 0 and t % align == 0:
            return t
    return n_rows


def _parallel(n):
    return pltpu.CompilerParams(dimension_semantics=("parallel",) * n)


# ---------------------------------------------------------------------------
# Kernels
# ---------------------------------------------------------------------------
def _pe_add_kernel(x_ref, pe_ref, o_ref):
    # x: (TS, B, D), pe: (TS, 1, D) -> broadcast add over the batch axis.
    o_ref[...] = (x_ref[...] + pe_ref[...]).astype(o_ref.dtype)


def _linear_kernel(x_ref, w_ref, b_ref, o_ref, *, relu):
    y = jnp.dot(x_ref[...], w_ref[...], preferred_element_type=jnp.float32)
    y = y + b_ref[...]
    if relu:
        y = jnp.maximum(y, 0.0)
    o_ref[...] = y.astype(o_ref.dtype)


def _ln_kernel(x_ref, g_ref, b_ref, o_ref, *, eps):
    x = x_ref[...].astype(jnp.float32)
    mu = jnp.mean(x, axis=-1, keepdims=True)
    xc = x - mu
    var = jnp.mean(xc * xc, axis=-1, keepdims=True)
    y = xc * jax.lax.rsqrt(var + eps) * g_ref[...] + b_ref[...]
    o_ref[...] = y.astype(o_ref.dtype)


def _add_ln_kernel(x_ref, r_ref, g_ref, b_ref, o_ref, *, eps):
    x = x_ref[...].astype(jnp.float32) + r_ref[...].astype(jnp.float32)
    mu = jnp.mean(x, axis=-1, keepdims=True)
    xc = x - mu
    var = jnp.mean(xc * xc, axis=-1, keepdims=True)
    y = xc * jax.lax.rsqrt(var + eps) * g_ref[...] + b_ref[...]
    o_ref[...] = y.astype(o_ref.dtype)


def _mha_kernel(q_ref, k_ref, v_ref, m_ref, o_ref, *, scale):
    # blocks: q/k/v/o (1, 1, S, hd); m (1, 1, S) additive key bias (0 or -1e30)
    q = q_ref[...][0, 0]                       # (S, hd)
    k = k_ref[...][0, 0]
    v = v_ref[...][0, 0]
    bias = m_ref[...][0]                       # (1, S)
    s = jax.lax.dot_general(q, k, (((1,), (1,)), ((), ())),
                            preferred_element_type=jnp.float32)
    s = s * scale + bias                       # (S, S) + (1, S)
    m = jnp.max(s, axis=-1, keepdims=True)
    p = jnp.exp(s - m)
    p = p / jnp.sum(p, axis=-1, keepdims=True)
    out = jnp.dot(p, v, preferred_element_type=jnp.float32)
    o_ref[...] = out[None, None].astype(o_ref.dtype)


# ---------------------------------------------------------------------------
# Pallas wrappers
# ---------------------------------------------------------------------------
def pe_add(x, pe):
    """x: (S, B, D); pe: (max_len, 1, D) buffer. Tiled over S only."""
    S, B, D = x.shape
    pe_s = pe[:S].astype(x.dtype)
    itm = x.dtype.itemsize
    ts = _row_tile(S, (2 * B * D + D) * itm, align=1)
    return pl.pallas_call(
        _pe_add_kernel,
        out_shape=jax.ShapeDtypeStruct((S, B, D), x.dtype),
        grid=(S // ts,),
        in_specs=[
            pl.BlockSpec((ts, B, D), lambda i: (i, 0, 0)),
            pl.BlockSpec((ts, 1, D), lambda i: (i, 0, 0)),   # pe traffic: O(S*D)
        ],
        out_specs=pl.BlockSpec((ts, B, D), lambda i: (i, 0, 0)),
        compiler_params=_parallel(1),
    )(x, pe_s)


def linear(x, w, b, *, relu=False):
    """x: (M, K); w: (K, N) (already transposed vs. torch); b: (N,)."""
    M, K = x.shape
    N = w.shape[1]
    tm = _row_tile(M, (K + N) * x.dtype.itemsize)
    return pl.pallas_call(
        functools.partial(_linear_kernel, relu=relu),
        out_shape=jax.ShapeDtypeStruct((M, N), x.dtype),
        grid=(M // tm,),
        in_specs=[
            pl.BlockSpec((tm, K), lambda i: (i, 0)),
            pl.BlockSpec((K, N), lambda i: (0, 0)),
            pl.BlockSpec((1, N), lambda i: (0, 0)),
        ],
        out_specs=pl.BlockSpec((tm, N), lambda i: (i, 0)),
        compiler_params=_parallel(1),
    )(x, w, b.reshape(1, N))


def layer_norm(x, g, b, *, eps=1e-5):
    M, D = x.shape
    tm = _row_tile(M, 2 * D * x.dtype.itemsize)
    return pl.pallas_call(
        functools.partial(_ln_kernel, eps=eps),
        out_shape=jax.ShapeDtypeStruct((M, D), x.dtype),
        grid=(M // tm,),
        in_specs=[
            pl.BlockSpec((tm, D), lambda i: (i, 0)),
            pl.BlockSpec((1, D), lambda i: (0, 0)),
            pl.BlockSpec((1, D), lambda i: (0, 0)),
        ],
        out_specs=pl.BlockSpec((tm, D), lambda i: (i, 0)),
        compiler_params=_parallel(1),
    )(x, g.reshape(1, D), b.reshape(1, D))


def add_layer_norm(x, res, g, b, *, eps=1e-5):
    M, D = x.shape
    tm = _row_tile(M, 3 * D * x.dtype.itemsize)
    return pl.pallas_call(
        functools.partial(_add_ln_kernel, eps=eps),
        out_shape=jax.ShapeDtypeStruct((M, D), x.dtype),
        grid=(M // tm,),
        in_specs=[
            pl.BlockSpec((tm, D), lambda i: (i, 0)),
            pl.BlockSpec((tm, D), lambda i: (i, 0)),
            pl.BlockSpec((1, D), lambda i: (0, 0)),
            pl.BlockSpec((1, D), lambda i: (0, 0)),
        ],
        out_specs=pl.BlockSpec((tm, D), lambda i: (i, 0)),
        compiler_params=_parallel(1),
    )(x, res, g.reshape(1, D), b.reshape(1, D))


def mha(q, k, v, mask_bias, *, scale):
    """q,k,v: (B, H, S, hd); mask_bias: (B, 1, S) additive key-padding bias."""
    B, H, S, hd = q.shape
    spec = pl.BlockSpec((1, 1, S, hd), lambda b, h: (b, h, 0, 0))
    mspec = pl.BlockSpec((1, 1, S), lambda b, h: (b, 0, 0))
    return pl.pallas_call(
        functools.partial(_mha_kernel, scale=scale),
        out_shape=jax.ShapeDtypeStruct((B, H, S, hd), q.dtype),
        grid=(B, H),
        in_specs=[spec, spec, spec, mspec],
        out_specs=spec,
        compiler_params=pltpu.CompilerParams(
            dimension_semantics=("parallel", "parallel")),
    )(q, k, v, mask_bias)


# ---------------------------------------------------------------------------
# Model glue (parameters + forward)
# ---------------------------------------------------------------------------
def make_positional_encoding_buffer(d_model, max_len=5000, dtype=jnp.float32):
    position = jnp.arange(max_len, dtype=jnp.float32)[:, None]
    div_term = jnp.exp(jnp.arange(0, d_model, 2, dtype=jnp.float32)
                       * (-math.log(10000.0) / d_model))
    pe = jnp.zeros((max_len, d_model), jnp.float32)
    pe = pe.at[:, 0::2].set(jnp.sin(position * div_term))
    pe = pe.at[:, 1::2].set(jnp.cos(position * div_term))
    return pe[:, None, :].astype(dtype)                      # (max_len, 1, D)


def init_params(key, *, d_model, nhead, dim_ff, max_len, n_classes, n_layers=2):
    keys = iter(jax.random.split(key, 64))

    def lin(in_dim, out_dim, w_scale=0.1):
        w = jax.random.normal(next(keys), (in_dim, out_dim), jnp.float32) * w_scale
        b = jax.random.normal(next(keys), (out_dim,), jnp.float32) * 0.01
        return w, b

    layers = []
    for _ in range(n_layers):
        layers.append(dict(
            wqkv=lin(d_model, 3 * d_model),
            wo=lin(d_model, d_model),
            w1=lin(d_model, dim_ff),
            w2=lin(dim_ff, d_model),
            ln1=(jnp.ones((d_model,), jnp.float32), jnp.zeros((d_model,), jnp.float32)),
            ln2=(jnp.ones((d_model,), jnp.float32), jnp.zeros((d_model,), jnp.float32)),
        ))
    return dict(
        pe=make_positional_encoding_buffer(d_model, max_len=max_len),
        layers=layers,
        final_ln=(jnp.ones((d_model,), jnp.float32), jnp.zeros((d_model,), jnp.float32)),
        fuse1=lin(max_len, 128),
        fuse2=lin(128, 1),
        dec1=lin(d_model, 128),
        dec2=lin(128, n_classes),
    )


def _encoder_layer(x2d, mask_bias, p, *, S, B, D, H):
    hd = D // H
    qkv = linear(x2d, p['wqkv'][0], p['wqkv'][1])            # (S*B, 3D)
    qkv = qkv.reshape(S, B, 3, H, hd)
    q = jnp.transpose(qkv[:, :, 0], (1, 2, 0, 3))            # (B, H, S, hd)
    k = jnp.transpose(qkv[:, :, 1], (1, 2, 0, 3))
    v = jnp.transpose(qkv[:, :, 2], (1, 2, 0, 3))
    attn = mha(q, k, v, mask_bias, scale=1.0 / math.sqrt(hd))
    attn2d = jnp.transpose(attn, (2, 0, 1, 3)).reshape(S * B, D)
    attn2d = linear(attn2d, p['wo'][0], p['wo'][1])
    x2d = add_layer_norm(attn2d, x2d, *p['ln1'])
    h = linear(x2d, p['w1'][0], p['w1'][1], relu=True)
    h = linear(h, p['w2'][0], p['w2'][1])
    return add_layer_norm(h, x2d, *p['ln2'])


def seq_classifier_forward(x, padding_mask, params, *, nhead=4):
    """x: padded (S=max_len, B, D); padding_mask: (B, S) bool, True = padding."""
    S, B, D = x.shape
    x = pe_add(x, params['pe'])
    mask_bias = jnp.where(padding_mask, -1e30, 0.0).astype(x.dtype).reshape(B, 1, S)
    x2d = x.reshape(S * B, D)
    for p in params['layers']:
        x2d = _encoder_layer(x2d, mask_bias, p, S=S, B=B, D=D, H=nhead)
    x2d = layer_norm(x2d, *params['final_ln'])
    x = x2d.reshape(S, B, D)
    # permute(1, 2, 0) -> (B, D, S); fuse over the sequence axis
    xf = jnp.transpose(x, (1, 2, 0)).reshape(B * D, S)
    h = linear(xf, params['fuse1'][0], params['fuse1'][1], relu=True)
    y = linear(h, params['fuse2'][0], params['fuse2'][1]).reshape(B, D)   # squeeze
    h = linear(y, params['dec1'][0], params['dec1'][1], relu=True)
    return linear(h, params['dec2'][0], params['dec2'][1])


# ---------------------------------------------------------------------------
# Pure-JAX reference (same math, no Pallas) for the correctness check
# ---------------------------------------------------------------------------
def ref_forward(x, padding_mask, params, *, nhead=4):
    S, B, D = x.shape
    hd = D // nhead
    x = x + params['pe'][:S]
    bias = jnp.where(padding_mask, -1e30, 0.0)[:, None, None, :]

    def ln(v, g, b, eps=1e-5):
        mu = v.mean(-1, keepdims=True)
        var = ((v - mu) ** 2).mean(-1, keepdims=True)
        return (v - mu) * jax.lax.rsqrt(var + eps) * g + b

    for p in params['layers']:
        qkv = (x.reshape(S * B, D) @ p['wqkv'][0] + p['wqkv'][1]).reshape(S, B, 3, nhead, hd)
        q = jnp.transpose(qkv[:, :, 0], (1, 2, 0, 3))
        k = jnp.transpose(qkv[:, :, 1], (1, 2, 0, 3))
        v = jnp.transpose(qkv[:, :, 2], (1, 2, 0, 3))
        s = jnp.einsum('bhqd,bhkd->bhqk', q, k) / math.sqrt(hd) + bias
        a = jax.nn.softmax(s, axis=-1)
        o = jnp.einsum('bhqk,bhkd->bhqd', a, v)
        o = jnp.transpose(o, (2, 0, 1, 3)).reshape(S, B, D)
        o = o @ p['wo'][0] + p['wo'][1]
        x = ln(x + o, *p['ln1'])
        f = jnp.maximum(x @ p['w1'][0] + p['w1'][1], 0.0) @ p['w2'][0] + p['w2'][1]
        x = ln(x + f, *p['ln2'])
    x = ln(x, *params['final_ln'])
    xf = jnp.transpose(x, (1, 2, 0))
    h = jnp.maximum(xf @ params['fuse1'][0] + params['fuse1'][1], 0.0)
    y = (h @ params['fuse2'][0] + params['fuse2'][1])[..., 0]
    h = jnp.maximum(y @ params['dec1'][0] + params['dec1'][1], 0.0)
    return h @ params['dec2'][0] + params['dec2'][1]


# ---------------------------------------------------------------------------
# Demo / self-check
# ---------------------------------------------------------------------------
if __name__ == "__main__":
    D = 32             # in_feature_dim
    NHEAD = 4
    DIM_FF = 4 * 32
    MAX_LEN = 32
    N_CLASSES = 5
    LENS = [20, 32]    # variable-length input sequences
    B = len(LENS)

    key = jax.random.PRNGKey(0)
    key, k_in = jax.random.split(key)
    seqs = []
    for L in LENS:
        k_in, sub = jax.random.split(k_in)
        seqs.append(jax.random.normal(sub, (L, D), jnp.float32))

    params = init_params(key, d_model=D, nhead=NHEAD, dim_ff=DIM_FF,
                         max_len=MAX_LEN, n_classes=N_CLASSES, n_layers=2)

    # custom_padding_seq + gen_padding_mask equivalents (host-side data prep).
    # TODO(synk): Python-list length extraction / padding has no Pallas
    # equivalent; it is plain data prep, done here with jnp.
    x = jnp.zeros((MAX_LEN, B, D), jnp.float32)
    for i, s in enumerate(seqs):
        x = x.at[: s.shape[0], i, :].set(s)
    lens = jnp.asarray(LENS, jnp.int32)
    padding_mask = jnp.arange(MAX_LEN)[None, :] >= lens[:, None]   # True = padding

    fwd = jax.jit(functools.partial(seq_classifier_forward, nhead=NHEAD))
    logits = jax.block_until_ready(fwd(x, padding_mask, params))
    assert logits.shape == (B, N_CLASSES)
    assert bool(jnp.all(jnp.isfinite(logits)))

    ref = ref_forward(x, padding_mask, params, nhead=NHEAD)
    assert jnp.allclose(logits, ref, atol=5e-3, rtol=5e-3), \
        float(jnp.max(jnp.abs(logits - ref)))

    print("KERNEL_OK")
</pallas_src>

<mosaic_0001>
module attributes {stable_mosaic.version = 11 : i64} {
  func.func @_linear_kernel(%arg0: i32, %arg1: memref<64x32xf32, #tpu.memory_space<vmem>>, %arg2: memref<32x96xf32, #tpu.memory_space<vmem>>, %arg3: memref<1x96xf32, #tpu.memory_space<vmem>>, %arg4: memref<64x96xf32, #tpu.memory_space<vmem>>) attributes {dimension_semantics = [#tpu.dimension_semantics<parallel>], iteration_bounds = array<i64: 1>, scalar_prefetch = 0 : i64, scratch_operands = 0 : i64, tpu.core_type = #tpu.core_type<tc>, window_params = [{transform_indices = @transform_0, window_bounds = array<i64: 64, 32>}, {pipeline_mode = #tpu.pipeline_mode<synchronous>, transform_indices = @transform_1, window_bounds = array<i64: 32, 96>}, {pipeline_mode = #tpu.pipeline_mode<synchronous>, transform_indices = @transform_2, window_bounds = array<i64: 1, 96>}, {transform_indices = @transform_3, window_bounds = array<i64: 64, 96>}]} {
    %c0 = arith.constant 0 : index
    %c0_0 = arith.constant 0 : index
    %0 = vector.load %arg1[%c0, %c0_0] : memref<64x32xf32, #tpu.memory_space<vmem>>, vector<64x32xf32>
    %c0_1 = arith.constant 0 : index
    %c0_2 = arith.constant 0 : index
    %1 = vector.load %arg2[%c0_1, %c0_2] : memref<32x96xf32, #tpu.memory_space<vmem>>, vector<32x96xf32>
    %cst = arith.constant dense<0.000000e+00> : vector<64x96xf32>
    %2 = tpu.matmul %0, %1, %cst {dimension_numbers = #tpu.dot_dimension_numbers<[1], [0], [0], [1], [0, 0, 1, 1], [], []>} : vector<64x32xf32>, vector<32x96xf32>, vector<64x96xf32> -> vector<64x96xf32>
    %c0_3 = arith.constant 0 : index
    %c0_4 = arith.constant 0 : index
    %3 = vector.load %arg3[%c0_3, %c0_4] : memref<1x96xf32, #tpu.memory_space<vmem>>, vector<1x96xf32>
    %4 = vector.broadcast %3 : vector<1x96xf32> to vector<64x96xf32>
    %5 = arith.addf %2, %4 : vector<64x96xf32>
    %c0_5 = arith.constant 0 : index
    %c0_6 = arith.constant 0 : index
    %6 = vector.load %arg4[%c0_5, %c0_6] : memref<64x96xf32, #tpu.memory_space<vmem>>, vector<64x96xf32>
    tpu.vector_store %arg4[%c0_5, %c0_6], %5 {strides = array<i32>} : memref<64x96xf32, #tpu.memory_space<vmem>>, vector<64x96xf32>,
    return
  }
  func.func @transform_0(%arg0: i32) -> (i32, i32) {
    %c0_i32 = arith.constant 0 : i32
    %c0_i32_0 = arith.constant 0 : i32
    return %arg0, %c0_i32 : i32, i32
  }
  func.func @transform_1(%arg0: i32) -> (i32, i32) {
    %c0_i32 = arith.constant 0 : i32
    %c0_i32_0 = arith.constant 0 : i32
    %c0_i32_1 = arith.constant 0 : i32
    return %c0_i32, %c0_i32_0 : i32, i32
  }
  func.func @transform_2(%arg0: i32) -> (i32, i32) {
    %c0_i32 = arith.constant 0 : i32
    %c0_i32_0 = arith.constant 0 : i32
    %c0_i32_1 = arith.constant 0 : i32
    return %c0_i32, %c0_i32_0 : i32, i32
  }
  func.func @transform_3(%arg0: i32) -> (i32, i32) {
    %c0_i32 = arith.constant 0 : i32
    %c0_i32_0 = arith.constant 0 : i32
    return %arg0, %c0_i32 : i32, i32
  }
}

module attributes {stable_mosaic.version = 11 : i64} {
  func.func @_pe_add_kernel(%arg0: i32, %arg1: memref<32x2x32xf32, #tpu.memory_space<vmem>>, %arg2: memref<32x1x32xf32, #tpu.memory_space<vmem>>, %arg3: memref<32x2x32xf32, #tpu.memory_space<vmem>>) attributes {dimension_semantics = [#tpu.dimension_semantics<parallel>], iteration_bounds = array<i64: 1>, scalar_prefetch = 0 : i64, scratch_operands = 0 : i64, tpu.core_type = #tpu.core_type<tc>, window_params = [{transform_indices = @transform_0, window_bounds = array<i64: 32, 2, 32>}, {transform_indices = @transform_1, window_bounds = array<i64: 32, 1, 32>}, {transform_indices = @transform_2, window_bounds = array<i64: 32, 2, 32>}]} {
    %c0 = arith.constant 0 : index
    %c0_0 = arith.constant 0 : index
    %c0_1 = arith.constant 0 : index
    %0 = vector.load %arg1[%c0, %c0_0, %c0_1] : memref<32x2x32xf32, #tpu.memory_space<vmem>>, vector<32x2x32xf32>
    %c0_2 = arith.constant 0 : index
    %c0_3 = arith.constant 0 : index
    %c0_4 = arith.constant 0 : index
    %1 = vector.load %arg2[%c0_2, %c0_3, %c0_4] : memref<32x1x32xf32, #tpu.memory_space<vmem>>, vector<32x1x32xf32>
    %2 = vector.broadcast %1 : vector<32x1x32xf32> to vector<32x2x32xf32>
    %3 = arith.addf %0, %2 : vector<32x2x32xf32>
    %c0_5 = arith.constant 0 : index
    %c0_6 = arith.constant 0 : index
    %c0_7 = arith.constant 0 : index
    %4 = vector.load %arg3[%c0_5, %c0_6, %c0_7] : memref<32x2x32xf32, #tpu.memory_space<vmem>>, vector<32x2x32xf32>
    tpu.vector_store %arg3[%c0_5, %c0_6, %c0_7], %3 {strides = array<i32>} : memref<32x2x32xf32, #tpu.memory_space<vmem>>, vector<32x2x32xf32>,
    return
  }
  func.func @transform_0(%arg0: i32) -> (i32, i32, i32) {
    %c0_i32 = arith.constant 0 : i32
    %c0_i32_0 = arith.constant 0 : i32
    %c0_i32_1 = arith.constant 0 : i32
    return %arg0, %c0_i32, %c0_i32_0 : i32, i32, i32
  }
  func.func @transform_1(%arg0: i32) -> (i32, i32, i32) {
    %c0_i32 = arith.constant 0 : i32
    %c0_i32_0 = arith.constant 0 : i32
    %c0_i32_1 = arith.constant 0 : i32
    return %arg0, %c0_i32, %c0_i32_0 : i32, i32, i32
  }
  func.func @transform_2(%arg0: i32) -> (i32, i32, i32) {
    %c0_i32 = arith.constant 0 : i32
    %c0_i32_0 = arith.constant 0 : i32
    %c0_i32_1 = arith.constant 0 : i32
    return %arg0, %c0_i32, %c0_i32_0 : i32, i32, i32
  }
}

module attributes {stable_mosaic.version = 11 : i64} {
  func.func @_mha_kernel(%arg0: i32, %arg1: i32, %arg2: memref<1x1x32x8xf32, #tpu.memory_space<vmem>>, %arg3: memref<1x1x32x8xf32, #tpu.memory_space<vmem>>, %arg4: memref<1x1x32x8xf32, #tpu.memory_space<vmem>>, %arg5: memref<1x1x32xf32, #tpu.memory_space<vmem>>, %arg6: memref<1x1x32x8xf32, #tpu.memory_space<vmem>>) attributes {dimension_semantics = [#tpu.dimension_semantics<parallel>, #tpu.dimension_semantics<parallel>], iteration_bounds = array<i64: 2, 4>, scalar_prefetch = 0 : i64, scratch_operands = 0 : i64, tpu.core_type = #tpu.core_type<tc>, window_params = [{transform_indices = @transform_0, window_bounds = array<i64: 1, 1, 32, 8>}, {transform_indices = @transform_1, window_bounds = array<i64: 1, 1, 32, 8>}, {transform_indices = @transform_2, window_bounds = array<i64: 1, 1, 32, 8>}, {transform_indices = @transform_3, window_bounds = array<i64: 1, 1, 32>}, {transform_indices = @transform_4, window_bounds = array<i64: 1, 1, 32, 8>}]} {
    %c0 = arith.constant 0 : index
    %c0_0 = arith.constant 0 : index
    %c0_1 = arith.constant 0 : index
    %c0_2 = arith.constant 0 : index
    %0 = vector.load %arg2[%c0, %c0_0, %c0_1, %c0_2] : memref<1x1x32x8xf32, #tpu.memory_space<vmem>>, vector<1x1x32x8xf32>
    %1 = vector.shape_cast %0 : vector<1x1x32x8xf32> to vector<32x8xf32>
    %c0_3 = arith.constant 0 : index
    %c0_4 = arith.constant 0 : index
    %c0_5 = arith.constant 0 : index
    %c0_6 = arith.constant 0 : index
    %2 = vector.load %arg3[%c0_3, %c0_4, %c0_5, %c0_6] : memref<1x1x32x8xf32, #tpu.memory_space<vmem>>, vector<1x1x32x8xf32>
    %3 = vector.shape_cast %2 : vector<1x1x32x8xf32> to vector<32x8xf32>
    %c0_7 = arith.constant 0 : index
    %c0_8 = arith.constant 0 : index
    %c0_9 = arith.constant 0 : index
    %c0_10 = arith.constant 0 : index
    %4 = vector.load %arg4[%c0_7, %c0_8, %c0_9, %c0_10] : memref<1x1x32x8xf32, #tpu.memory_space<vmem>>, vector<1x1x32x8xf32>
    %5 = vector.shape_cast %4 : vector<1x1x32x8xf32> to vector<32x8xf32>
    %c0_11 = arith.constant 0 : index
    %c0_12 = arith.constant 0 : index
    %c0_13 = arith.constant 0 : index
    %6 = vector.load %arg5[%c0_11, %c0_12, %c0_13] : memref<1x1x32xf32, #tpu.memory_space<vmem>>, vector<1x1x32xf32>
    %7 = vector.shape_cast %6 : vector<1x1x32xf32> to vector<1x32xf32>
    %cst = arith.constant dense<0.000000e+00> : vector<32x32xf32>
    %8 = tpu.matmul %1, %3, %cst {dimension_numbers = #tpu.dot_dimension_numbers<[1], [1], [0], [0], [0, 0, 1, 0], [], []>} : vector<32x8xf32>, vector<32x8xf32>, vector<32x32xf32> -> vector<32x32xf32>
    %cst_14 = arith.constant 0.353553385 : f32
    %9 = vector.broadcast %cst_14 : f32 to vector<32x32xf32>
    %10 = arith.mulf %8, %9 : vector<32x32xf32>
    %11 = vector.broadcast %7 : vector<1x32xf32> to vector<32x32xf32>
    %12 = arith.addf %10, %11 : vector<32x32xf32>
    %cst_15 = arith.constant dense<0xFF800000> : vector<32xf32>
    %13 = vector.multi_reduction <maximumf>, %12, %cst_15 [1] : vector<32x32xf32> to vector<32xf32>
    %14 = vector.shape_cast %13 : vector<32xf32> to vector<32x1xf32>
    %15 = vector.broadcast %14 : vector<32x1xf32> to vector<32x32xf32>
    %16 = arith.subf %12, %15 : vector<32x32xf32>
    %17 = math.exp %16 : vector<32x32xf32>
    %cst_16 = arith.constant dense<0.000000e+00> : vector<32xf32>
    %18 = vector.multi_reduction <add>, %17, %cst_16 [1] : vector<32x32xf32> to vector<32xf32>
    %19 = vector.shape_cast %18 : vector<32xf32> to vector<32x1xf32>
    %20 = vector.broadcast %19 : vector<32x1xf32> to vector<32x32xf32>
    %21 = arith.divf %17, %20 : vector<32x32xf32>
    %cst_17 = arith.constant dense<0.000000e+00> : vector<32x8xf32>
    %22 = tpu.matmul %21, %5, %cst_17 {dimension_numbers = #tpu.dot_dimension_numbers<[1], [0], [0], [1], [0, 0, 1, 1], [], []>} : vector<32x32xf32>, vector<32x8xf32>, vector<32x8xf32> -> vector<32x8xf32>
    %23 = vector.shape_cast %22 : vector<32x8xf32> to vector<1x1x32x8xf32>
    %c0_18 = arith.constant 0 : index
    %c0_19 = arith.constant 0 : index
    %c0_20 = arith.constant 0 : index
    %c0_21 = arith.constant 0 : index
    %24 = vector.load %arg6[%c0_18, %c0_19, %c0_20, %c0_21] : memref<1x1x32x8xf32, #tpu.memory_space<vmem>>, vector<1x1x32x8xf32>
    tpu.vector_store %arg6[%c0_18, %c0_19, %c0_20, %c0_21], %23 {strides = array<i32>} : memref<1x1x32x8xf32, #tpu.memory_space<vmem>>, vector<1x1x32x8xf32>,
    return
  }
  func.func @transform_0(%arg0: i32, %arg1: i32) -> (i32, i32, i32, i32) {
    %c0_i32 = arith.constant 0 : i32
    %c0_i32_0 = arith.constant 0 : i32
    %c0_i32_1 = arith.constant 0 : i32
    return %arg0, %arg1, %c0_i32, %c0_i32_0 : i32, i32, i32, i32
  }
  func.func @transform_1(%arg0: i32, %arg1: i32) -> (i32, i32, i32, i32) {
    %c0_i32 = arith.constant 0 : i32
    %c0_i32_0 = arith.constant 0 : i32
    %c0_i32_1 = arith.constant 0 : i32
    return %arg0, %arg1, %c0_i32, %c0_i32_0 : i32, i32, i32, i32
  }
  func.func @transform_2(%arg0: i32, %arg1: i32) -> (i32, i32, i32, i32) {
    %c0_i32 = arith.constant 0 : i32
    %c0_i32_0 = arith.constant 0 : i32
    %c0_i32_1 = arith.constant 0 : i32
    return %arg0, %arg1, %c0_i32, %c0_i32_0 : i32, i32, i32, i32
  }
  func.func @transform_3(%arg0: i32, %arg1: i32) -> (i32, i32, i32) {
    %c0_i32 = arith.constant 0 : i32
    %c0_i32_0 = arith.constant 0 : i32
    %c0_i32_1 = arith.constant 0 : i32
    return %arg0, %c0_i32, %c0_i32_0 : i32, i32, i32
  }
  func.func @transform_4(%arg0: i32, %arg1: i32) -> (i32, i32, i32, i32) {
    %c0_i32 = arith.constant 0 : i32
    %c0_i32_0 = arith.constant 0 : i32
    %c0_i32_1 = arith.constant 0 : i32
    return %arg0, %arg1, %c0_i32, %c0_i32_0 : i32, i32, i32, i32
  }
}

module attributes {stable_mosaic.version = 11 : i64} {
  func.func @_linear_kernel(%arg0: i32, %arg1: memref<64x32xf32, #tpu.memory_space<vmem>>, %arg2: memref<32x32xf32, #tpu.memory_space<vmem>>, %arg3: memref<1x32xf32, #tpu.memory_space<vmem>>, %arg4: memref<64x32xf32, #tpu.memory_space<vmem>>) attributes {dimension_semantics = [#tpu.dimension_semantics<parallel>], iteration_bounds = array<i64: 1>, scalar_prefetch = 0 : i64, scratch_operands = 0 : i64, tpu.core_type = #tpu.core_type<tc>, window_params = [{transform_indices = @transform_0, window_bounds = array<i64: 64, 32>}, {pipeline_mode = #tpu.pipeline_mode<synchronous>, transform_indices = @transform_1, window_bounds = array<i64: 32, 32>}, {pipeline_mode = #tpu.pipeline_mode<synchronous>, transform_indices = @transform_2, window_bounds = array<i64: 1, 32>}, {transform_indices = @transform_3, window_bounds = array<i64: 64, 32>}]} {
    %c0 = arith.constant 0 : index
    %c0_0 = arith.constant 0 : index
    %0 = vector.load %arg1[%c0, %c0_0] : memref<64x32xf32, #tpu.memory_space<vmem>>, vector<64x32xf32>
    %c0_1 = arith.constant 0 : index
    %c0_2 = arith.constant 0 : index
    %1 = vector.load %arg2[%c0_1, %c0_2] : memref<32x32xf32, #tpu.memory_space<vmem>>, vector<32x32xf32>
    %cst = arith.constant dense<0.000000e+00> : vector<64x32xf32>
    %2 = tpu.matmul %0, %1, %cst {dimension_numbers = #tpu.dot_dimension_numbers<[1], [0], [0], [1], [0, 0, 1, 1], [], []>} : vector<64x32xf32>, vector<32x32xf32>, vector<64x32xf32> -> vector<64x32xf32>
    %c0_3 = arith.constant 0 : index
    %c0_4 = arith.constant 0 : index
    %3 = vector.load %arg3[%c0_3, %c0_4] : memref<1x32xf32, #tpu.memory_space<vmem>>, vector<1x32xf32>
    %4 = vector.broadcast %3 : vector<1x32xf32> to vector<64x32xf32>
    %5 = arith.addf %2, %4 : vector<64x32xf32>
    %c0_5 = arith.constant 0 : index
    %c0_6 = arith.constant 0 : index
    %6 = vector.load %arg4[%c0_5, %c0_6] : memref<64x32xf32, #tpu.memory_space<vmem>>, vector<64x32xf32>
    tpu.vector_store %arg4[%c0_5, %c0_6], %5 {strides = array<i32>} : memref<64x32xf32, #tpu.memory_space<vmem>>, vector<64x32xf32>,
    return
  }
  func.func @transform_0(%arg0: i32) -> (i32, i32) {
    %c0_i32 = arith.constant 0 : i32
    %c0_i32_0 = arith.constant 0 : i32
    return %arg0, %c0_i32 : i32, i32
  }
  func.func @transform_1(%arg0: i32) -> (i32, i32) {
    %c0_i32 = arith.constant 0 : i32
    %c0_i32_0 = arith.constant 0 : i32
    %c0_i32_1 = arith.constant 0 : i32
    return %c0_i32, %c0_i32_0 : i32, i32
  }
  func.func @transform_2(%arg0: i32) -> (i32, i32) {
    %c0_i32 = arith.constant 0 : i32
    %c0_i32_0 = arith.constant 0 : i32
    %c0_i32_1 = arith.constant 0 : i32
    return %c0_i32, %c0_i32_0 : i32, i32
  }
  func.func @transform_3(%arg0: i32) -> (i32, i32) {
    %c0_i32 = arith.constant 0 : i32
    %c0_i32_0 = arith.constant 0 : i32
    return %arg0, %c0_i32 : i32, i32
  }
}

module attributes {stable_mosaic.version = 11 : i64} {
  func.func @_linear_kernel(%arg0: i32, %arg1: memref<64x32xf32, #tpu.memory_space<vmem>>, %arg2: memref<32x128xf32, #tpu.memory_space<vmem>>, %arg3: memref<1x128xf32, #tpu.memory_space<vmem>>, %arg4: memref<64x128xf32, #tpu.memory_space<vmem>>) attributes {dimension_semantics = [#tpu.dimension_semantics<parallel>], iteration_bounds = array<i64: 1>, scalar_prefetch = 0 : i64, scratch_operands = 0 : i64, tpu.core_type = #tpu.core_type<tc>, window_params = [{transform_indices = @transform_0, window_bounds = array<i64: 64, 32>}, {pipeline_mode = #tpu.pipeline_mode<synchronous>, transform_indices = @transform_1, window_bounds = array<i64: 32, 128>}, {pipeline_mode = #tpu.pipeline_mode<synchronous>, transform_indices = @transform_2, window_bounds = array<i64: 1, 128>}, {transform_indices = @transform_3, window_bounds = array<i64: 64, 128>}]} {
    %c0 = arith.constant 0 : index
    %c0_0 = arith.constant 0 : index
    %0 = vector.load %arg1[%c0, %c0_0] : memref<64x32xf32, #tpu.memory_space<vmem>>, vector<64x32xf32>
    %c0_1 = arith.constant 0 : index
    %c0_2 = arith.constant 0 : index
    %1 = vector.load %arg2[%c0_1, %c0_2] : memref<32x128xf32, #tpu.memory_space<vmem>>, vector<32x128xf32>
    %cst = arith.constant dense<0.000000e+00> : vector<64x128xf32>
    %2 = tpu.matmul %0, %1, %cst {dimension_numbers = #tpu.dot_dimension_numbers<[1], [0], [0], [1], [0, 0, 1, 1], [], []>} : vector<64x32xf32>, vector<32x128xf32>, vector<64x128xf32> -> vector<64x128xf32>
    %c0_3 = arith.constant 0 : index
    %c0_4 = arith.constant 0 : index
    %3 = vector.load %arg3[%c0_3, %c0_4] : memref<1x128xf32, #tpu.memory_space<vmem>>, vector<1x128xf32>
    %4 = vector.broadcast %3 : vector<1x128xf32> to vector<64x128xf32>
    %5 = arith.addf %2, %4 : vector<64x128xf32>
    %cst_5 = arith.constant 0.000000e+00 : f32
    %6 = vector.broadcast %cst_5 : f32 to vector<64x128xf32>
    %7 = arith.maximumf %5, %6 : vector<64x128xf32>
    %c0_6 = arith.constant 0 : index
    %c0_7 = arith.constant 0 : index
    %8 = vector.load %arg4[%c0_6, %c0_7] : memref<64x128xf32, #tpu.memory_space<vmem>>, vector<64x128xf32>
    tpu.vector_store %arg4[%c0_6, %c0_7], %7 {strides = array<i32>} : memref<64x128xf32, #tpu.memory_space<vmem>>, vector<64x128xf32>,
    return
  }
  func.func @transform_0(%arg0: i32) -> (i32, i32) {
    %c0_i32 = arith.constant 0 : i32
    %c0_i32_0 = arith.constant 0 : i32
    return %arg0, %c0_i32 : i32, i32
  }
  func.func @transform_1(%arg0: i32) -> (i32, i32) {
    %c0_i32 = arith.constant 0 : i32
    %c0_i32_0 = arith.constant 0 : i32
    %c0_i32_1 = arith.constant 0 : i32
    return %c0_i32, %c0_i32_0 : i32, i32
  }
  func.func @transform_2(%arg0: i32) -> (i32, i32) {
    %c0_i32 = arith.constant 0 : i32
    %c0_i32_0 = arith.constant 0 : i32
    %c0_i32_1 = arith.constant 0 : i32
    return %c0_i32, %c0_i32_0 : i32, i32
  }
  func.func @transform_3(%arg0: i32) -> (i32, i32) {
    %c0_i32 = arith.constant 0 : i32
    %c0_i32_0 = arith.constant 0 : i32
    return %arg0, %c0_i32 : i32, i32
  }
}

module attributes {stable_mosaic.version = 11 : i64} {
  func.func @_add_ln_kernel(%arg0: i32, %arg1: memref<64x32xf32, #tpu.memory_space<vmem>>, %arg2: memref<64x32xf32, #tpu.memory_space<vmem>>, %arg3: memref<1x32xf32, #tpu.memory_space<vmem>>, %arg4: memref<1x32xf32, #tpu.memory_space<vmem>>, %arg5: memref<64x32xf32, #tpu.memory_space<vmem>>) attributes {dimension_semantics = [#tpu.dimension_semantics<parallel>], iteration_bounds = array<i64: 1>, scalar_prefetch = 0 : i64, scratch_operands = 0 : i64, tpu.core_type = #tpu.core_type<tc>, window_params = [{transform_indices = @transform_0, window_bounds = array<i64: 64, 32>}, {transform_indices = @transform_1, window_bounds = array<i64: 64, 32>}, {pipeline_mode = #tpu.pipeline_mode<synchronous>, transform_indices = @transform_2, window_bounds = array<i64: 1, 32>}, {pipeline_mode = #tpu.pipeline_mode<synchronous>, transform_indices = @transform_3, window_bounds = array<i64: 1, 32>}, {transform_indices = @transform_4, window_bounds = array<i64: 64, 32>}]} {
    %c0 = arith.constant 0 : index
    %c0_0 = arith.constant 0 : index
    %0 = vector.load %arg1[%c0, %c0_0] : memref<64x32xf32, #tpu.memory_space<vmem>>, vector<64x32xf32>
    %c0_1 = arith.constant 0 : index
    %c0_2 = arith.constant 0 : index
    %1 = vector.load %arg2[%c0_1, %c0_2] : memref<64x32xf32, #tpu.memory_space<vmem>>, vector<64x32xf32>
    %2 = arith.addf %0, %1 : vector<64x32xf32>
    %cst = arith.constant dense<0.000000e+00> : vector<64xf32>
    %3 = vector.multi_reduction <add>, %2, %cst [1] : vector<64x32xf32> to vector<64xf32>
    %4 = vector.shape_cast %3 : vector<64xf32> to vector<64x1xf32>
    %cst_3 = arith.constant 3.200000e+01 : f32
    %5 = vector.broadcast %cst_3 : f32 to vector<64x1xf32>
    %6 = arith.divf %4, %5 : vector<64x1xf32>
    %7 = vector.broadcast %6 : vector<64x1xf32> to vector<64x32xf32>
    %8 = arith.subf %2, %7 : vector<64x32xf32>
    %9 = arith.mulf %8, %8 : vector<64x32xf32>
    %cst_4 = arith.constant dense<0.000000e+00> : vector<64xf32>
    %10 = vector.multi_reduction <add>, %9, %cst_4 [1] : vector<64x32xf32> to vector<64xf32>
    %11 = vector.shape_cast %10 : vector<64xf32> to vector<64x1xf32>
    %cst_5 = arith.constant 3.200000e+01 : f32
    %12 = vector.broadcast %cst_5 : f32 to vector<64x1xf32>
    %13 = arith.divf %11, %12 : vector<64x1xf32>
    %cst_6 = arith.constant 9.99999974E-6 : f32
    %14 = vector.broadcast %cst_6 : f32 to vector<64x1xf32>
    %15 = arith.addf %13, %14 : vector<64x1xf32>
    %16 = math.rsqrt %15 : vector<64x1xf32>
    %17 = vector.broadcast %16 : vector<64x1xf32> to vector<64x32xf32>
    %18 = arith.mulf %8, %17 : vector<64x32xf32>
    %c0_7 = arith.constant 0 : index
    %c0_8 = arith.constant 0 : index
    %19 = vector.load %arg3[%c0_7, %c0_8] : memref<1x32xf32, #tpu.memory_space<vmem>>, vector<1x32xf32>
    %20 = vector.broadcast %19 : vector<1x32xf32> to vector<64x32xf32>
    %21 = arith.mulf %18, %20 : vector<64x32xf32>
    %c0_9 = arith.constant 0 : index
    %c0_10 = arith.constant 0 : index
    %22 = vector.load %arg4[%c0_9, %c0_10] : memref<1x32xf32, #tpu.memory_space<vmem>>, vector<1x32xf32>
    %23 = vector.broadcast %22 : vector<1x32xf32> to vector<64x32xf32>
    %24 = arith.addf %21, %23 : vector<64x32xf32>
    %c0_11 = arith.constant 0 : index
    %c0_12 = arith.constant 0 : index
    %25 = vector.load %arg5[%c0_11, %c0_12] : memref<64x32xf32, #tpu.memory_space<vmem>>, vector<64x32xf32>
    tpu.vector_store %arg5[%c0_11, %c0_12], %24 {strides = array<i32>} : memref<64x32xf32, #tpu.memory_space<vmem>>, vector<64x32xf32>,
    return
  }
  func.func @transform_0(%arg0: i32) -> (i32, i32) {
    %c0_i32 = arith.constant 0 : i32
    %c0_i32_0 = arith.constant 0 : i32
    return %arg0, %c0_i32 : i32, i32
  }
  func.func @transform_1(%arg0: i32) -> (i32, i32) {
    %c0_i32 = arith.constant 0 : i32
    %c0_i32_0 = arith.constant 0 : i32
    return %arg0, %c0_i32 : i32, i32
  }
  func.func @transform_2(%arg0: i32) -> (i32, i32) {
    %c0_i32 = arith.constant 0 : i32
    %c0_i32_0 = arith.constant 0 : i32
    %c0_i32_1 = arith.constant 0 : i32
    return %c0_i32, %c0_i32_0 : i32, i32
  }
  func.func @transform_3(%arg0: i32) -> (i32, i32) {
    %c0_i32 = arith.constant 0 : i32
    %c0_i32_0 = arith.constant 0 : i32
    %c0_i32_1 = arith.constant 0 : i32
    return %c0_i32, %c0_i32_0 : i32, i32
  }
  func.func @transform_4(%arg0: i32) -> (i32, i32) {
    %c0_i32 = arith.constant 0 : i32
    %c0_i32_0 = arith.constant 0 : i32
    return %arg0, %c0_i32 : i32, i32
  }
}

module attributes {stable_mosaic.version = 11 : i64} {
  func.func @_linear_kernel(%arg0: i32, %arg1: memref<64x128xf32, #tpu.memory_space<vmem>>, %arg2: memref<128x32xf32, #tpu.memory_space<vmem>>, %arg3: memref<1x32xf32, #tpu.memory_space<vmem>>, %arg4: memref<64x32xf32, #tpu.memory_space<vmem>>) attributes {dimension_semantics = [#tpu.dimension_semantics<parallel>], iteration_bounds = array<i64: 1>, scalar_prefetch = 0 : i64, scratch_operands = 0 : i64, tpu.core_type = #tpu.core_type<tc>, window_params = [{transform_indices = @transform_0, window_bounds = array<i64: 64, 128>}, {pipeline_mode = #tpu.pipeline_mode<synchronous>, transform_indices = @transform_1, window_bounds = array<i64: 128, 32>}, {pipeline_mode = #tpu.pipeline_mode<synchronous>, transform_indices = @transform_2, window_bounds = array<i64: 1, 32>}, {transform_indices = @transform_3, window_bounds = array<i64: 64, 32>}]} {
    %c0 = arith.constant 0 : index
    %c0_0 = arith.constant 0 : index
    %0 = vector.load %arg1[%c0, %c0_0] : memref<64x128xf32, #tpu.memory_space<vmem>>, vector<64x128xf32>
    %c0_1 = arith.constant 0 : index
    %c0_2 = arith.constant 0 : index
    %1 = vector.load %arg2[%c0_1, %c0_2] : memref<128x32xf32, #tpu.memory_space<vmem>>, vector<128x32xf32>
    %cst = arith.constant dense<0.000000e+00> : vector<64x32xf32>
    %2 = tpu.matmul %0, %1, %cst {dimension_numbers = #tpu.dot_dimension_numbers<[1], [0], [0], [1], [0, 0, 1, 1], [], []>} : vector<64x128xf32>, vector<128x32xf32>, vector<64x32xf32> -> vector<64x32xf32>
    %c0_3 = arith.constant 0 : index
    %c0_4 = arith.constant 0 : index
    %3 = vector.load %arg3[%c0_3, %c0_4] : memref<1x32xf32, #tpu.memory_space<vmem>>, vector<1x32xf32>
    %4 = vector.broadcast %3 : vector<1x32xf32> to vector<64x32xf32>
    %5 = arith.addf %2, %4 : vector<64x32xf32>
    %c0_5 = arith.constant 0 : index
    %c0_6 = arith.constant 0 : index
    %6 = vector.load %arg4[%c0_5, %c0_6] : memref<64x32xf32, #tpu.memory_space<vmem>>, vector<64x32xf32>
    tpu.vector_store %arg4[%c0_5, %c0_6], %5 {strides = array<i32>} : memref<64x32xf32, #tpu.memory_space<vmem>>, vector<64x32xf32>,
    return
  }
  func.func @transform_0(%arg0: i32) -> (i32, i32) {
    %c0_i32 = arith.constant 0 : i32
    %c0_i32_0 = arith.constant 0 : i32
    return %arg0, %c0_i32 : i32, i32
  }
  func.func @transform_1(%arg0: i32) -> (i32, i32) {
    %c0_i32 = arith.constant 0 : i32
    %c0_i32_0 = arith.constant 0 : i32
    %c0_i32_1 = arith.constant 0 : i32
    return %c0_i32, %c0_i32_0 : i32, i32
  }
  func.func @transform_2(%arg0: i32) -> (i32, i32) {
    %c0_i32 = arith.constant 0 : i32
    %c0_i32_0 = arith.constant 0 : i32
    %c0_i32_1 = arith.constant 0 : i32
    return %c0_i32, %c0_i32_0 : i32, i32
  }
  func.func @transform_3(%arg0: i32) -> (i32, i32) {
    %c0_i32 = arith.constant 0 : i32
    %c0_i32_0 = arith.constant 0 : i32
    return %arg0, %c0_i32 : i32, i32
  }
}

module attributes {stable_mosaic.version = 11 : i64} {
  func.func @_linear_kernel(%arg0: i32, %arg1: memref<64x32xf32, #tpu.memory_space<vmem>>, %arg2: memref<32x96xf32, #tpu.memory_space<vmem>>, %arg3: memref<1x96xf32, #tpu.memory_space<vmem>>, %arg4: memref<64x96xf32, #tpu.memory_space<vmem>>) attributes {dimension_semantics = [#tpu.dimension_semantics<parallel>], iteration_bounds = array<i64: 1>, scalar_prefetch = 0 : i64, scratch_operands = 0 : i64, tpu.core_type = #tpu.core_type<tc>, window_params = [{transform_indices = @transform_0, window_bounds = array<i64: 64, 32>}, {pipeline_mode = #tpu.pipeline_mode<synchronous>, transform_indices = @transform_1, window_bounds = array<i64: 32, 96>}, {pipeline_mode = #tpu.pipeline_mode<synchronous>, transform_indices = @transform_2, window_bounds = array<i64: 1, 96>}, {transform_indices = @transform_3, window_bounds = array<i64: 64, 96>}]} {
    %c0 = arith.constant 0 : index
    %c0_0 = arith.constant 0 : index
    %0 = vector.load %arg1[%c0, %c0_0] : memref<64x32xf32, #tpu.memory_space<vmem>>, vector<64x32xf32>
    %c0_1 = arith.constant 0 : index
    %c0_2 = arith.constant 0 : index
    %1 = vector.load %arg2[%c0_1, %c0_2] : memref<32x96xf32, #tpu.memory_space<vmem>>, vector<32x96xf32>
    %cst = arith.constant dense<0.000000e+00> : vector<64x96xf32>
    %2 = tpu.matmul %0, %1, %cst {dimension_numbers = #tpu.dot_dimension_numbers<[1], [0], [0], [1], [0, 0, 1, 1], [], []>} : vector<64x32xf32>, vector<32x96xf32>, vector<64x96xf32> -> vector<64x96xf32>
    %c0_3 = arith.constant 0 : index
    %c0_4 = arith.constant 0 : index
    %3 = vector.load %arg3[%c0_3, %c0_4] : memref<1x96xf32, #tpu.memory_space<vmem>>, vector<1x96xf32>
    %4 = vector.broadcast %3 : vector<1x96xf32> to vector<64x96xf32>
    %5 = arith.addf %2, %4 : vector<64x96xf32>
    %c0_5 = arith.constant 0 : index
    %c0_6 = arith.constant 0 : index
    %6 = vector.load %arg4[%c0_5, %c0_6] : memref<64x96xf32, #tpu.memory_space<vmem>>, vector<64x96xf32>
    tpu.vector_store %arg4[%c0_5, %c0_6], %5 {strides = array<i32>} : memref<64x96xf32, #tpu.memory_space<vmem>>, vector<64x96xf32>,
    return
  }
  func.func @transform_0(%arg0: i32) -> (i32, i32) {
    %c0_i32 = arith.constant 0 : i32
    %c0_i32_0 = arith.constant 0 : i32
    return %arg0, %c0_i32 : i32, i32
  }
  func.func @transform_1(%arg0: i32) -> (i32, i32) {
    %c0_i32 = arith.constant 0 : i32
    %c0_i32_0 = arith.constant 0 : i32
    %c0_i32_1 = arith.constant 0 : i32
    return %c0_i32, %c0_i32_0 : i32, i32
  }
  func.func @transform_2(%arg0: i32) -> (i32, i32) {
    %c0_i32 = arith.constant 0 : i32
    %c0_i32_0 = arith.constant 0 : i32
    %c0_i32_1 = arith.constant 0 : i32
    return %c0_i32, %c0_i32_0 : i32, i32
  }
  func.func @transform_3(%arg0: i32) -> (i32, i32) {
    %c0_i32 = arith.constant 0 : i32
    %c0_i32_0 = arith.constant 0 : i32
    return %arg0, %c0_i32 : i32, i32
  }
}

module attributes {stable_mosaic.version = 11 : i64} {
  func.func @_ln_kernel(%arg0: i32, %arg1: memref<64x32xf32, #tpu.memory_space<vmem>>, %arg2: memref<1x32xf32, #tpu.memory_space<vmem>>, %arg3: memref<1x32xf32, #tpu.memory_space<vmem>>, %arg4: memref<64x32xf32, #tpu.memory_space<vmem>>) attributes {dimension_semantics = [#tpu.dimension_semantics<parallel>], iteration_bounds = array<i64: 1>, scalar_prefetch = 0 : i64, scratch_operands = 0 : i64, tpu.core_type = #tpu.core_type<tc>, window_params = [{transform_indices = @transform_0, window_bounds = array<i64: 64, 32>}, {pipeline_mode = #tpu.pipeline_mode<synchronous>, transform_indices = @transform_1, window_bounds = array<i64: 1, 32>}, {pipeline_mode = #tpu.pipeline_mode<synchronous>, transform_indices = @transform_2, window_bounds = array<i64: 1, 32>}, {transform_indices = @transform_3, window_bounds = array<i64: 64, 32>}]} {
    %c0 = arith.constant 0 : index
    %c0_0 = arith.constant 0 : index
    %0 = vector.load %arg1[%c0, %c0_0] : memref<64x32xf32, #tpu.memory_space<vmem>>, vector<64x32xf32>
    %cst = arith.constant dense<0.000000e+00> : vector<64xf32>
    %1 = vector.multi_reduction <add>, %0, %cst [1] : vector<64x32xf32> to vector<64xf32>
    %2 = vector.shape_cast %1 : vector<64xf32> to vector<64x1xf32>
    %cst_1 = arith.constant 3.200000e+01 : f32
    %3 = vector.broadcast %cst_1 : f32 to vector<64x1xf32>
    %4 = arith.divf %2, %3 : vector<64x1xf32>
    %5 = vector.broadcast %4 : vector<64x1xf32> to vector<64x32xf32>
    %6 = arith.subf %0, %5 : vector<64x32xf32>
    %7 = arith.mulf %6, %6 : vector<64x32xf32>
    %cst_2 = arith.constant dense<0.000000e+00> : vector<64xf32>
    %8 = vector.multi_reduction <add>, %7, %cst_2 [1] : vector<64x32xf32> to vector<64xf32>
    %9 = vector.shape_cast %8 : vector<64xf32> to vector<64x1xf32>
    %cst_3 = arith.constant 3.200000e+01 : f32
    %10 = vector.broadcast %cst_3 : f32 to vector<64x1xf32>
    %11 = arith.divf %9, %10 : vector<64x1xf32>
    %cst_4 = arith.constant 9.99999974E-6 : f32
    %12 = vector.broadcast %cst_4 : f32 to vector<64x1xf32>
    %13 = arith.addf %11, %12 : vector<64x1xf32>
    %14 = math.rsqrt %13 : vector<64x1xf32>
    %15 = vector.broadcast %14 : vector<64x1xf32> to vector<64x32xf32>
    %16 = arith.mulf %6, %15 : vector<64x32xf32>
    %c0_5 = arith.constant 0 : index
    %c0_6 = arith.constant 0 : index
    %17 = vector.load %arg2[%c0_5, %c0_6] : memref<1x32xf32, #tpu.memory_space<vmem>>, vector<1x32xf32>
    %18 = vector.broadcast %17 : vector<1x32xf32> to vector<64x32xf32>
    %19 = arith.mulf %16, %18 : vector<64x32xf32>
    %c0_7 = arith.constant 0 : index
    %c0_8 = arith.constant 0 : index
    %20 = vector.load %arg3[%c0_7, %c0_8] : memref<1x32xf32, #tpu.memory_space<vmem>>, vector<1x32xf32>
    %21 = vector.broadcast %20 : vector<1x32xf32> to vector<64x32xf32>
    %22 = arith.addf %19, %21 : vector<64x32xf32>
    %c0_9 = arith.constant 0 : index
    %c0_10 = arith.constant 0 : index
    %23 = vector.load %arg4[%c0_9, %c0_10] : memref<64x32xf32, #tpu.memory_space<vmem>>, vector<64x32xf32>
    tpu.vector_store %arg4[%c0_9, %c0_10], %22 {strides = array<i32>} : memref<64x32xf32, #tpu.memory_space<vmem>>, vector<64x32xf32>,
    return
  }
  func.func @transform_0(%arg0: i32) -> (i32, i32) {
    %c0_i32 = arith.constant 0 : i32
    %c0_i32_0 = arith.constant 0 : i32
    return %arg0, %c0_i32 : i32, i32
  }
  func.func @transform_1(%arg0: i32) -> (i32, i32) {
    %c0_i32 = arith.constant 0 : i32
    %c0_i32_0 = arith.constant 0 : i32
    %c0_i32_1 = arith.constant 0 : i32
    return %c0_i32, %c0_i32_0 : i32, i32
  }
  func.func @transform_2(%arg0: i32) -> (i32, i32) {
    %c0_i32 = arith.constant 0 : i32
    %c0_i32_0 = arith.constant 0 : i32
    %c0_i32_1 = arith.constant 0 : i32
    return %c0_i32, %c0_i32_0 : i32, i32
  }
  func.func @transform_3(%arg0: i32) -> (i32, i32) {
    %c0_i32 = arith.constant 0 : i32
    %c0_i32_0 = arith.constant 0 : i32
    return %arg0, %c0_i32 : i32, i32
  }
}

module attributes {stable_mosaic.version = 11 : i64} {
  func.func @_linear_kernel(%arg0: i32, %arg1: memref<2x32xf32, #tpu.memory_space<vmem>>, %arg2: memref<32x128xf32, #tpu.memory_space<vmem>>, %arg3: memref<1x128xf32, #tpu.memory_space<vmem>>, %arg4: memref<2x128xf32, #tpu.memory_space<vmem>>) attributes {dimension_semantics = [#tpu.dimension_semantics<parallel>], iteration_bounds = array<i64: 1>, scalar_prefetch = 0 : i64, scratch_operands = 0 : i64, tpu.core_type = #tpu.core_type<tc>, window_params = [{transform_indices = @transform_0, window_bounds = array<i64: 2, 32>}, {pipeline_mode = #tpu.pipeline_mode<synchronous>, transform_indices = @transform_1, window_bounds = array<i64: 32, 128>}, {pipeline_mode = #tpu.pipeline_mode<synchronous>, transform_indices = @transform_2, window_bounds = array<i64: 1, 128>}, {transform_indices = @transform_3, window_bounds = array<i64: 2, 128>}]} {
    %c0 = arith.constant 0 : index
    %c0_0 = arith.constant 0 : index
    %0 = vector.load %arg1[%c0, %c0_0] : memref<2x32xf32, #tpu.memory_space<vmem>>, vector<2x32xf32>
    %c0_1 = arith.constant 0 : index
    %c0_2 = arith.constant 0 : index
    %1 = vector.load %arg2[%c0_1, %c0_2] : memref<32x128xf32, #tpu.memory_space<vmem>>, vector<32x128xf32>
    %cst = arith.constant dense<0.000000e+00> : vector<2x128xf32>
    %2 = tpu.matmul %0, %1, %cst {dimension_numbers = #tpu.dot_dimension_numbers<[1], [0], [0], [1], [0, 0, 1, 1], [], []>} : vector<2x32xf32>, vector<32x128xf32>, vector<2x128xf32> -> vector<2x128xf32>
    %c0_3 = arith.constant 0 : index
    %c0_4 = arith.constant 0 : index
    %3 = vector.load %arg3[%c0_3, %c0_4] : memref<1x128xf32, #tpu.memory_space<vmem>>, vector<1x128xf32>
    %4 = vector.broadcast %3 : vector<1x128xf32> to vector<2x128xf32>
    %5 = arith.addf %2, %4 : vector<2x128xf32>
    %cst_5 = arith.constant 0.000000e+00 : f32
    %6 = vector.broadcast %cst_5 : f32 to vector<2x128xf32>
    %7 = arith.maximumf %5, %6 : vector<2x128xf32>
    %c0_6 = arith.constant 0 : index
    %c0_7 = arith.constant 0 : index
    %8 = vector.load %arg4[%c0_6, %c0_7] : memref<2x128xf32, #tpu.memory_space<vmem>>, vector<2x128xf32>
    tpu.vector_store %arg4[%c0_6, %c0_7], %7 {strides = array<i32>} : memref<2x128xf32, #tpu.memory_space<vmem>>, vector<2x128xf32>,
    return
  }
  func.func @transform_0(%arg0: i32) -> (i32, i32) {
    %c0_i32 = arith.constant 0 : i32
    %c0_i32_0 = arith.constant 0 : i32
    return %arg0, %c0_i32 : i32, i32
  }
  func.func @transform_1(%arg0: i32) -> (i32, i32) {
    %c0_i32 = arith.constant 0 : i32
    %c0_i32_0 = arith.constant 0 : i32
    %c0_i32_1 = arith.constant 0 : i32
    return %c0_i32, %c0_i32_0 : i32, i32
  }
  func.func @transform_2(%arg0: i32) -> (i32, i32) {
    %c0_i32 = arith.constant 0 : i32
    %c0_i32_0 = arith.constant 0 : i32
    %c0_i32_1 = arith.constant 0 : i32
    return %c0_i32, %c0_i32_0 : i32, i32
  }
  func.func @transform_3(%arg0: i32) -> (i32, i32) {
    %c0_i32 = arith.constant 0 : i32
    %c0_i32_0 = arith.constant 0 : i32
    return %arg0, %c0_i32 : i32, i32
  }
}

module attributes {stable_mosaic.version = 11 : i64} {
  func.func @_linear_kernel(%arg0: i32, %arg1: memref<2x128xf32, #tpu.memory_space<vmem>>, %arg2: memref<128x5xf32, #tpu.memory_space<vmem>>, %arg3: memref<1x5xf32, #tpu.memory_space<vmem>>, %arg4: memref<2x5xf32, #tpu.memory_space<vmem>>) attributes {dimension_semantics = [#tpu.dimension_semantics<parallel>], iteration_bounds = array<i64: 1>, scalar_prefetch = 0 : i64, scratch_operands = 0 : i64, tpu.core_type = #tpu.core_type<tc>, window_params = [{transform_indices = @transform_0, window_bounds = array<i64: 2, 128>}, {pipeline_mode = #tpu.pipeline_mode<synchronous>, transform_indices = @transform_1, window_bounds = array<i64: 128, 5>}, {pipeline_mode = #tpu.pipeline_mode<synchronous>, transform_indices = @transform_2, window_bounds = array<i64: 1, 5>}, {transform_indices = @transform_3, window_bounds = array<i64: 2, 5>}]} {
    %c0 = arith.constant 0 : index
    %c0_0 = arith.constant 0 : index
    %0 = vector.load %arg1[%c0, %c0_0] : memref<2x128xf32, #tpu.memory_space<vmem>>, vector<2x128xf32>
    %c0_1 = arith.constant 0 : index
    %c0_2 = arith.constant 0 : index
    %1 = vector.load %arg2[%c0_1, %c0_2] : memref<128x5xf32, #tpu.memory_space<vmem>>, vector<128x5xf32>
    %cst = arith.constant dense<0.000000e+00> : vector<2x5xf32>
    %2 = tpu.matmul %0, %1, %cst {dimension_numbers = #tpu.dot_dimension_numbers<[1], [0], [0], [1], [0, 0, 1, 1], [], []>} : vector<2x128xf32>, vector<128x5xf32>, vector<2x5xf32> -> vector<2x5xf32>
    %c0_3 = arith.constant 0 : index
    %c0_4 = arith.constant 0 : index
    %3 = vector.load %arg3[%c0_3, %c0_4] : memref<1x5xf32, #tpu.memory_space<vmem>>, vector<1x5xf32>
    %4 = vector.broadcast %3 : vector<1x5xf32> to vector<2x5xf32>
    %5 = arith.addf %2, %4 : vector<2x5xf32>
    %c0_5 = arith.constant 0 : index
    %c0_6 = arith.constant 0 : index
    %6 = vector.load %arg4[%c0_5, %c0_6] : memref<2x5xf32, #tpu.memory_space<vmem>>, vector<2x5xf32>
    tpu.vector_store %arg4[%c0_5, %c0_6], %5 {strides = array<i32>} : memref<2x5xf32, #tpu.memory_space<vmem>>, vector<2x5xf32>,
    return
  }
  func.func @transform_0(%arg0: i32) -> (i32, i32) {
    %c0_i32 = arith.constant 0 : i32
    %c0_i32_0 = arith.constant 0 : i32
    return %arg0, %c0_i32 : i32, i32
  }
  func.func @transform_1(%arg0: i32) -> (i32, i32) {
    %c0_i32 = arith.constant 0 : i32
    %c0_i32_0 = arith.constant 0 : i32
    %c0_i32_1 = arith.constant 0 : i32
    return %c0_i32, %c0_i32_0 : i32, i32
  }
  func.func @transform_2(%arg0: i32) -> (i32, i32) {
    %c0_i32 = arith.constant 0 : i32
    %c0_i32_0 = arith.constant 0 : i32
    %c0_i32_1 = arith.constant 0 : i32
    return %c0_i32, %c0_i32_0 : i32, i32
  }
  func.func @transform_3(%arg0: i32) -> (i32, i32) {
    %c0_i32 = arith.constant 0 : i32
    %c0_i32_0 = arith.constant 0 : i32
    return %arg0, %c0_i32 : i32, i32
  }
}

module attributes {stable_mosaic.version = 11 : i64} {
  func.func @_linear_kernel(%arg0: i32, %arg1: memref<64x128xf32, #tpu.memory_space<vmem>>, %arg2: memref<128x1xf32, #tpu.memory_space<vmem>>, %arg3: memref<1x1xf32, #tpu.memory_space<vmem>>, %arg4: memref<64x1xf32, #tpu.memory_space<vmem>>) attributes {dimension_semantics = [#tpu.dimension_semantics<parallel>], iteration_bounds = array<i64: 1>, scalar_prefetch = 0 : i64, scratch_operands = 0 : i64, tpu.core_type = #tpu.core_type<tc>, window_params = [{transform_indices = @transform_0, window_bounds = array<i64: 64, 128>}, {pipeline_mode = #tpu.pipeline_mode<synchronous>, transform_indices = @transform_1, window_bounds = array<i64: 128, 1>}, {pipeline_mode = #tpu.pipeline_mode<synchronous>, transform_indices = @transform_2, window_bounds = array<i64: 1, 1>}, {transform_indices = @transform_3, window_bounds = array<i64: 64, 1>}]} {
    %c0 = arith.constant 0 : index
    %c0_0 = arith.constant 0 : index
    %0 = vector.load %arg1[%c0, %c0_0] : memref<64x128xf32, #tpu.memory_space<vmem>>, vector<64x128xf32>
    %c0_1 = arith.constant 0 : index
    %c0_2 = arith.constant 0 : index
    %1 = vector.load %arg2[%c0_1, %c0_2] : memref<128x1xf32, #tpu.memory_space<vmem>>, vector<128x1xf32>
    %cst = arith.constant dense<0.000000e+00> : vector<64x1xf32>
    %2 = tpu.matmul %0, %1, %cst {dimension_numbers = #tpu.dot_dimension_numbers<[1], [0], [0], [1], [0, 0, 1, 1], [], []>} : vector<64x128xf32>, vector<128x1xf32>, vector<64x1xf32> -> vector<64x1xf32>
    %c0_3 = arith.constant 0 : index
    %c0_4 = arith.constant 0 : index
    %3 = vector.load %arg3[%c0_3, %c0_4] : memref<1x1xf32, #tpu.memory_space<vmem>>, vector<1x1xf32>
    %4 = vector.broadcast %3 : vector<1x1xf32> to vector<64x1xf32>
    %5 = arith.addf %2, %4 : vector<64x1xf32>
    %c0_5 = arith.constant 0 : index
    %c0_6 = arith.constant 0 : index
    %6 = vector.load %arg4[%c0_5, %c0_6] : memref<64x1xf32, #tpu.memory_space<vmem>>, vector<64x1xf32>
    tpu.vector_store %arg4[%c0_5, %c0_6], %5 {strides = array<i32>} : memref<64x1xf32, #tpu.memory_space<vmem>>, vector<64x1xf32>,
    return
  }
  func.func @transform_0(%arg0: i32) -> (i32, i32) {
    %c0_i32 = arith.constant 0 : i32
    %c0_i32_0 = arith.constant 0 : i32
    return %arg0, %c0_i32 : i32, i32
  }
  func.func @transform_1(%arg0: i32) -> (i32, i32) {
    %c0_i32 = arith.constant 0 : i32
    %c0_i32_0 = arith.constant 0 : i32
    %c0_i32_1 = arith.constant 0 : i32
    return %c0_i32, %c0_i32_0 : i32, i32
  }
  func.func @transform_2(%arg0: i32) -> (i32, i32) {
    %c0_i32 = arith.constant 0 : i32
    %c0_i32_0 = arith.constant 0 : i32
    %c0_i32_1 = arith.constant 0 : i32
    return %c0_i32, %c0_i32_0 : i32, i32
  }
  func.func @transform_3(%arg0: i32) -> (i32, i32) {
    %c0_i32 = arith.constant 0 : i32
    %c0_i32_0 = arith.constant 0 : i32
    return %arg0, %c0_i32 : i32, i32
  }
}

</mosaic_0001>

<bundles_post_ra>
// kernel: seq_classifier_forward.21
= control target key start
LH: loop header
LB: loop body
LE: loop exit
PB: predicated region body
PF: predicated region fallthrough
CT: control target
= control target key end

     0   :  { %8 = vsyncpa [#allocation3], 0  ;;  %s176_s15 = smov [#allocation2]   ;;  %s177_s17 = smov 128   ;;  %s269_s0 = inlined_call_operand.vmem [shape: f32[64,32], index: 0, kind: input, shape index: {}]   ;;  %s270_s1 = inlined_call_operand.hbm [shape: f32[32,96], index: 1, kind: input, shape index: {}]   ;;  %s271_s2 = inlined_call_operand.vmem [shape: f32[1,96], index: 2, kind: input, shape index: {}]   ;;  %s272_s3 = inlined_call_operand.vmem [shape: f32[64,96], index: 3, kind: output, shape index: {}]  }
   0x1   :  { %s15_s14 = sshll.u32 %s270_s1, 4  ;;  %s17_s16 = sshll.u32 %s176_s15, 4  ;;  %s16_s14 = int_to_ptr.hbm [resolvable:$true] %s15_s14  ;;  %s18_s16 = int_to_ptr.vmem [resolvable:$true] %s17_s16 }
   0x2   :  { %s178_s18 = smov 8  }
   0x3   :  { %23 = dma.hbm_to_vmem [thread:$0]  %s16_s14, 512, %s18_s16, [#allocation3], %s177_s17, %s177_s17, %s178_s18  }
   0x4   :  { %174 = dma.done.wait [#allocation3], 512  }
   0x5   :  { %175 = vsyncadd [#allocation3], 4294966784  ;;  %v41_v0 = vld [vmem:[#allocation2 + $0x18] sm:$0xff]  ;;  %v40_v1 = vld [vmem:[#allocation2 + $0x10] sm:$0xff]  ;;  %vm46_vm0 = vcmask 261120   ;;  %vm112_vm1 = vcmask 785408  }
   0x6   :  { %135 = vmatpush.msra.mxu2 %v41_v0  ;;  %136 = vmatpush.msra.mxu3 %v41_v0  ;;  %v39_v2 = vld [vmem:[#allocation2 + $0x8] sm:$0xff]  ;;  %v38_v3 = vld [vmem:[#allocation2] sm:$0xff]  ;;  %v36_v5 = vld [vmem:[%s269_s0 + $0x30] sm:$0xff] }
   0x7   :  { %83 = vmatpush.msra.mxu0 %v41_v0  ;;  %134 = vmatpush.msra.mxu1 %v41_v0  ;;  %v34_v4 = vld [vmem:[%s269_s0 + $0x20] sm:$0xff]  ;;  %v32_v7 = vld [vmem:[%s269_s0 + $0x10] sm:$0xff]  ;;  %v35_v8 = vld [vmem:[%s269_s0 + $0x28] sm:$0xff] }
   0x8   :  { %138 = vmatpush.msra.mxu2 %v40_v1  ;;  %139 = vmatpush.msra.mxu3 %v40_v1  ;;  %v30_v6 = vld [vmem:[%s269_s0] sm:$0xff]  ;;  %v37_v9 = vld [vmem:[%s269_s0 + $0x38] sm:$0xff]  ;;  %v31_v10 = vld [vmem:[%s269_s0 + $0x8] sm:$0xff] }
   0x9   :  { %84 = vmatpush.msra.mxu0 %v40_v1  ;;  %137 = vmatpush.msra.mxu1 %v40_v1  ;;  %v33_v11 = vld [vmem:[%s269_s0 + $0x18] sm:$0xff]  ;;  %v149_v12 = vld [vmem:[%s271_s2] ss:$0 sm:$0xff] }
   0xa   :  { %141 = vmatpush.msra.mxu2 %v39_v2  ;;  %142 = vmatpush.msra.mxu3 %v39_v2 }
   0xb   :  { %85 = vmatpush.msra.mxu0 %v39_v2  ;;  %140 = vmatpush.msra.mxu1 %v39_v2 }
   0xc   :  { %144 = vmatpush.msra.mxu2 %v38_v3  ;;  %145 = vmatpush.msra.mxu3 %v38_v3 }
   0xd   :  { %130 = vmatmul.msk.f32.vlgmr.msra.gmra.mxu2 %vm46_vm0, %v34_v4  ;;  %132 = vmatmul.msk.f32.vlgmr.msra.gmra.mxu3 %vm46_vm0, %v36_v5 }
   0xe   :  { %86 = vmatpush.msra.mxu0 %v38_v3  ;;  %143 = vmatpush.msra.mxu1 %v38_v3 }
   0xf   :  { %126 = vmatmul.msk.f32.vlgmr.msra.gmra.mxu0 %vm46_vm0, %v30_v6  ;;  %128 = vmatmul.msk.f32.vlgmr.msra.gmra.mxu1 %vm46_vm0, %v32_v7 }
  0x15   :  { %131 = vmatmul.msk.f32.gmra.mxu2 %vm46_vm0, %v35_v8  ;;  %133 = vmatmul.msk.f32.gmra.mxu3 %vm46_vm0, %v37_v9 }
  0x17   :  { %127 = vmatmul.msk.f32.gmra.mxu0 %vm46_vm0, %v31_v10  ;;  %129 = vmatmul.msk.f32.gmra.mxu1 %vm46_vm0, %v33_v11 }
  0x8c   :  { %v88_v13 = vpop.f32.mrf.mxu0  ;;  %v94_v14 = vpop.f32.mrf.mxu1 }
  0x8d   :  { %v89_v15 = vadd.f32 %v149_v12, %v88_v13  ;;  %v95_v16 = vadd.f32 %v149_v12, %v94_v14 }
  0x8f   :  { %113 = vst.msk [vmem:[%s272_s3] sm:$0xff] %vm112_vm1, %v89_v15 }
  0x90   :  { %115 = vst.msk [vmem:[%s272_s3 + $0x10] sm:$0xff] %vm112_vm1, %v95_v16  ;;  %v100_v17 = vpop.f32.mrf.mxu2  ;;  %v106_v18 = vpop.f32.mrf.mxu3 }
  0x91   :  { %v101_v19 = vadd.f32 %v149_v12, %v100_v17  ;;  %v107_v20 = vadd.f32 %v149_v12, %v106_v18 }
  0x93   :  { %117 = vst.msk [vmem:[%s272_s3 + $0x20] sm:$0xff] %vm112_vm1, %v101_v19 }
  0x94   :  { %119 = vst.msk [vmem:[%s272_s3 + $0x30] sm:$0xff] %vm112_vm1, %v107_v20  ;;  %v91_v21 = vpop.f32.mrf.mxu0  ;;  %v97_v22 = vpop.f32.mrf.mxu1 }
  0x95   :  { %v92_v23 = vadd.f32 %v149_v12, %v91_v21  ;;  %v98_v24 = vadd.f32 %v149_v12, %v97_v22 }
  0x97   :  { %114 = vst.msk [vmem:[%s272_s3 + $0x8] sm:$0xff] %vm112_vm1, %v92_v23 }
  0x98   :  { %116 = vst.msk [vmem:[%s272_s3 + $0x18] sm:$0xff] %vm112_vm1, %v98_v24  ;;  %v103_v25 = vpop.f32.mrf.mxu2  ;;  %v109_v26 = vpop.f32.mrf.mxu3 }
  0x99   :  { %v104_v27 = vadd.f32 %v149_v12, %v103_v25  ;;  %v110_v28 = vadd.f32 %v149_v12, %v109_v26 }
  0x9b   :  { %118 = vst.msk [vmem:[%s272_s3 + $0x28] sm:$0xff] %vm112_vm1, %v104_v27 }
  0x9c   :  { %120 = vst.msk [vmem:[%s272_s3 + $0x38] sm:$0xff] %vm112_vm1, %v110_v28 }
  0x9d   :  { %125 = vsyncpa [#allocation3], 1 }

// kernel: seq_classifier_forward.20
= control target key start
LH: loop header
LB: loop body
LE: loop exit
PB: predicated region body
PF: predicated region fallthrough
CT: control target
= control target key end

     0   :  { %7 = vsyncpa [#allocation3], 0  ;;  %s318_s12 = smov [#allocation2]   ;;  %s319_s14 = smov 32   ;;  %s563_s0 = inlined_call_operand.hbm [shape: f32[32,2,32], index: 0, kind: input, shape index: {}]   ;;  %s564_s1 = inlined_call_operand.vmem [shape: f32[32,1,32], index: 1, kind: input, shape index: {}]   ;;  %s565_s2 = inlined_call_operand.vmem [shape: f32[32,2,32], index: 2, kind: output, shape index: {}]  }
   0x1   :  { %s12_s11 = sshll.u32 %s563_s0, 4  ;;  %s14_s13 = sshll.u32 %s318_s12, 4  ;;  %s13_s11 = int_to_ptr.hbm [resolvable:$true] %s12_s11  ;;  %s15_s13 = int_to_ptr.vmem [resolvable:$true] %s14_s13 }
   0x2   :  { %s320_s15 = smov 2  }
   0x3   :  { %20 = dma.hbm_to_vmem [thread:$0]  %s13_s11, 1024, %s15_s13, [#allocation3], %s319_s14, %s319_s14, %s320_s15  }
   0x4   :  { %316 = dma.done.wait [#allocation3], 1024  }
   0x5   :  { %317 = vsyncadd [#allocation3], 4294966272  ;;  %vm219_vm0 = vcmask 254976   ;;  %v27_v0 = vld [vmem:[#allocation2] sm:$0x3] }
   0x6   :  { %v260_v1 = vld [vmem:[%s564_s1] ss:$0 sm:$0xff]  ;;  %v28_v2 = vld [vmem:[#allocation2 + $0x2] sm:$0x3]  ;;  %v261_v3 = vld [vmem:[%s564_s1 + $0x1] ss:$0 sm:$0xff] }
   0x7   :  { %v187_v4 = vadd.f32 %v260_v1, %v27_v0  ;;  %v29_v5 = vld [vmem:[#allocation2 + $0x4] sm:$0x3]  ;;  %v262_v6 = vld [vmem:[%s564_s1 + $0x2] ss:$0 sm:$0xff]  ;;  %v188_v7 = vadd.f32 %v261_v3, %v28_v2  ;;  %v30_v8 = vld [vmem:[#allocation2 + $0x6] sm:$0x3] }
   0x8   :  { %v263_v9 = vld [vmem:[%s564_s1 + $0x3] ss:$0 sm:$0xff]  ;;  %v189_v10 = vadd.f32 %v262_v6, %v29_v5  ;;  %v31_v11 = vld [vmem:[#allocation2 + $0x8] sm:$0x3]  ;;  %v264_v13 = vld [vmem:[%s564_s1 + $0x4] ss:$0 sm:$0xff] }
   0x9   :  { %220 = vst.msk [vmem:[%s565_s2] sm:$0x3] %vm219_vm0, %v187_v4  ;;  %v190_v12 = vadd.f32 %v263_v9, %v30_v8  ;;  %v32_v14 = vld [vmem:[#allocation2 + $0xa] sm:$0x3]  ;;  %v265_v15 = vld [vmem:[%s564_s1 + $0x5] ss:$0 sm:$0xff]  ;;  %v191_v16 = vadd.f32 %v264_v13, %v31_v11 }
   0xa   :  { %221 = vst.msk [vmem:[%s565_s2 + $0x2] sm:$0x3] %vm219_vm0, %v188_v7  ;;  %v33_v17 = vld [vmem:[#allocation2 + $0xc] sm:$0x3]  ;;  %v192_v18 = vadd.f32 %v265_v15, %v32_v14  ;;  %v266_v19 = vld [vmem:[%s564_s1 + $0x6] ss:$0 sm:$0xff] }
   0xb   :  { %222 = vst.msk [vmem:[%s565_s2 + $0x4] sm:$0x3] %vm219_vm0, %v189_v10  ;;  %v34_v20 = vld [vmem:[#allocation2 + $0xe] sm:$0x3]  ;;  %v267_v21 = vld [vmem:[%s564_s1 + $0x7] ss:$0 sm:$0xff]  ;;  %v193_v23 = vadd.f32 %v266_v19, %v33_v17 }
   0xc   :  { %223 = vst.msk [vmem:[%s565_s2 + $0x6] sm:$0x3] %vm219_vm0, %v190_v12  ;;  %v35_v22 = vld [vmem:[#allocation2 + $0x10] sm:$0x3]  ;;  %v268_v24 = vld [vmem:[%s564_s1 + $0x8] ss:$0 sm:$0xff]  ;;  %v194_v25 = vadd.f32 %v267_v21, %v34_v20 }
   0xd   :  { %224 = vst.msk [vmem:[%s565_s2 + $0x8] sm:$0x3] %vm219_vm0, %v191_v16  ;;  %v36_v26 = vld [vmem:[#allocation2 + $0x12] sm:$0x3]  ;;  %v269_v27 = vld [vmem:[%s564_s1 + $0x9] ss:$0 sm:$0xff]  ;;  %v195_v28 = vadd.f32 %v268_v24, %v35_v22 }
   0xe   :  { %225 = vst.msk [vmem:[%s565_s2 + $0xa] sm:$0x3] %vm219_vm0, %v192_v18  ;;  %v37_v29 = vld [vmem:[#allocation2 + $0x14] sm:$0x3]  ;;  %v196_v30 = vadd.f32 %v269_v27, %v36_v26  ;;  %v270_v31 = vld [vmem:[%s564_s1 + $0xa] ss:$0 sm:$0xff] }
   0xf   :  { %226 = vst.msk [vmem:[%s565_s2 + $0xc] sm:$0x3] %vm219_vm0, %v193_v23  ;;  %v38_v32 = vld [vmem:[#allocation2 + $0x16] sm:$0x3]  ;;  %v271_v33 = vld [vmem:[%s564_s1 + $0xb] ss:$0 sm:$0xff]  ;;  %v197_v34 = vadd.f32 %v270_v31, %v37_v29 }
  0x10   :  { %227 = vst.msk [vmem:[%s565_s2 + $0xe] sm:$0x3] %vm219_vm0, %v194_v25  ;;  %v39_v35 = vld [vmem:[#allocation2 + $0x18] sm:$0x3]  ;;  %v198_v36 = vadd.f32 %v271_v33, %v38_v32  ;;  %v272_v37 = vld [vmem:[%s564_s1 + $0xc] ss:$0 sm:$0xff] }
  0x11   :  { %228 = vst.msk [vmem:[%s565_s2 + $0x10] sm:$0x3] %vm219_vm0, %v195_v28  ;;  %v40_v38 = vld [vmem:[#allocation2 + $0x1a] sm:$0x3]  ;;  %v273_v39 = vld [vmem:[%s564_s1 + $0xd] ss:$0 sm:$0xff]  ;;  %v199_v41 = vadd.f32 %v272_v37, %v39_v35 }
  0x12   :  { %229 = vst.msk [vmem:[%s565_s2 + $0x12] sm:$0x3] %vm219_vm0, %v196_v30  ;;  %v41_v40 = vld [vmem:[#allocation2 + $0x1c] sm:$0x3]  ;;  %v274_v42 = vld [vmem:[%s564_s1 + $0xe] ss:$0 sm:$0xff]  ;;  %v200_v43 = vadd.f32 %v273_v39, %v40_v38 }
  0x13   :  { %230 = vst.msk [vmem:[%s565_s2 + $0x14] sm:$0x3] %vm219_vm0, %v197_v34  ;;  %v42_v44 = vld [vmem:[#allocation2 + $0x1e] sm:$0x3]  ;;  %v275_v45 = vld [vmem:[%s564_s1 + $0xf] ss:$0 sm:$0xff]  ;;  %v201_v46 = vadd.f32 %v274_v42, %v41_v40 }
  0x14   :  { %231 = vst.msk [vmem:[%s565_s2 + $0x16] sm:$0x3] %vm219_vm0, %v198_v36  ;;  %v43_v47 = vld [vmem:[#allocation2 + $0x20] sm:$0x3]  ;;  %v202_v48 = vadd.f32 %v275_v45, %v42_v44  ;;  %v276_v49 = vld [vmem:[%s564_s1 + $0x10] ss:$0 sm:$0xff] }
  0x15   :  { %232 = vst.msk [vmem:[%s565_s2 + $0x18] sm:$0x3] %vm219_vm0, %v199_v41  ;;  %v44_v50 = vld [vmem:[#allocation2 + $0x22] sm:$0x3]  ;;  %v277_v51 = vld [vmem:[%s564_s1 + $0x11] ss:$0 sm:$0xff]  ;;  %v203_v52 = vadd.f32 %v276_v49, %v43_v47 }
  0x16   :  { %233 = vst.msk [vmem:[%s565_s2 + $0x1a] sm:$0x3] %vm219_vm0, %v200_v43  ;;  %v45_v53 = vld [vmem:[#allocation2 + $0x24] sm:$0x3]  ;;  %v204_v54 = vadd.f32 %v277_v51, %v44_v50  ;;  %v278_v55 = vld [vmem:[%s564_s1 + $0x12] ss:$0 sm:$0xff] }
  0x17   :  { %234 = vst.msk [vmem:[%s565_s2 + $0x1c] sm:$0x3] %vm219_vm0, %v201_v46  ;;  %v46_v56 = vld [vmem:[#allocation2 + $0x26] sm:$0x3]  ;;  %v279_v57 = vld [vmem:[%s564_s1 + $0x13] ss:$0 sm:$0xff]  ;;  %v205_v59 = vadd.f32 %v278_v55, %v45_v53 }
  0x18   :  { %235 = vst.msk [vmem:[%s565_s2 + $0x1e] sm:$0x3] %vm219_vm0, %v202_v48  ;;  %v47_v58 = vld [vmem:[#allocation2 + $0x28] sm:$0x3]  ;;  %v280_v60 = vld [vmem:[%s564_s1 + $0x14] ss:$0 sm:$0xff]  ;;  %v206_v61 = vadd.f32 %v279_v57, %v46_v56 }
  0x19   :  { %236 = vst.msk [vmem:[%s565_s2 + $0x20] sm:$0x3] %vm219_vm0, %v203_v52  ;;  %v48_v62 = vld [vmem:[#allocation2 + $0x2a] sm:$0x3]  ;;  %v281_v63 = vld [vmem:[%s564_s1 + $0x15] ss:$0 sm:$0xff]  ;;  %v207_v0 = vadd.f32 %v280_v60, %v47_v58 }
  0x1a   :  { %237 = vst.msk [vmem:[%s565_s2 + $0x22] sm:$0x3] %vm219_vm0, %v204_v54  ;;  %v49_v1 = vld [vmem:[#allocation2 + $0x2c] sm:$0x3]  ;;  %v208_v2 = vadd.f32 %v281_v63, %v48_v62  ;;  %v282_v3 = vld [vmem:[%s564_s1 + $0x16] ss:$0 sm:$0xff] }
  0x1b   :  { %238 = vst.msk [vmem:[%s565_s2 + $0x24] sm:$0x3] %vm219_vm0, %v205_v59  ;;  %v50_v4 = vld [vmem:[#allocation2 + $0x2e] sm:$0x3]  ;;  %v283_v5 = vld [vmem:[%s564_s1 + $0x17] ss:$0 sm:$0xff]  ;;  %v209_v6 = vadd.f32 %v282_v3, %v49_v1 }
  0x1c   :  { %239 = vst.msk [vmem:[%s565_s2 + $0x26] sm:$0x3] %vm219_vm0, %v206_v61  ;;  %v51_v7 = vld [vmem:[#allocation2 + $0x30] sm:$0x3]  ;;  %v210_v8 = vadd.f32 %v283_v5, %v50_v4  ;;  %v284_v9 = vld [vmem:[%s564_s1 + $0x18] ss:$0 sm:$0xff] }
  0x1d   :  { %240 = vst.msk [vmem:[%s565_s2 + $0x28] sm:$0x3] %vm219_vm0, %v207_v0  ;;  %v52_v10 = vld [vmem:[#allocation2 + $0x32] sm:$0x3]  ;;  %v285_v11 = vld [vmem:[%s564_s1 + $0x19] ss:$0 sm:$0xff]  ;;  %v211_v13 = vadd.f32 %v284_v9, %v51_v7 }
  0x1e   :  { %241 = vst.msk [vmem:[%s565_s2 + $0x2a] sm:$0x3] %vm219_vm0, %v208_v2  ;;  %v53_v12 = vld [vmem:[#allocation2 + $0x34] sm:$0x3]  ;;  %v286_v14 = vld [vmem:[%s564_s1 + $0x1a] ss:$0 sm:$0xff]  ;;  %v212_v15 = vadd.f32 %v285_v11, %v52_v10 }
  0x1f   :  { %242 = vst.msk [vmem:[%s565_s2 + $0x2c] sm:$0x3] %vm219_vm0, %v209_v6  ;;  %v54_v16 = vld [vmem:[#allocation2 + $0x36] sm:$0x3]  ;;  %v287_v17 = vld [vmem:[%s564_s1 + $0x1b] ss:$0 sm:$0xff]  ;;  %v213_v18 = vadd.f32 %v286_v14, %v53_v12 }
  0x20   :  { %243 = vst.msk [vmem:[%s565_s2 + $0x2e] sm:$0x3] %vm219_vm0, %v210_v8  ;;  %v55_v19 = vld [vmem:[#allocation2 + $0x38] sm:$0x3]  ;;  %v214_v20 = vadd.f32 %v287_v17, %v54_v16  ;;  %v288_v21 = vld [vmem:[%s564_s1 + $0x1c] ss:$0 sm:$0xff] }
  0x21   :  { %244 = vst.msk [vmem:[%s565_s2 + $0x30] sm:$0x3] %vm219_vm0, %v211_v13  ;;  %v56_v22 = vld [vmem:[#allocation2 + $0x3a] sm:$0x3]  ;;  %v289_v23 = vld [vmem:[%s564_s1 + $0x1d] ss:$0 sm:$0xff]  ;;  %v215_v24 = vadd.f32 %v288_v21, %v55_v19 }
  0x22   :  { %245 = vst.msk [vmem:[%s565_s2 + $0x32] sm:$0x3] %vm219_vm0, %v212_v15  ;;  %v57_v25 = vld [vmem:[#allocation2 + $0x3c] sm:$0x3]  ;;  %v216_v26 = vadd.f32 %v289_v23, %v56_v22  ;;  %v290_v27 = vld [vmem:[%s564_s1 + $0x1e] ss:$0 sm:$0xff] }
  0x23   :  { %246 = vst.msk [vmem:[%s565_s2 + $0x34] sm:$0x3] %vm219_vm0, %v213_v18  ;;  %v58_v28 = vld [vmem:[#allocation2 + $0x3e] sm:$0x3]  ;;  %v217_v30 = vadd.f32 %v290_v27, %v57_v25 }
  0x24   :  { %247 = vst.msk [vmem:[%s565_s2 + $0x36] sm:$0x3] %vm219_vm0, %v214_v20  ;;  %v291_v29 = vld [vmem:[%s564_s1 + $0x1f] ss:$0 sm:$0xff] }
  0x25   :  { %248 = vst.msk [vmem:[%s565_s2 + $0x38] sm:$0x3] %vm219_vm0, %v215_v24  ;;  %v218_v31 = vadd.f32 %v291_v29, %v58_v28 }
  0x26   :  { %249 = vst.msk [vmem:[%s565_s2 + $0x3a] sm:$0x3] %vm219_vm0, %v216_v26 }
  0x27   :  { %250 = vst.msk [vmem:[%s565_s2 + $0x3c] sm:$0x3] %vm219_vm0, %v217_v30 }
  0x28   :  { %251 = vst.msk [vmem:[%s565_s2 + $0x3e] sm:$0x3] %vm219_vm0, %v218_v31 }
  0x29   :  { %256 = vsyncpa [#allocation3], 1 }

// kernel: seq_classifier_forward.23
= control target key start
LH: loop header
LB: loop body
LE: loop exit
PB: predicated region body
PF: predicated region fallthrough
CT: control target
= control target key end

     0   :  { %vm30_vm0 = vcmask 261120   ;;  %s228_s1 = inlined_call_operand.vmem [shape: f32[32,32], index: 1, kind: input, shape index: {}]   ;;  %s229_s0 = inlined_call_operand.vmem [shape: f32[64,32], index: 0, kind: input, shape index: {}]   ;;  %s230_s2 = inlined_call_operand.vmem [shape: f32[1,32], index: 2, kind: input, shape index: {}]   ;;  %s231_s3 = inlined_call_operand.vmem [shape: f32[64,32], index: 3, kind: output, shape index: {}]  }
   0x1   :  { %v25_v0 = vld [vmem:[%s228_s1 + $0x18] sm:$0xff]  ;;  %v24_v1 = vld [vmem:[%s228_s1 + $0x10] sm:$0xff]  ;;  %v23_v2 = vld [vmem:[%s228_s1 + $0x8] sm:$0xff] }
   0x2   :  { %117 = vmatpush.msra.mxu2 %v25_v0  ;;  %118 = vmatpush.msra.mxu3 %v25_v0  ;;  %v22_v3 = vld [vmem:[%s228_s1] sm:$0xff]  ;;  %v20_v5 = vld [vmem:[%s229_s0 + $0x30] sm:$0xff]  ;;  %v19_v8 = vld [vmem:[%s229_s0 + $0x28] sm:$0xff] }
   0x3   :  { %67 = vmatpush.msra.mxu0 %v25_v0  ;;  %116 = vmatpush.msra.mxu1 %v25_v0  ;;  %v18_v4 = vld [vmem:[%s229_s0 + $0x20] sm:$0xff]  ;;  %v16_v7 = vld [vmem:[%s229_s0 + $0x10] sm:$0xff]  ;;  %v21_v9 = vld [vmem:[%s229_s0 + $0x38] sm:$0xff] }
   0x4   :  { %120 = vmatpush.msra.mxu2 %v24_v1  ;;  %121 = vmatpush.msra.mxu3 %v24_v1  ;;  %v14_v6 = vld [vmem:[%s229_s0] sm:$0xff]  ;;  %v15_v10 = vld [vmem:[%s229_s0 + $0x8] sm:$0xff]  ;;  %v17_v11 = vld [vmem:[%s229_s0 + $0x18] sm:$0xff] }
   0x5   :  { %68 = vmatpush.msra.mxu0 %v24_v1  ;;  %119 = vmatpush.msra.mxu1 %v24_v1  ;;  %v128_v12 = vld [vmem:[%s230_s2] ss:$0 sm:$0xff] }
   0x6   :  { %123 = vmatpush.msra.mxu2 %v23_v2  ;;  %124 = vmatpush.msra.mxu3 %v23_v2 }
   0x7   :  { %69 = vmatpush.msra.mxu0 %v23_v2  ;;  %122 = vmatpush.msra.mxu1 %v23_v2 }
   0x8   :  { %126 = vmatpush.msra.mxu2 %v22_v3  ;;  %127 = vmatpush.msra.mxu3 %v22_v3 }
   0x9   :  { %112 = vmatmul.msk.f32.vlgmr.msra.gmra.mxu2 %vm30_vm0, %v18_v4  ;;  %114 = vmatmul.msk.f32.vlgmr.msra.gmra.mxu3 %vm30_vm0, %v20_v5 }
   0xa   :  { %70 = vmatpush.msra.mxu0 %v22_v3  ;;  %125 = vmatpush.msra.mxu1 %v22_v3 }
   0xb   :  { %108 = vmatmul.msk.f32.vlgmr.msra.gmra.mxu0 %vm30_vm0, %v14_v6  ;;  %110 = vmatmul.msk.f32.vlgmr.msra.gmra.mxu1 %vm30_vm0, %v16_v7 }
  0x11   :  { %113 = vmatmul.msk.f32.gmra.mxu2 %vm30_vm0, %v19_v8  ;;  %115 = vmatmul.msk.f32.gmra.mxu3 %vm30_vm0, %v21_v9 }
  0x13   :  { %109 = vmatmul.msk.f32.gmra.mxu0 %vm30_vm0, %v15_v10  ;;  %111 = vmatmul.msk.f32.gmra.mxu1 %vm30_vm0, %v17_v11 }
  0x88   :  { %v72_v13 = vpop.f32.mrf.mxu0  ;;  %v78_v14 = vpop.f32.mrf.mxu1 }
  0x89   :  { %v73_v15 = vadd.f32 %v128_v12, %v72_v13  ;;  %v79_v16 = vadd.f32 %v128_v12, %v78_v14 }
  0x8b   :  { %96 = vst.msk [vmem:[%s231_s3] sm:$0xff] %vm30_vm0, %v73_v15 }
  0x8c   :  { %98 = vst.msk [vmem:[%s231_s3 + $0x10] sm:$0xff] %vm30_vm0, %v79_v16  ;;  %v84_v17 = vpop.f32.mrf.mxu2  ;;  %v90_v18 = vpop.f32.mrf.mxu3 }
  0x8d   :  { %v85_v19 = vadd.f32 %v128_v12, %v84_v17  ;;  %v91_v20 = vadd.f32 %v128_v12, %v90_v18 }
  0x8f   :  { %100 = vst.msk [vmem:[%s231_s3 + $0x20] sm:$0xff] %vm30_vm0, %v85_v19 }
  0x90   :  { %102 = vst.msk [vmem:[%s231_s3 + $0x30] sm:$0xff] %vm30_vm0, %v91_v20  ;;  %v75_v21 = vpop.f32.mrf.mxu0  ;;  %v81_v22 = vpop.f32.mrf.mxu1 }
  0x91   :  { %v76_v23 = vadd.f32 %v128_v12, %v75_v21  ;;  %v82_v24 = vadd.f32 %v128_v12, %v81_v22 }
  0x93   :  { %97 = vst.msk [vmem:[%s231_s3 + $0x8] sm:$0xff] %vm30_vm0, %v76_v23 }
  0x94   :  { %99 = vst.msk [vmem:[%s231_s3 + $0x18] sm:$0xff] %vm30_vm0, %v82_v24  ;;  %v87_v25 = vpop.f32.mrf.mxu2  ;;  %v93_v26 = vpop.f32.mrf.mxu3 }
  0x95   :  { %v88_v27 = vadd.f32 %v128_v12, %v87_v25  ;;  %v94_v28 = vadd.f32 %v128_v12, %v93_v26 }
  0x97   :  { %101 = vst.msk [vmem:[%s231_s3 + $0x28] sm:$0xff] %vm30_vm0, %v88_v27 }
  0x98   :  { %103 = vst.msk [vmem:[%s231_s3 + $0x38] sm:$0xff] %vm30_vm0, %v94_v28 }

// kernel: seq_classifier_forward.22
= control target key start
LH: loop header
LB: loop body
LE: loop exit
PB: predicated region body
PF: predicated region fallthrough
CT: control target
= control target key end

     0   :  { %s843_s15 = smov 0   ;;  %s845_s16 = smov 0   ;;  %s954_s0 = inlined_call_operand.vmem [shape: f32[2,4,32,8], index: 0, kind: input, shape index: {}]   ;;  %s955_s1 = inlined_call_operand.vmem [shape: f32[2,4,32,8], index: 1, kind: input, shape index: {}]   ;;  %s956_s2 = inlined_call_operand.vmem [shape: f32[2,4,32,8], index: 2, kind: input, shape index: {}]   ;;  %s957_s3 = inlined_call_operand.vmem [shape: f32[2,1,32], index: 3, kind: input, shape index: {}]   ;;  %s958_s4 = inlined_call_operand.vmem [shape: f32[2,4,32,8], index: 4, kind: output, shape index: {}]  }
   0x1   :  { %s847_s17 = smov 0   ;;  %s849_s18 = smov 0  }
   0x2   :  { %s851_s19 = smov 0  }
   0x3 LB: > { %s23_s20 = sadd.s32 1, %s808_s17  ;;  %s26_s21 = sadd.s32 1, %s812_s18  ;;  %s816_s19 = sphi %s851_s19, %s14_s19   ;;  %s812_s18 = sphi %s849_s18, %s962_s18   ;;  %s808_s17 = sphi %s847_s17, %s961_s17   ;;  %s804_s16 = sphi %s845_s16, %s960_s16   ;;  %s800_s15 = sphi %s843_s15, %s959_s15  }
   0x4   : > { %p24_p0 = scmp.ge.s32.totalorder %s23_s20, 4  ;;  %p686_p1 = scmp.ge.s32.totalorder %s816_s19, 1 }
   0x5   : > { %p222_p2 = scmp.lt.s32.totalorder %s816_s19, 9 }
   0x6   : > { %s964_s20 = smov (%p24_p0, %s23_s20), 0  ;;  %s966_s21 = smov (!%p24_p0, %s26_s21), %s812_s18 }
   0x7   : > { %p223_p3 = pnand %p686_p1, %p222_p2  ;;  %p28_p4 = scmp.ge.s32.totalorder %s966_s21, 2 }
   0x8   : > { %p277_p5 = scmp.lt.s32.totalorder (!%p223_p3), %s804_s16, 1  ;;  %p279_p6 = scmp.lt.s32.totalorder (!%p223_p3), %s800_s15, 3 }
   0x9   : > { %s968_s21 = smov (%p28_p4, %s966_s21), 0  ;;  %226 = sbr.rel (%p223_p3) target bundleno = 586 (0x24a), region = 36 }
   0xe   : > { %s970_s16 = smov (!%p277_p5, %s804_s16), 1  ;;  %s972_s15 = smov (!%p279_p6, %s800_s15), 3  ;;  %vm329_vm0 = vcmask 64512   ;;  %vm394_vm1 = vcmask 261120  }
   0xf   : > { %s688_s22 = sshll.u32 %s970_s16, 4  ;;  %s687_s23 = sshll.u32 %s972_s15, 2 }
  0x10   : > { %s283_s24 = sadd.s32 %s688_s22, %s687_s23  ;;  %s306_s8 = scalar_lea.vmem %s957_s3, %s970_s16 }
  0x11   : > { %s876_s25 = sshll.u32 %s283_s24, 3  ;;  %v761_v12 = vld [vmem:[%s306_s8] ss:$0 sm:$0xff] }
  0x12   : > { %s294_s28 = scalar_lea.vmem %s955_s1, %s876_s25  ;;  %s285_s5 = scalar_lea.vmem %s954_s0, %s876_s25 }
  0x13   : > { %v323_v0 = vld [vmem:[%s294_s28 + $0x18] sm:$0xff]  ;;  %v322_v1 = vld [vmem:[%s294_s28 + $0x10] sm:$0xff]  ;;  %v321_v2 = vld [vmem:[%s294_s28 + $0x8] sm:$0xff]  ;;  %s303_s11 = scalar_lea.vmem %s956_s2, %s876_s25  ;;  %s315_s14 = scalar_lea.vmem %s958_s4, %s876_s25 }
  0x14   : > { %699 = vmatpush.xpose.msk.msra.mxu0 %vm329_vm0, %v323_v0  ;;  %713 = vmatpush.xpose.msk.msra.mxu2 %vm329_vm0, %v323_v0  ;;  %v320_v3 = vld [vmem:[%s294_s28] sm:$0xff]  ;;  %v318_v5 = vld [vmem:[%s285_s5 + $0x10] sm:$0xff]  ;;  %v317_v6 = vld [vmem:[%s285_s5 + $0x8] sm:$0xff] }
  0x15   : > { %v316_v4 = vld [vmem:[%s285_s5] sm:$0xff]  ;;  %v319_v7 = vld [vmem:[%s285_s5 + $0x18] sm:$0xff]  ;;  %v326_v46 = vld [vmem:[%s303_s11 + $0x10] sm:$0xff] }
  0x16   : > { %v327_v45 = vld [vmem:[%s303_s11 + $0x18] sm:$0xff]  ;;  %v325_v47 = vld [vmem:[%s303_s11 + $0x8] sm:$0xff]  ;;  %v324_v48 = vld [vmem:[%s303_s11] sm:$0xff] }
  0x17   : > { %717 = vmatpush.msra.mxu3 %v327_v45  ;;  %515 = vmatpush.msra.mxu1 %v327_v45 }
  0x18   : > { %700 = vmatpush.xpose.msk.msra.mxu0 %vm329_vm0, %v322_v1  ;;  %714 = vmatpush.xpose.msk.msra.mxu2 %vm329_vm0, %v322_v1 }
  0x19   : > { %718 = vmatpush.msra.mxu3 %v326_v46  ;;  %516 = vmatpush.msra.mxu1 %v326_v46 }
  0x1b   : > { %719 = vmatpush.msra.mxu3 %v325_v47  ;;  %517 = vmatpush.msra.mxu1 %v325_v47 }
  0x1c   : > { %701 = vmatpush.xpose.msk.msra.mxu0 %vm329_vm0, %v321_v2  ;;  %715 = vmatpush.xpose.msk.msra.mxu2 %vm329_vm0, %v321_v2 }
  0x1d   : > { %720 = vmatpush.msra.mxu3 %v324_v48  ;;  %518 = vmatpush.msra.mxu1 %v324_v48 }
  0x20   : > { %702 = vmatpush.xpose.msk.msra.mxu0 %vm329_vm0, %v320_v3  ;;  %716 = vmatpush.xpose.msk.msra.mxu2 %vm329_vm0, %v320_v3 }
  0x23   : > { %703 = vmatmul.msk.f32.vlgmr.msra.gmra.mxu0 %vm329_vm0, %v316_v4  ;;  %705 = vmatmul.msk.f32.vlgmr.msra.gmra.mxu2 %vm329_vm0, %v318_v5 }
  0x2b   : > { %704 = vmatmul.msk.f32.gmra.mxu0 %vm329_vm0, %v317_v6  ;;  %706 = vmatmul.msk.f32.gmra.mxu2 %vm329_vm0, %v319_v7 }
  0xa0   : > { %v371_v8 = vpop.f32.mrf.mxu0 }
  0xa1   : > { %v383_v20 = vmul.f32 0.35355338, %v371_v8 }
  0xa3   : > { %v390_v23 = vadd.f32 %v761_v12, %v383_v20 }
  0xa5   : > { %v395_v24 = vsel %vm394_vm1, %v390_v23, -inf }
  0xa6   : > { %v377_v9 = vpop.f32.mrf.mxu2 }
  0xa7   : > { %v385_v14 = vmul.f32 0.35355338, %v377_v9 }
  0xa8   : > { %v374_v10 = vpop.f32.mrf.mxu0 }
  0xa9   : > { %v384_v11 = vmul.f32 0.35355338, %v374_v10  ;;  %v392_v19 = vadd.f32 %v761_v12, %v385_v14 }
  0xab   : > { %v391_v13 = vadd.f32 %v761_v12, %v384_v11  ;;  %v401_v22 = vsel %vm394_vm1, %v392_v19, -inf }
  0xad   : > { %v398_v15 = vsel %vm394_vm1, %v391_v13, -inf }
  0xae   : > { %v380_v16 = vpop.f32.mrf.mxu2  ;;  %399 = vmax.xlane.f32.xlu0 %v398_v15 }
  0xaf   : > { %v386_v17 = vmul.f32 0.35355338, %v380_v16 }
  0xb1   : > { %v393_v18 = vadd.f32 %v761_v12, %v386_v17 }
  0xb3   : > { %v404_v21 = vsel %vm394_vm1, %v393_v18, -inf }
  0xb4   : > { %405 = vmax.xlane.f32.xlu1 %v404_v21 }
  0xb6   : > { %402 = vmax.xlane.f32.xlu0 %v401_v22 }
  0xbc   : > { %396 = vmax.xlane.f32.xlu1 %v395_v24 }
 0x121   : > { %v400_v25 = vpop.xlane.xlu0 %399 }
 0x122   : > { %v408_v26 = vsub.f32 %v391_v13, %v400_v25 }
 0x124   : > { %v413_v27 = vmul.f32 1.442695, %v408_v26 }
 0x126   : > { %762 = vpow2.f32 %v413_v27 }
 0x127   : > { %v406_v28 = vpop.xlane.xlu1 %405 }
 0x128   : > { %v410_v29 = vsub.f32 %v393_v18, %v406_v28 }
 0x129   : > { %v403_v30 = vpop.xlane.xlu0 %402 }
 0x12a   : > { %v417_v31 = vmul.f32 1.442695, %v410_v29  ;;  %v409_v32 = vsub.f32 %v392_v19, %v403_v30 }
 0x12c   : > { %v763_v33 = vpop.eup %762  ;;  %764 = vpow2.f32 %v417_v31  ;;  %v415_v34 = vmul.f32 1.442695, %v409_v32 }
 0x12d   : > { %v422_v35 = vsel %vm394_vm1, %v763_v33, 0.0 }
 0x12e   : > { %766 = vpow2.f32 %v415_v34  ;;  %423 = vadd.xlane.f32.xlu2 %v422_v35 }
 0x12f   : > { %v397_v36 = vpop.xlane.xlu1 %396 }
 0x130   : > { %v407_v37 = vsub.f32 %v390_v23, %v397_v36 }
 0x132   : > { %v907_v38 = vpop.eup %764  ;;  %v411_v39 = vmul.f32 1.442695, %v407_v37 }
 0x133   : > { %v428_v40 = vsel %vm394_vm1, %v907_v38, 0.0 }
 0x134   : > { %v911_v41 = vpop.eup %766  ;;  %768 = vpow2.f32 %v411_v39  ;;  %429 = vadd.xlane.f32.xlu0 %v428_v40 }
 0x135   : > { %v425_v42 = vsel %vm394_vm1, %v911_v41, 0.0 }
 0x136   : > { %426 = vadd.xlane.f32.xlu2 %v425_v42 }
 0x13a   : > { %v915_v43 = vpop.eup %768 }
 0x13b   : > { %v419_v44 = vsel %vm394_vm1, %v915_v43, 0.0 }
 0x13c   : > { %420 = vadd.xlane.f32.xlu1 %v419_v44 }
 0x1a1   : > { %v424_v49 = vpop.xlane.xlu2 %423 }
 0x1a2   : > { %770 = vrcp.f32 %v424_v49  ;;  %v457_v55 = vand.u32 2147483648, %v424_v49  ;;  %v455_v57 = vand.u32 2147483647, %v424_v49  ;;  %vm451_vm3 = vweird.f32 %v424_v49 }
 0x1a4   : > { %v458_v63 = vor.u32 1.1754944e-38, %v457_v55  ;;  %vm456_vm5 = vcmp.eq.f32.partialorder %v455_v57, 8.507059e+37 }
 0x1a7   : > { %v430_v50 = vpop.xlane.xlu0 %429 }
 0x1a8   : > { %v771_v51 = vpop.eup %770  ;;  %772 = vrcp.f32 %v430_v50  ;;  %vm481_vm8 = vweird.f32 %v430_v50  ;;  %v485_v17 = vand.u32 2147483647, %v430_v50  ;;  %v487_v18 = vand.u32 2147483648, %v430_v50 }
 0x1a9   : > { %v447_v52 = vmul.f32 %v771_v51, %v424_v49  ;;  %v427_v53 = vpop.xlane.xlu2 %426  ;;  %vm452_vm2 = vweird.f32 %v771_v51 }
 0x1aa   : > { %774 = vrcp.f32 %v427_v53  ;;  %vm453_vm4 = vmor %vm451_vm3, %vm452_vm2  ;;  %v470_v6 = vand.u32 2147483647, %v427_v53  ;;  %v472_v7 = vand.u32 2147483648, %v427_v53  ;;  %vm466_vm7 = vweird.f32 %v427_v53 }
 0x1ab   : > { %v448_v54 = vsub.f32 1.0, %v447_v52  ;;  %v488_v26 = vor.u32 1.1754944e-38, %v487_v18  ;;  %vm486_vm2 = vcmp.eq.f32.partialorder %v485_v17, 8.507059e+37 }
 0x1ac   : > { %vm471_vm10 = vcmp.eq.f32.partialorder %v470_v6, 8.507059e+37  ;;  %v473_v13 = vor.u32 1.1754944e-38, %v472_v7 }
 0x1ad   : > { %v449_v56 = vmul.f32 %v771_v51, %v448_v54 }
 0x1ae   : > { %v773_v58 = vpop.eup %772 }
 0x1af   : > { %v477_v59 = vmul.f32 %v773_v58, %v430_v50  ;;  %v421_v60 = vpop.xlane.xlu1 %420  ;;  %v450_v61 = vadd.f32 %v771_v51, %v449_v56  ;;  %vm482_vm11 = vweird.f32 %v773_v58 }
 0x1b0   : > { %v775_v62 = vpop.eup %774  ;;  %776 = vrcp.f32 %v421_v60  ;;  %v442_v19 = vand.u32 2147483648, %v421_v60  ;;  %v440_v22 = vand.u32 2147483647, %v421_v60  ;;  %vm483_vm13 = vmor %vm481_vm8, %vm482_vm11  ;;  %vm436_vm14 = vweird.f32 %v421_v60 }
 0x1b1   : > { %v478_v0 = vsub.f32 1.0, %v477_v59  ;;  %v462_v1 = vmul.f32 %v775_v62, %v427_v53  ;;  %v454_v2 = vsel %vm453_vm4, %v771_v51, %v450_v61  ;;  %vm467_vm6 = vweird.f32 %v775_v62 }
 0x1b2   : > { %v459_v3 = vsel %vm456_vm5, %v458_v63, %v454_v2  ;;  %vm468_vm9 = vmor %vm466_vm7, %vm467_vm6  ;;  %v443_v27 = vor.u32 1.1754944e-38, %v442_v19  ;;  %vm441_vm3 = vcmp.eq.f32.partialorder %v440_v22, 8.507059e+37 }
 0x1b3   : > { %v463_v4 = vsub.f32 1.0, %v462_v1  ;;  %v460_v5 = vmul.f32 %v763_v33, %v459_v3  ;;  %v479_v8 = vmul.f32 %v773_v58, %v478_v0 }
 0x1b5   : > { %v464_v9 = vmul.f32 %v775_v62, %v463_v4  ;;  %708 = vmatmul.msk.f32.vlgmr.msra.gmra.mxu3 %vm394_vm1, %v460_v5  ;;  %v480_v14 = vadd.f32 %v773_v58, %v479_v8 }
 0x1b6   : > { %v777_v10 = vpop.eup %776 }
 0x1b7   : > { %v465_v11 = vadd.f32 %v775_v62, %v464_v9  ;;  %v432_v12 = vmul.f32 %v777_v10, %v421_v60  ;;  %vm437_vm12 = vweird.f32 %v777_v10  ;;  %v484_v25 = vsel %vm483_vm13, %v773_v58, %v480_v14 }
 0x1b8   : > { %vm438_vm15 = vmor %vm436_vm14, %vm437_vm12  ;;  %v489_v30 = vsel %vm486_vm2, %v488_v26, %v484_v25 }
 0x1b9   : > { %v433_v15 = vsub.f32 1.0, %v432_v12  ;;  %v469_v16 = vsel %vm468_vm9, %v775_v62, %v465_v11  ;;  %v490_v32 = vmul.f32 %v907_v38, %v489_v30 }
 0x1ba   : > { %v474_v20 = vsel %vm471_vm10, %v473_v13, %v469_v16 }
 0x1bb   : > { %v434_v21 = vmul.f32 %v777_v10, %v433_v15  ;;  %v475_v23 = vmul.f32 %v911_v41, %v474_v20 }
 0x1bd   : > { %v435_v24 = vadd.f32 %v777_v10, %v434_v21  ;;  %709 = vmatmul.msk.f32.gmra.mxu3 %vm394_vm1, %v475_v23 }
 0x1bf   : > { %v439_v28 = vsel %vm438_vm15, %v777_v10, %v435_v24 }
 0x1c0   : > { %v444_v29 = vsel %vm441_vm3, %v443_v27, %v439_v28 }
 0x1c1   : > { %v445_v31 = vmul.f32 %v915_v43, %v444_v29 }
 0x1c3   : > { %707 = vmatmul.msk.f32.vlgmr.msra.gmra.mxu1 %vm394_vm1, %v445_v31 }
 0x1c5   : > { %710 = vmatmul.msk.f32.gmra.mxu3 %vm394_vm1, %v490_v32 }
 0x238   : > { %v523_v33 = vpop.f32.mrf.mxu3 }
 0x239   : > { %533 = vst.msk [vmem:[%s315_s14 + $0x8] sm:$0xff] %vm329_vm0, %v523_v33 }
 0x240   : > { %v520_v34 = vpop.f32.mrf.mxu1  ;;  %v526_v35 = vpop.f32.mrf.mxu3 }
 0x241   : > { %532 = vst.msk [vmem:[%s315_s14] sm:$0xff] %vm329_vm0, %v520_v34 }
 0x242   : > { %534 = vst.msk [vmem:[%s315_s14 + $0x10] sm:$0xff] %vm329_vm0, %v526_v35 }
 0x248   : > { %v529_v36 = vpop.f32.mrf.mxu3 }
 0x249   : > { %535 = vst.msk [vmem:[%s315_s14 + $0x18] sm:$0xff] %vm329_vm0, %v529_v36 }
 0x24a PF: > { %s14_s19 = sadd.s32 1, %s816_s19   ;;  %s959_s15 = smov %s808_s17 }
 0x24b   : > { %p11_p7 = scmp.ge.s32.totalorder %s14_s19, 10   ;;  %s960_s16 = smov %s812_s18 }
 0x24c   : > { %s961_s17 = smov %s964_s20  ;;  %s962_s18 = smov %s968_s21 }
 0x24d   :  { %13 = sbr.rel (!%p11_p7) target bundleno = 3 (0x3), region = 75 }

// kernel: seq_classifier_forward.25
= control target key start
LH: loop header
LB: loop body
LE: loop exit
PB: predicated region body
PF: predicated region fallthrough
CT: control target
= control target key end

     0   :  { %vm30_vm0 = vcmask 261120   ;;  %s228_s1 = inlined_call_operand.vmem [shape: f32[32,128], index: 1, kind: input, shape index: {}]   ;;  %s229_s0 = inlined_call_operand.vmem [shape: f32[64,32], index: 0, kind: input, shape index: {}]   ;;  %s230_s2 = inlined_call_operand.vmem [shape: f32[1,128], index: 2, kind: input, shape index: {}]   ;;  %s231_s3 = inlined_call_operand.vmem [shape: f32[64,128], index: 3, kind: output, shape index: {}]  }
   0x1   :  { %v25_v0 = vld [vmem:[%s228_s1 + $0x18] sm:$0xff]  ;;  %v24_v1 = vld [vmem:[%s228_s1 + $0x10] sm:$0xff]  ;;  %v23_v2 = vld [vmem:[%s228_s1 + $0x8] sm:$0xff] }
   0x2   :  { %125 = vmatpush.msra.mxu2 %v25_v0  ;;  %126 = vmatpush.msra.mxu3 %v25_v0  ;;  %v22_v3 = vld [vmem:[%s228_s1] sm:$0xff]  ;;  %v20_v5 = vld [vmem:[%s229_s0 + $0x30] sm:$0xff]  ;;  %v19_v8 = vld [vmem:[%s229_s0 + $0x28] sm:$0xff] }
   0x3   :  { %67 = vmatpush.msra.mxu0 %v25_v0  ;;  %124 = vmatpush.msra.mxu1 %v25_v0  ;;  %v18_v4 = vld [vmem:[%s229_s0 + $0x20] sm:$0xff]  ;;  %v16_v7 = vld [vmem:[%s229_s0 + $0x10] sm:$0xff]  ;;  %v21_v9 = vld [vmem:[%s229_s0 + $0x38] sm:$0xff] }
   0x4   :  { %128 = vmatpush.msra.mxu2 %v24_v1  ;;  %129 = vmatpush.msra.mxu3 %v24_v1  ;;  %v14_v6 = vld [vmem:[%s229_s0] sm:$0xff]  ;;  %v15_v10 = vld [vmem:[%s229_s0 + $0x8] sm:$0xff]  ;;  %v17_v11 = vld [vmem:[%s229_s0 + $0x18] sm:$0xff] }
   0x5   :  { %68 = vmatpush.msra.mxu0 %v24_v1  ;;  %127 = vmatpush.msra.mxu1 %v24_v1  ;;  %v136_v12 = vld [vmem:[%s230_s2] ss:$0 sm:$0xff] }
   0x6   :  { %131 = vmatpush.msra.mxu2 %v23_v2  ;;  %132 = vmatpush.msra.mxu3 %v23_v2 }
   0x7   :  { %69 = vmatpush.msra.mxu0 %v23_v2  ;;  %130 = vmatpush.msra.mxu1 %v23_v2 }
   0x8   :  { %134 = vmatpush.msra.mxu2 %v22_v3  ;;  %135 = vmatpush.msra.mxu3 %v22_v3 }
   0x9   :  { %120 = vmatmul.msk.f32.vlgmr.msra.gmra.mxu2 %vm30_vm0, %v18_v4  ;;  %122 = vmatmul.msk.f32.vlgmr.msra.gmra.mxu3 %vm30_vm0, %v20_v5 }
   0xa   :  { %70 = vmatpush.msra.mxu0 %v22_v3  ;;  %133 = vmatpush.msra.mxu1 %v22_v3 }
   0xb   :  { %116 = vmatmul.msk.f32.vlgmr.msra.gmra.mxu0 %vm30_vm0, %v14_v6  ;;  %118 = vmatmul.msk.f32.vlgmr.msra.gmra.mxu1 %vm30_vm0, %v16_v7 }
  0x11   :  { %121 = vmatmul.msk.f32.gmra.mxu2 %vm30_vm0, %v19_v8  ;;  %123 = vmatmul.msk.f32.gmra.mxu3 %vm30_vm0, %v21_v9 }
  0x13   :  { %117 = vmatmul.msk.f32.gmra.mxu0 %vm30_vm0, %v15_v10  ;;  %119 = vmatmul.msk.f32.gmra.mxu1 %vm30_vm0, %v17_v11 }
  0x88   :  { %v72_v13 = vpop.f32.mrf.mxu0  ;;  %v78_v14 = vpop.f32.mrf.mxu1 }
  0x89   :  { %v73_v15 = vadd.f32 %v136_v12, %v72_v13  ;;  %v79_v16 = vadd.f32 %v136_v12, %v78_v14 }
  0x8b   :  { %v96_v17 = vmax.f32 %v73_v15, 0.0  ;;  %v98_v18 = vmax.f32 %v79_v16, 0.0 }
  0x8c   :  { %v84_v19 = vpop.f32.mrf.mxu2  ;;  %v90_v20 = vpop.f32.mrf.mxu3 }
  0x8d   :  { %104 = vst [vmem:[%s231_s3] sm:$0xff] %v96_v17  ;;  %v85_v21 = vadd.f32 %v136_v12, %v84_v19  ;;  %v91_v22 = vadd.f32 %v136_v12, %v90_v20 }
  0x8e   :  { %106 = vst [vmem:[%s231_s3 + $0x10] sm:$0xff] %v98_v18 }
  0x8f   :  { %v100_v23 = vmax.f32 %v85_v21, 0.0  ;;  %v102_v24 = vmax.f32 %v91_v22, 0.0 }
  0x90   :  { %v75_v25 = vpop.f32.mrf.mxu0  ;;  %v81_v26 = vpop.f32.mrf.mxu1 }
  0x91   :  { %108 = vst [vmem:[%s231_s3 + $0x20] sm:$0xff] %v100_v23  ;;  %v76_v27 = vadd.f32 %v136_v12, %v75_v25  ;;  %v82_v28 = vadd.f32 %v136_v12, %v81_v26 }
  0x92   :  { %110 = vst [vmem:[%s231_s3 + $0x30] sm:$0xff] %v102_v24 }
  0x93   :  { %v97_v29 = vmax.f32 %v76_v27, 0.0  ;;  %v99_v30 = vmax.f32 %v82_v28, 0.0 }
  0x94   :  { %v87_v31 = vpop.f32.mrf.mxu2  ;;  %v93_v32 = vpop.f32.mrf.mxu3 }
  0x95   :  { %105 = vst [vmem:[%s231_s3 + $0x8] sm:$0xff] %v97_v29  ;;  %v88_v33 = vadd.f32 %v136_v12, %v87_v31  ;;  %v94_v34 = vadd.f32 %v136_v12, %v93_v32 }
  0x96   :  { %107 = vst [vmem:[%s231_s3 + $0x18] sm:$0xff] %v99_v30 }
  0x97   :  { %v101_v35 = vmax.f32 %v88_v33, 0.0  ;;  %v103_v36 = vmax.f32 %v94_v34, 0.0 }
  0x99   :  { %109 = vst [vmem:[%s231_s3 + $0x28] sm:$0xff] %v101_v35 }
  0x9a   :  { %111 = vst [vmem:[%s231_s3 + $0x38] sm:$0xff] %v103_v36 }

// kernel: seq_classifier_forward.24
= control target key start
LH: loop header
LB: loop body
LE: loop exit
PB: predicated region body
PF: predicated region fallthrough
CT: control target
= control target key end

     0   :  { %vm41_vm0 = vcmask 261120   ;;  %v282_v32 = vmov 32.0   ;;  %s523_s0 = inlined_call_operand.vmem [shape: f32[64,32], index: 0, kind: input, shape index: {}]   ;;  %s524_s1 = inlined_call_operand.vmem [shape: f32[64,32], index: 1, kind: input, shape index: {}]   ;;  %s525_s2 = inlined_call_operand.vmem [shape: f32[1,32], index: 2, kind: input, shape index: {}]   ;;  %s526_s3 = inlined_call_operand.vmem [shape: f32[1,32], index: 3, kind: input, shape index: {}]   ;;  %s527_s4 = inlined_call_operand.vmem [shape: f32[64,32], index: 4, kind: output, shape index: {}]  }
   0x1   :  { %v21_v0 = vld [vmem:[%s523_s0 + $0x20] sm:$0xff]  ;;  %v19_v2 = vld [vmem:[%s523_s0 + $0x10] sm:$0xff]  ;;  %v22_v9 = vld [vmem:[%s523_s0 + $0x28] sm:$0xff]  ;;  %264 = vrcp.f32 %v282_v32 }
   0x2   :  { %v29_v1 = vld [vmem:[%s524_s1 + $0x20] sm:$0xff]  ;;  %v27_v4 = vld [vmem:[%s524_s1 + $0x10] sm:$0xff]  ;;  %v30_v10 = vld [vmem:[%s524_s1 + $0x28] sm:$0xff] }
   0x3   :  { %v317_v3 = vadd.f32 %v29_v1, %v21_v0  ;;  %v17_v5 = vld [vmem:[%s523_s0] sm:$0xff]  ;;  %v35_v7 = vadd.f32 %v27_v4, %v19_v2  ;;  %v20_v11 = vld [vmem:[%s523_s0 + $0x18] sm:$0xff]  ;;  %v18_v14 = vld [vmem:[%s523_s0 + $0x8] sm:$0xff]  ;;  %v38_v18 = vadd.f32 %v30_v10, %v22_v9 }
   0x4   :  { %v25_v6 = vld [vmem:[%s524_s1] sm:$0xff]  ;;  %v28_v13 = vld [vmem:[%s524_s1 + $0x18] sm:$0xff]  ;;  %v26_v15 = vld [vmem:[%s524_s1 + $0x8] sm:$0xff] }
   0x5   :  { %v33_v8 = vadd.f32 %v25_v6, %v17_v5  ;;  %v54_v12 = vsel %vm41_vm0, %v317_v3, 0.0  ;;  %v48_v16 = vsel %vm41_vm0, %v35_v7, 0.0  ;;  %v36_v19 = vadd.f32 %v28_v13, %v20_v11  ;;  %v23_v24 = vld [vmem:[%s523_s0 + $0x30] sm:$0xff]  ;;  %v24_v26 = vld [vmem:[%s523_s0 + $0x38] sm:$0xff] }
   0x6   :  { %55 = vadd.xlane.f32.xlu2 %v54_v12  ;;  %49 = vadd.xlane.f32.xlu1 %v48_v16  ;;  %v34_v20 = vadd.f32 %v26_v15, %v18_v14  ;;  %v57_v21 = vsel %vm41_vm0, %v38_v18, 0.0  ;;  %v31_v25 = vld [vmem:[%s524_s1 + $0x30] sm:$0xff]  ;;  %v32_v27 = vld [vmem:[%s524_s1 + $0x38] sm:$0xff] }
   0x7   :  { %v42_v17 = vsel %vm41_vm0, %v33_v8, 0.0  ;;  %v51_v22 = vsel %vm41_vm0, %v36_v19, 0.0  ;;  %v39_v28 = vadd.f32 %v31_v25, %v23_v24  ;;  %v40_v29 = vadd.f32 %v32_v27, %v24_v26  ;;  %v265_v33 = vpop.eup %264 }
   0x8   :  { %43 = vadd.xlane.f32.xlu0 %v42_v17  ;;  %v45_v23 = vsel %vm41_vm0, %v34_v20, 0.0  ;;  %v67_v34 = vmul.f32 32.0, %v265_v33  ;;  %vm71_vm1 = vweird.f32 %v265_v33 }
   0x9   :  { %v60_v30 = vsel %vm41_vm0, %v39_v28, 0.0  ;;  %v63_v31 = vsel %vm41_vm0, %v40_v29, 0.0 }
   0xa   :  { %v68_v35 = vsub.f32 1.0, %v67_v34 }
   0xc   :  { %v69_v36 = vmul.f32 %v265_v33, %v68_v35 }
   0xe   :  { %58 = vadd.xlane.f32.xlu2 %v57_v21  ;;  %52 = vadd.xlane.f32.xlu1 %v51_v22  ;;  %v70_v37 = vadd.f32 %v265_v33, %v69_v36 }
  0x10   :  { %46 = vadd.xlane.f32.xlu0 %v45_v23  ;;  %v367_v38 = vsel %vm71_vm1, %v265_v33, %v70_v37 }
  0x16   :  { %64 = vadd.xlane.f32.xlu1 %v63_v31 }
  0x18   :  { %61 = vadd.xlane.f32.xlu0 %v60_v30 }
  0x79   :  { %v56_v39 = vpop.xlane.xlu2 %55  ;;  %v50_v40 = vpop.xlane.xlu1 %49 }
  0x7a   :  { %v75_v42 = vmul.f32 %v367_v38, %v50_v40  ;;  %v77_v56 = vmul.f32 %v367_v38, %v56_v39 }
  0x7b   :  { %v44_v41 = vpop.xlane.xlu0 %43 }
  0x7c   :  { %v73_v43 = vmul.f32 %v367_v38, %v44_v41  ;;  %v371_v44 = vsub.f32 %v35_v7, %v75_v42  ;;  %v398_v63 = vsub.f32 %v317_v3, %v77_v56 }
  0x7e   :  { %v373_v45 = vsub.f32 %v33_v8, %v73_v43  ;;  %v91_v46 = vmul.f32 %v371_v44, %v371_v44  ;;  %v93_v8 = vmul.f32 %v398_v63, %v398_v63 }
  0x80   :  { %v89_v47 = vmul.f32 %v373_v45, %v373_v45  ;;  %v103_v49 = vsel %vm41_vm0, %v91_v46, 0.0  ;;  %v109_v11 = vsel %vm41_vm0, %v93_v8, 0.0 }
  0x81   :  { %v59_v48 = vpop.xlane.xlu2 %58  ;;  %104 = vadd.xlane.f32.xlu1 %v103_v49  ;;  %v53_v52 = vpop.xlane.xlu1 %52 }
  0x82   :  { %v97_v50 = vsel %vm41_vm0, %v89_v47, 0.0  ;;  %v78_v51 = vmul.f32 %v367_v38, %v59_v48  ;;  %v76_v54 = vmul.f32 %v367_v38, %v53_v52 }
  0x83   :  { %98 = vadd.xlane.f32.xlu2 %v97_v50  ;;  %v47_v53 = vpop.xlane.xlu0 %46 }
  0x84   :  { %v74_v55 = vmul.f32 %v367_v38, %v47_v53  ;;  %v385_v57 = vsub.f32 %v38_v18, %v78_v51  ;;  %v387_v58 = vsub.f32 %v36_v19, %v76_v54  ;;  %v438_v54 = vld [vmem:[%s525_s2] ss:$0 sm:$0xff] }
  0x86   :  { %v389_v59 = vsub.f32 %v34_v20, %v74_v55  ;;  %v94_v60 = vmul.f32 %v385_v57, %v385_v57  ;;  %v92_v61 = vmul.f32 %v387_v58, %v387_v58 }
  0x88   :  { %v90_v62 = vmul.f32 %v389_v59, %v389_v59  ;;  %v112_v0 = vsel %vm41_vm0, %v94_v60, 0.0  ;;  %v106_v1 = vsel %vm41_vm0, %v92_v61, 0.0 }
  0x89   :  { %113 = vadd.xlane.f32.xlu1 %v112_v0  ;;  %v65_v5 = vpop.xlane.xlu1 %64  ;;  %v446_v0 = vld [vmem:[%s526_s3] ss:$0 sm:$0xff] }
  0x8a   :  { %v100_v2 = vsel %vm41_vm0, %v90_v62, 0.0  ;;  %v80_v7 = vmul.f32 %v367_v38, %v65_v5 }
  0x8b   :  { %107 = vadd.xlane.f32.xlu2 %v106_v1  ;;  %v62_v4 = vpop.xlane.xlu0 %61  ;;  %101 = vadd.xlane.f32.xlu0 %v100_v2 }
  0x8c   :  { %v79_v6 = vmul.f32 %v367_v38, %v62_v4  ;;  %v411_v10 = vsub.f32 %v40_v29, %v80_v7 }
  0x8e   :  { %v407_v3 = vsub.f32 %v39_v28, %v79_v6  ;;  %v96_v13 = vmul.f32 %v411_v10, %v411_v10 }
  0x90   :  { %v95_v9 = vmul.f32 %v407_v3, %v407_v3  ;;  %v118_v14 = vsel %vm41_vm0, %v96_v13, 0.0 }
  0x92   :  { %v115_v12 = vsel %vm41_vm0, %v95_v9, 0.0 }
  0x93   :  { %116 = vadd.xlane.f32.xlu2 %v115_v12  ;;  %110 = vadd.xlane.f32.xlu0 %v109_v11 }
  0x9b   :  { %119 = vadd.xlane.f32.xlu0 %v118_v14 }
  0xf4   :  { %v105_v15 = vpop.xlane.xlu1 %104 }
  0xf5   :  { %v123_v17 = vmul.f32 %v105_v15, %v367_v38 }
  0xf6   :  { %v99_v16 = vpop.xlane.xlu2 %98 }
  0xf7   :  { %v121_v18 = vmul.f32 %v99_v16, %v367_v38  ;;  %v131_v19 = vadd.f32 1e-05, %v123_v17 }
  0xf9   :  { %v129_v20 = vadd.f32 1e-05, %v121_v18  ;;  %266 = vrsqrt.f32 %v131_v19  ;;  %vm163_vm2 = vweird.f32 %v131_v19 }
  0xfb   :  { %268 = vrsqrt.f32 %v129_v20  ;;  %vm143_vm6 = vweird.f32 %v129_v20 }
  0xfc   :  { %v114_v21 = vpop.xlane.xlu1 %113 }
  0xfd   :  { %v126_v23 = vmul.f32 %v114_v21, %v367_v38 }
  0xfe   :  { %v108_v22 = vpop.xlane.xlu2 %107  ;;  %v102_v25 = vpop.xlane.xlu0 %101 }
  0xff   :  { %v124_v24 = vmul.f32 %v108_v22, %v367_v38  ;;  %v122_v26 = vmul.f32 %v102_v25, %v367_v38  ;;  %v267_v27 = vpop.eup %266  ;;  %v134_v28 = vadd.f32 1e-05, %v126_v23 }
 0x100   :  { %v158_v31 = vmul.f32 %v267_v27, %v131_v19  ;;  %vm164_vm3 = vweird.f32 %v267_v27 }
 0x101   :  { %v423_v29 = vadd.f32 1e-05, %v124_v24  ;;  %v269_v30 = vpop.eup %268  ;;  %v425_v32 = vadd.f32 1e-05, %v122_v26  ;;  %270 = vrsqrt.f32 %v134_v28  ;;  %vm165_vm5 = vmor %vm163_vm2, %vm164_vm3  ;;  %vm193_vm8 = vweird.f32 %v134_v28 }
 0x102   :  { %v138_v33 = vmul.f32 %v269_v30, %v129_v20  ;;  %v159_v34 = vmul.f32 %v267_v27, %v158_v31  ;;  %vm144_vm4 = vweird.f32 %v269_v30 }
 0x103   :  { %272 = vrsqrt.f32 %v423_v29  ;;  %vm145_vm7 = vmor %vm143_vm6, %vm144_vm4  ;;  %vm173_vm10 = vweird.f32 %v423_v29  ;;  %vm153_vm15 = vweird.f32 %v425_v32 }
 0x104   :  { %v139_v35 = vmul.f32 %v269_v30, %v138_v33  ;;  %274 = vrsqrt.f32 %v425_v32  ;;  %v160_v36 = vmul.f32 0.5, %v159_v34 }
 0x106   :  { %v117_v37 = vpop.xlane.xlu2 %116  ;;  %v140_v39 = vmul.f32 0.5, %v139_v35  ;;  %v111_v41 = vpop.xlane.xlu0 %110  ;;  %v161_v42 = vsub.f32 1.5, %v160_v36 }
 0x107   :  { %v127_v40 = vmul.f32 %v117_v37, %v367_v38  ;;  %v125_v43 = vmul.f32 %v111_v41, %v367_v38  ;;  %v271_v46 = vpop.eup %270 }
 0x108   :  { %v141_v47 = vsub.f32 1.5, %v140_v39  ;;  %v162_v50 = vmul.f32 %v267_v27, %v161_v42  ;;  %v188_v51 = vmul.f32 %v271_v46, %v134_v28  ;;  %vm194_vm9 = vweird.f32 %v271_v46 }
 0x109   :  { %v431_v48 = vadd.f32 1e-05, %v127_v40  ;;  %v273_v49 = vpop.eup %272  ;;  %v433_v52 = vadd.f32 1e-05, %v125_v43  ;;  %vm458_vm11 = vmor %vm193_vm8, %vm194_vm9 }
 0x10a   :  { %v275_v53 = vpop.eup %274  ;;  %v142_v55 = vmul.f32 %v269_v30, %v141_v47  ;;  %v168_v56 = vmul.f32 %v273_v49, %v423_v29  ;;  %v166_v60 = vsel %vm165_vm5, %v267_v27, %v162_v50  ;;  %v189_v61 = vmul.f32 %v271_v46, %v188_v51 }
 0x10b   :  { %276 = vrsqrt.f32 %v431_v48  ;;  %v148_v62 = vmul.f32 %v275_v53, %v425_v32  ;;  %v219_v1 = vmul.f32 %v166_v60, %v371_v44  ;;  %vm174_vm12 = vweird.f32 %v273_v49 }
 0x10c   :  { %v146_v2 = vsel %vm145_vm7, %v269_v30, %v142_v55  ;;  %v169_v4 = vmul.f32 %v273_v49, %v168_v56  ;;  %v190_v6 = vmul.f32 0.5, %v189_v61  ;;  %278 = vrsqrt.f32 %v433_v52  ;;  %vm175_vm14 = vmor %vm173_vm10, %vm174_vm12 }
 0x10d   :  { %v217_v5 = vmul.f32 %v146_v2, %v373_v45  ;;  %v149_v7 = vmul.f32 %v275_v53, %v148_v62  ;;  %v231_v8 = vmul.f32 %v438_v54, %v219_v1  ;;  %vm154_vm13 = vweird.f32 %v275_v53 }
 0x10e   :  { %v170_v9 = vmul.f32 0.5, %v169_v4  ;;  %v120_v11 = vpop.xlane.xlu0 %119  ;;  %v191_v13 = vsub.f32 1.5, %v190_v6  ;;  %vm155_vm1 = vmor %vm153_vm15, %vm154_vm13  ;;  %vm203_vm2 = vweird.f32 %v431_v48  ;;  %vm183_vm6 = vweird.f32 %v433_v52 }
 0x10f   :  { %v229_v12 = vmul.f32 %v438_v54, %v217_v5  ;;  %v150_v14 = vmul.f32 0.5, %v149_v7  ;;  %v128_v44 = vmul.f32 %v120_v11, %v367_v38  ;;  %v243_v16 = vadd.f32 %v446_v0, %v231_v8 }
 0x110   :  { %v171_v17 = vsub.f32 1.5, %v170_v9  ;;  %v192_v19 = vmul.f32 %v271_v46, %v191_v13 }
 0x111   :  { %v277_v15 = vpop.eup %276  ;;  %v241_v18 = vadd.f32 %v446_v0, %v229_v12  ;;  %v151_v20 = vsub.f32 1.5, %v150_v14  ;;  %251 = vst.msk [vmem:[%s527_s4 + $0x10] sm:$0xff] %vm41_vm0, %v243_v16  ;;  %v136_v22 = vadd.f32 1e-05, %v128_v44 }
 0x112   :  { %v198_v21 = vmul.f32 %v277_v15, %v431_v48  ;;  %v172_v38 = vmul.f32 %v273_v49, %v171_v17  ;;  %v279_v23 = vpop.eup %278  ;;  %v196_v24 = vsel %vm458_vm11, %v271_v46, %v192_v19  ;;  %vm204_vm3 = vweird.f32 %v277_v15 }
 0x113   :  { %249 = vst.msk [vmem:[%s527_s4] sm:$0xff] %vm41_vm0, %v241_v18  ;;  %v152_v25 = vmul.f32 %v275_v53, %v151_v20  ;;  %v222_v27 = vmul.f32 %v196_v24, %v385_v57  ;;  %v178_v30 = vmul.f32 %v279_v23, %v433_v52  ;;  %280 = vrsqrt.f32 %v136_v22  ;;  %vm205_vm4 = vmor %vm203_vm2, %vm204_vm3 }
 0x114   :  { %v199_v26 = vmul.f32 %v277_v15, %v198_v21  ;;  %v176_v28 = vsel %vm175_vm14, %v273_v49, %v172_v38  ;;  %vm184_vm5 = vweird.f32 %v279_v23  ;;  %vm213_vm9 = vweird.f32 %v136_v22 }
 0x115   :  { %v220_v31 = vmul.f32 %v176_v28, %v387_v58  ;;  %v156_v33 = vsel %vm155_vm1, %v275_v53, %v152_v25  ;;  %v234_v35 = vmul.f32 %v438_v54, %v222_v27  ;;  %v179_v36 = vmul.f32 %v279_v23, %v178_v30  ;;  %vm185_vm7 = vmor %vm183_vm6, %vm184_vm5 }
 0x116   :  { %v200_v34 = vmul.f32 0.5, %v199_v26  ;;  %v218_v29 = vmul.f32 %v156_v33, %v389_v59 }
 0x117   :  { %v232_v32 = vmul.f32 %v438_v54, %v220_v31  ;;  %v246_v57 = vadd.f32 %v446_v0, %v234_v35  ;;  %v180_v40 = vmul.f32 0.5, %v179_v36 }
 0x118   :  { %v201_v37 = vsub.f32 1.5, %v200_v34  ;;  %v230_v39 = vmul.f32 %v438_v54, %v218_v29 }
 0x119   :  { %v244_v58 = vadd.f32 %v446_v0, %v232_v32  ;;  %254 = vst.msk [vmem:[%s527_s4 + $0x28] sm:$0xff] %vm41_vm0, %v246_v57  ;;  %v181_v42 = vsub.f32 1.5, %v180_v40  ;;  %v281_v43 = vpop.eup %280 }
 0x11a   :  { %v202_v41 = vmul.f32 %v277_v15, %v201_v37  ;;  %v242_v59 = vadd.f32 %v446_v0, %v230_v39  ;;  %v208_v49 = vmul.f32 %v281_v43, %v136_v22  ;;  %vm214_vm8 = vweird.f32 %v281_v43 }
 0x11b   :  { %252 = vst.msk [vmem:[%s527_s4 + $0x18] sm:$0xff] %vm41_vm0, %v244_v58  ;;  %v182_v48 = vmul.f32 %v279_v23, %v181_v42  ;;  %vm215_vm10 = vmor %vm213_vm9, %vm214_vm8 }
 0x11c   :  { %v206_v46 = vsel %vm205_vm4, %v277_v15, %v202_v41  ;;  %250 = vst.msk [vmem:[%s527_s4 + $0x8] sm:$0xff] %vm41_vm0, %v242_v59  ;;  %v209_v53 = vmul.f32 %v281_v43, %v208_v49 }
 0x11d   :  { %v223_v47 = vmul.f32 %v206_v46, %v407_v3  ;;  %v186_v51 = vsel %vm185_vm7, %v279_v23, %v182_v48 }
 0x11e   :  { %v221_v55 = vmul.f32 %v186_v51, %v398_v63  ;;  %v210_v60 = vmul.f32 0.5, %v209_v53 }
 0x11f   :  { %v235_v50 = vmul.f32 %v438_v54, %v223_v47 }
 0x120   :  { %v233_v61 = vmul.f32 %v438_v54, %v221_v55  ;;  %v211_v3 = vsub.f32 1.5, %v210_v60 }
 0x121   :  { %v247_v56 = vadd.f32 %v446_v0, %v235_v50 }
 0x122   :  { %v245_v52 = vadd.f32 %v446_v0, %v233_v61  ;;  %v212_v62 = vmul.f32 %v281_v43, %v211_v3 }
 0x123   :  { %255 = vst.msk [vmem:[%s527_s4 + $0x30] sm:$0xff] %vm41_vm0, %v247_v56 }
 0x124   :  { %253 = vst.msk [vmem:[%s527_s4 + $0x20] sm:$0xff] %vm41_vm0, %v245_v52  ;;  %v216_v63 = vsel %vm215_vm10, %v281_v43, %v212_v62 }
 0x125   :  { %v224_v1 = vmul.f32 %v216_v63, %v411_v10 }
 0x127   :  { %v236_v2 = vmul.f32 %v438_v54, %v224_v1 }
 0x129   :  { %v248_v4 = vadd.f32 %v446_v0, %v236_v2 }
 0x12b   :  { %256 = vst.msk [vmem:[%s527_s4 + $0x38] sm:$0xff] %vm41_vm0, %v248_v4 }

// kernel: seq_classifier_forward.26
= control target key start
LH: loop header
LB: loop body
LE: loop exit
PB: predicated region body
PF: predicated region fallthrough
CT: control target
= control target key end

     0   :  { %vm83_vm0 = vcmask 261120   ;;  %s272_s1 = inlined_call_operand.vmem [shape: f32[128,32], index: 1, kind: input, shape index: {}]   ;;  %s273_s2 = inlined_call_operand.vmem [shape: f32[1,32], index: 2, kind: input, shape index: {}]   ;;  %s274_s0 = inlined_call_operand.vmem [shape: f32[64,128], index: 0, kind: input, shape index: {}]   ;;  %s275_s3 = inlined_call_operand.vmem [shape: f32[64,32], index: 3, kind: output, shape index: {}]  }
   0x1   :  { %v37_v0 = vld [vmem:[%s272_s1 + $0x78] sm:$0xff]  ;;  %v36_v1 = vld [vmem:[%s272_s1 + $0x70] sm:$0xff]  ;;  %v35_v2 = vld [vmem:[%s272_s1 + $0x68] sm:$0xff] }
   0x2   :  { %97 = vmatpush.msra.mxu2 %v37_v0  ;;  %98 = vmatpush.msra.mxu3 %v37_v0  ;;  %v34_v3 = vld [vmem:[%s272_s1 + $0x60] sm:$0xff]  ;;  %v33_v4 = vld [vmem:[%s272_s1 + $0x58] sm:$0xff]  ;;  %v32_v5 = vld [vmem:[%s272_s1 + $0x50] sm:$0xff] }
   0x3   :  { %42 = vmatpush.msra.mxu0 %v37_v0  ;;  %96 = vmatpush.msra.mxu1 %v37_v0  ;;  %v31_v6 = vld [vmem:[%s272_s1 + $0x48] sm:$0xff]  ;;  %v30_v7 = vld [vmem:[%s272_s1 + $0x40] sm:$0xff]  ;;  %v29_v8 = vld [vmem:[%s272_s1 + $0x38] sm:$0xff] }
   0x4   :  { %100 = vmatpush.msra.mxu2 %v36_v1  ;;  %101 = vmatpush.msra.mxu3 %v36_v1  ;;  %v28_v9 = vld [vmem:[%s272_s1 + $0x30] sm:$0xff]  ;;  %v27_v10 = vld [vmem:[%s272_s1 + $0x28] sm:$0xff]  ;;  %v26_v11 = vld [vmem:[%s272_s1 + $0x20] sm:$0xff] }
   0x5   :  { %43 = vmatpush.msra.mxu0 %v36_v1  ;;  %99 = vmatpush.msra.mxu1 %v36_v1  ;;  %v25_v12 = vld [vmem:[%s272_s1 + $0x18] sm:$0xff]  ;;  %v24_v13 = vld [vmem:[%s272_s1 + $0x10] sm:$0xff]  ;;  %v23_v14 = vld [vmem:[%s272_s1 + $0x8] sm:$0xff] }
   0x6   :  { %103 = vmatpush.msra.mxu2 %v35_v2  ;;  %104 = vmatpush.msra.mxu3 %v35_v2  ;;  %v22_v15 = vld [vmem:[%s272_s1] sm:$0xff]  ;;  %v20_v17 = vld [vmem:[%s274_s0 + $0x30] sm:$0xff]  ;;  %v19_v20 = vld [vmem:[%s274_s0 + $0x28] sm:$0xff] }
   0x7   :  { %44 = vmatpush.msra.mxu0 %v35_v2  ;;  %102 = vmatpush.msra.mxu1 %v35_v2  ;;  %v18_v16 = vld [vmem:[%s274_s0 + $0x20] sm:$0xff]  ;;  %v16_v19 = vld [vmem:[%s274_s0 + $0x10] sm:$0xff]  ;;  %v21_v21 = vld [vmem:[%s274_s0 + $0x38] sm:$0xff] }
   0x8   :  { %106 = vmatpush.msra.mxu2 %v34_v3  ;;  %107 = vmatpush.msra.mxu3 %v34_v3  ;;  %v14_v18 = vld [vmem:[%s274_s0] sm:$0xff]  ;;  %v15_v22 = vld [vmem:[%s274_s0 + $0x8] sm:$0xff]  ;;  %v17_v23 = vld [vmem:[%s274_s0 + $0x18] sm:$0xff] }
   0x9   :  { %45 = vmatpush.msra.mxu0 %v34_v3  ;;  %105 = vmatpush.msra.mxu1 %v34_v3  ;;  %v144_v24 = vld [vmem:[%s273_s2] ss:$0 sm:$0xff] }
   0xa   :  { %109 = vmatpush.msra.mxu2 %v33_v4  ;;  %110 = vmatpush.msra.mxu3 %v33_v4 }
   0xb   :  { %46 = vmatpush.msra.mxu0 %v33_v4  ;;  %108 = vmatpush.msra.mxu1 %v33_v4 }
   0xc   :  { %112 = vmatpush.msra.mxu2 %v32_v5  ;;  %113 = vmatpush.msra.mxu3 %v32_v5 }
   0xd   :  { %47 = vmatpush.msra.mxu0 %v32_v5  ;;  %111 = vmatpush.msra.mxu1 %v32_v5 }
   0xe   :  { %115 = vmatpush.msra.mxu2 %v31_v6  ;;  %116 = vmatpush.msra.mxu3 %v31_v6 }
   0xf   :  { %48 = vmatpush.msra.mxu0 %v31_v6  ;;  %114 = vmatpush.msra.mxu1 %v31_v6 }
  0x10   :  { %118 = vmatpush.msra.mxu2 %v30_v7  ;;  %119 = vmatpush.msra.mxu3 %v30_v7 }
  0x11   :  { %49 = vmatpush.msra.mxu0 %v30_v7  ;;  %117 = vmatpush.msra.mxu1 %v30_v7 }
  0x12   :  { %121 = vmatpush.msra.mxu2 %v29_v8  ;;  %122 = vmatpush.msra.mxu3 %v29_v8 }
  0x13   :  { %50 = vmatpush.msra.mxu0 %v29_v8  ;;  %120 = vmatpush.msra.mxu1 %v29_v8 }
  0x14   :  { %124 = vmatpush.msra.mxu2 %v28_v9  ;;  %125 = vmatpush.msra.mxu3 %v28_v9 }
  0x15   :  { %51 = vmatpush.msra.mxu0 %v28_v9  ;;  %123 = vmatpush.msra.mxu1 %v28_v9 }
  0x16   :  { %127 = vmatpush.msra.mxu2 %v27_v10  ;;  %128 = vmatpush.msra.mxu3 %v27_v10 }
  0x17   :  { %52 = vmatpush.msra.mxu0 %v27_v10  ;;  %126 = vmatpush.msra.mxu1 %v27_v10 }
  0x18   :  { %130 = vmatpush.msra.mxu2 %v26_v11  ;;  %131 = vmatpush.msra.mxu3 %v26_v11 }
  0x19   :  { %53 = vmatpush.msra.mxu0 %v26_v11  ;;  %129 = vmatpush.msra.mxu1 %v26_v11 }
  0x1a   :  { %133 = vmatpush.msra.mxu2 %v25_v12  ;;  %134 = vmatpush.msra.mxu3 %v25_v12 }
  0x1b   :  { %54 = vmatpush.msra.mxu0 %v25_v12  ;;  %132 = vmatpush.msra.mxu1 %v25_v12 }
  0x1c   :  { %136 = vmatpush.msra.mxu2 %v24_v13  ;;  %137 = vmatpush.msra.mxu3 %v24_v13 }
  0x1d   :  { %55 = vmatpush.msra.mxu0 %v24_v13  ;;  %135 = vmatpush.msra.mxu1 %v24_v13 }
  0x1e   :  { %139 = vmatpush.msra.mxu2 %v23_v14  ;;  %140 = vmatpush.msra.mxu3 %v23_v14 }
  0x1f   :  { %56 = vmatpush.msra.mxu0 %v23_v14  ;;  %138 = vmatpush.msra.mxu1 %v23_v14 }
  0x20   :  { %142 = vmatpush.msra.mxu2 %v22_v15  ;;  %143 = vmatpush.msra.mxu3 %v22_v15 }
  0x21   :  { %70 = vmatmul.f32.vlgmr.msra.gmra.mxu2 %v18_v16  ;;  %76 = vmatmul.f32.vlgmr.msra.gmra.mxu3 %v20_v17 }
  0x22   :  { %57 = vmatpush.msra.mxu0 %v22_v15  ;;  %141 = vmatpush.msra.mxu1 %v22_v15 }
  0x23   :  { %58 = vmatmul.f32.vlgmr.msra.gmra.mxu0 %v14_v18  ;;  %64 = vmatmul.f32.vlgmr.msra.gmra.mxu1 %v16_v19 }
  0x29   :  { %73 = vmatmul.f32.gmra.mxu2 %v19_v20  ;;  %79 = vmatmul.f32.gmra.mxu3 %v21_v21 }
  0x2b   :  { %61 = vmatmul.f32.gmra.mxu0 %v15_v22  ;;  %67 = vmatmul.f32.gmra.mxu1 %v17_v23 }
  0xa0   :  { %v59_v25 = vpop.f32.mrf.mxu0  ;;  %v65_v26 = vpop.f32.mrf.mxu1 }
  0xa1   :  { %v60_v27 = vadd.f32 %v144_v24, %v59_v25  ;;  %v66_v28 = vadd.f32 %v144_v24, %v65_v26 }
  0xa3   :  { %84 = vst.msk [vmem:[%s275_s3] sm:$0xff] %vm83_vm0, %v60_v27 }
  0xa4   :  { %86 = vst.msk [vmem:[%s275_s3 + $0x10] sm:$0xff] %vm83_vm0, %v66_v28  ;;  %v71_v29 = vpop.f32.mrf.mxu2  ;;  %v77_v30 = vpop.f32.mrf.mxu3 }
  0xa5   :  { %v72_v31 = vadd.f32 %v144_v24, %v71_v29  ;;  %v78_v32 = vadd.f32 %v144_v24, %v77_v30 }
  0xa7   :  { %88 = vst.msk [vmem:[%s275_s3 + $0x20] sm:$0xff] %vm83_vm0, %v72_v31 }
  0xa8   :  { %90 = vst.msk [vmem:[%s275_s3 + $0x30] sm:$0xff] %vm83_vm0, %v78_v32  ;;  %v62_v33 = vpop.f32.mrf.mxu0  ;;  %v68_v34 = vpop.f32.mrf.mxu1 }
  0xa9   :  { %v63_v35 = vadd.f32 %v144_v24, %v62_v33  ;;  %v69_v36 = vadd.f32 %v144_v24, %v68_v34 }
  0xab   :  { %85 = vst.msk [vmem:[%s275_s3 + $0x8] sm:$0xff] %vm83_vm0, %v63_v35 }
  0xac   :  { %87 = vst.msk [vmem:[%s275_s3 + $0x18] sm:$0xff] %vm83_vm0, %v69_v36  ;;  %v74_v37 = vpop.f32.mrf.mxu2  ;;  %v80_v38 = vpop.f32.mrf.mxu3 }
  0xad   :  { %v75_v39 = vadd.f32 %v144_v24, %v74_v37  ;;  %v81_v40 = vadd.f32 %v144_v24, %v80_v38 }
  0xaf   :  { %89 = vst.msk [vmem:[%s275_s3 + $0x28] sm:$0xff] %vm83_vm0, %v75_v39 }
  0xb0   :  { %91 = vst.msk [vmem:[%s275_s3 + $0x38] sm:$0xff] %vm83_vm0, %v81_v40 }

// kernel: seq_classifier_forward.28
= control target key start
LH: loop header
LB: loop body
LE: loop exit
PB: predicated region body
PF: predicated region fallthrough
CT: control target
= control target key end

     0   :  { %vm30_vm0 = vcmask 261120   ;;  %vm96_vm1 = vcmask 785408   ;;  %s229_s1 = inlined_call_operand.vmem [shape: f32[32,96], index: 1, kind: input, shape index: {}]   ;;  %s230_s0 = inlined_call_operand.vmem [shape: f32[64,32], index: 0, kind: input, shape index: {}]   ;;  %s231_s2 = inlined_call_operand.vmem [shape: f32[1,96], index: 2, kind: input, shape index: {}]   ;;  %s232_s3 = inlined_call_operand.vmem [shape: f32[64,96], index: 3, kind: output, shape index: {}]  }
   0x1   :  { %v25_v0 = vld [vmem:[%s229_s1 + $0x18] sm:$0xff]  ;;  %v24_v1 = vld [vmem:[%s229_s1 + $0x10] sm:$0xff]  ;;  %v23_v2 = vld [vmem:[%s229_s1 + $0x8] sm:$0xff] }
   0x2   :  { %118 = vmatpush.msra.mxu2 %v25_v0  ;;  %119 = vmatpush.msra.mxu3 %v25_v0  ;;  %v22_v3 = vld [vmem:[%s229_s1] sm:$0xff]  ;;  %v20_v5 = vld [vmem:[%s230_s0 + $0x30] sm:$0xff]  ;;  %v19_v8 = vld [vmem:[%s230_s0 + $0x28] sm:$0xff] }
   0x3   :  { %67 = vmatpush.msra.mxu0 %v25_v0  ;;  %117 = vmatpush.msra.mxu1 %v25_v0  ;;  %v18_v4 = vld [vmem:[%s230_s0 + $0x20] sm:$0xff]  ;;  %v16_v7 = vld [vmem:[%s230_s0 + $0x10] sm:$0xff]  ;;  %v21_v9 = vld [vmem:[%s230_s0 + $0x38] sm:$0xff] }
   0x4   :  { %121 = vmatpush.msra.mxu2 %v24_v1  ;;  %122 = vmatpush.msra.mxu3 %v24_v1  ;;  %v14_v6 = vld [vmem:[%s230_s0] sm:$0xff]  ;;  %v15_v10 = vld [vmem:[%s230_s0 + $0x8] sm:$0xff]  ;;  %v17_v11 = vld [vmem:[%s230_s0 + $0x18] sm:$0xff] }
   0x5   :  { %68 = vmatpush.msra.mxu0 %v24_v1  ;;  %120 = vmatpush.msra.mxu1 %v24_v1  ;;  %v129_v12 = vld [vmem:[%s231_s2] ss:$0 sm:$0xff] }
   0x6   :  { %124 = vmatpush.msra.mxu2 %v23_v2  ;;  %125 = vmatpush.msra.mxu3 %v23_v2 }
   0x7   :  { %69 = vmatpush.msra.mxu0 %v23_v2  ;;  %123 = vmatpush.msra.mxu1 %v23_v2 }
   0x8   :  { %127 = vmatpush.msra.mxu2 %v22_v3  ;;  %128 = vmatpush.msra.mxu3 %v22_v3 }
   0x9   :  { %113 = vmatmul.msk.f32.vlgmr.msra.gmra.mxu2 %vm30_vm0, %v18_v4  ;;  %115 = vmatmul.msk.f32.vlgmr.msra.gmra.mxu3 %vm30_vm0, %v20_v5 }
   0xa   :  { %70 = vmatpush.msra.mxu0 %v22_v3  ;;  %126 = vmatpush.msra.mxu1 %v22_v3 }
   0xb   :  { %109 = vmatmul.msk.f32.vlgmr.msra.gmra.mxu0 %vm30_vm0, %v14_v6  ;;  %111 = vmatmul.msk.f32.vlgmr.msra.gmra.mxu1 %vm30_vm0, %v16_v7 }
  0x11   :  { %114 = vmatmul.msk.f32.gmra.mxu2 %vm30_vm0, %v19_v8  ;;  %116 = vmatmul.msk.f32.gmra.mxu3 %vm30_vm0, %v21_v9 }
  0x13   :  { %110 = vmatmul.msk.f32.gmra.mxu0 %vm30_vm0, %v15_v10  ;;  %112 = vmatmul.msk.f32.gmra.mxu1 %vm30_vm0, %v17_v11 }
  0x88   :  { %v72_v13 = vpop.f32.mrf.mxu0  ;;  %v78_v14 = vpop.f32.mrf.mxu1 }
  0x89   :  { %v73_v15 = vadd.f32 %v129_v12, %v72_v13  ;;  %v79_v16 = vadd.f32 %v129_v12, %v78_v14 }
  0x8b   :  { %97 = vst.msk [vmem:[%s232_s3] sm:$0xff] %vm96_vm1, %v73_v15 }
  0x8c   :  { %99 = vst.msk [vmem:[%s232_s3 + $0x10] sm:$0xff] %vm96_vm1, %v79_v16  ;;  %v84_v17 = vpop.f32.mrf.mxu2  ;;  %v90_v18 = vpop.f32.mrf.mxu3 }
  0x8d   :  { %v85_v19 = vadd.f32 %v129_v12, %v84_v17  ;;  %v91_v20 = vadd.f32 %v129_v12, %v90_v18 }
  0x8f   :  { %101 = vst.msk [vmem:[%s232_s3 + $0x20] sm:$0xff] %vm96_vm1, %v85_v19 }
  0x90   :  { %103 = vst.msk [vmem:[%s232_s3 + $0x30] sm:$0xff] %vm96_vm1, %v91_v20  ;;  %v75_v21 = vpop.f32.mrf.mxu0  ;;  %v81_v22 = vpop.f32.mrf.mxu1 }
  0x91   :  { %v76_v23 = vadd.f32 %v129_v12, %v75_v21  ;;  %v82_v24 = vadd.f32 %v129_v12, %v81_v22 }
  0x93   :  { %98 = vst.msk [vmem:[%s232_s3 + $0x8] sm:$0xff] %vm96_vm1, %v76_v23 }
  0x94   :  { %100 = vst.msk [vmem:[%s232_s3 + $0x18] sm:$0xff] %vm96_vm1, %v82_v24  ;;  %v87_v25 = vpop.f32.mrf.mxu2  ;;  %v93_v26 = vpop.f32.mrf.mxu3 }
  0x95   :  { %v88_v27 = vadd.f32 %v129_v12, %v87_v25  ;;  %v94_v28 = vadd.f32 %v129_v12, %v93_v26 }
  0x97   :  { %102 = vst.msk [vmem:[%s232_s3 + $0x28] sm:$0xff] %vm96_vm1, %v88_v27 }
  0x98   :  { %104 = vst.msk [vmem:[%s232_s3 + $0x38] sm:$0xff] %vm96_vm1, %v94_v28 }

// kernel: seq_classifier_forward.35
= control target key start
LH: loop header
LB: loop body
LE: loop exit
PB: predicated region body
PF: predicated region fallthrough
CT: control target
= control target key end

     0   :  { %vm22_vm0 = vcmask 261120   ;;  %v263_v16 = vmov 32.0   ;;  %s471_s0 = inlined_call_operand.vmem [shape: f32[64,32], index: 0, kind: input, shape index: {}]   ;;  %s472_s1 = inlined_call_operand.vmem [shape: f32[1,32], index: 1, kind: input, shape index: {}]   ;;  %s473_s2 = inlined_call_operand.vmem [shape: f32[1,32], index: 2, kind: input, shape index: {}]   ;;  %s474_s3 = inlined_call_operand.vmem [shape: f32[64,32], index: 3, kind: output, shape index: {}]  }
   0x1   :  { %v18_v0 = vld [vmem:[%s471_s0 + $0x20] sm:$0xff]  ;;  %v16_v1 = vld [vmem:[%s471_s0 + $0x10] sm:$0xff]  ;;  %v19_v6 = vld [vmem:[%s471_s0 + $0x28] sm:$0xff]  ;;  %245 = vrcp.f32 %v263_v16 }
   0x2   :  { %v14_v2 = vld [vmem:[%s471_s0] sm:$0xff]  ;;  %v35_v3 = vsel %vm22_vm0, %v18_v0, 0.0  ;;  %v29_v4 = vsel %vm22_vm0, %v16_v1, 0.0  ;;  %v17_v7 = vld [vmem:[%s471_s0 + $0x18] sm:$0xff]  ;;  %v15_v8 = vld [vmem:[%s471_s0 + $0x8] sm:$0xff]  ;;  %v38_v9 = vsel %vm22_vm0, %v19_v6, 0.0 }
   0x3   :  { %v23_v5 = vsel %vm22_vm0, %v14_v2, 0.0  ;;  %36 = vadd.xlane.f32.xlu2 %v35_v3  ;;  %30 = vadd.xlane.f32.xlu1 %v29_v4  ;;  %v32_v10 = vsel %vm22_vm0, %v17_v7, 0.0  ;;  %v26_v11 = vsel %vm22_vm0, %v15_v8, 0.0  ;;  %v21_v12 = vld [vmem:[%s471_s0 + $0x38] sm:$0xff]  ;;  %v20_v13 = vld [vmem:[%s471_s0 + $0x30] sm:$0xff] }
   0x4   :  { %24 = vadd.xlane.f32.xlu0 %v23_v5  ;;  %v44_v14 = vsel %vm22_vm0, %v21_v12, 0.0  ;;  %v41_v15 = vsel %vm22_vm0, %v20_v13, 0.0 }
   0x7   :  { %v246_v17 = vpop.eup %245 }
   0x8   :  { %v48_v18 = vmul.f32 32.0, %v246_v17  ;;  %vm52_vm1 = vweird.f32 %v246_v17 }
   0xa   :  { %v49_v19 = vsub.f32 1.0, %v48_v18 }
   0xb   :  { %39 = vadd.xlane.f32.xlu2 %v38_v9  ;;  %33 = vadd.xlane.f32.xlu1 %v32_v10 }
   0xc   :  { %27 = vadd.xlane.f32.xlu0 %v26_v11  ;;  %v50_v20 = vmul.f32 %v246_v17, %v49_v19 }
   0xe   :  { %v51_v21 = vadd.f32 %v246_v17, %v50_v20 }
  0x10   :  { %v316_v22 = vsel %vm52_vm1, %v246_v17, %v51_v21 }
  0x13   :  { %45 = vadd.xlane.f32.xlu1 %v44_v14 }
  0x14   :  { %42 = vadd.xlane.f32.xlu0 %v41_v15 }
  0x76   :  { %v37_v23 = vpop.xlane.xlu2 %36  ;;  %v31_v24 = vpop.xlane.xlu1 %30 }
  0x77   :  { %v56_v25 = vmul.f32 %v316_v22, %v31_v24  ;;  %v25_v26 = vpop.xlane.xlu0 %24  ;;  %v58_v39 = vmul.f32 %v316_v22, %v37_v23 }
  0x78   :  { %v54_v27 = vmul.f32 %v316_v22, %v25_v26 }
  0x79   :  { %v320_v28 = vsub.f32 %v16_v1, %v56_v25  ;;  %v344_v46 = vsub.f32 %v18_v0, %v58_v39 }
  0x7a   :  { %v322_v29 = vsub.f32 %v14_v2, %v54_v27 }
  0x7b   :  { %v72_v30 = vmul.f32 %v320_v28, %v320_v28  ;;  %v74_v55 = vmul.f32 %v344_v46, %v344_v46 }
  0x7c   :  { %v70_v31 = vmul.f32 %v322_v29, %v322_v29 }
  0x7d   :  { %v84_v32 = vsel %vm22_vm0, %v72_v30, 0.0  ;;  %v90_v58 = vsel %vm22_vm0, %v74_v55, 0.0 }
  0x7e   :  { %v40_v33 = vpop.xlane.xlu2 %39  ;;  %85 = vadd.xlane.f32.xlu1 %v84_v32  ;;  %v34_v34 = vpop.xlane.xlu1 %33  ;;  %v78_v35 = vsel %vm22_vm0, %v70_v31, 0.0 }
  0x7f   :  { %v59_v36 = vmul.f32 %v316_v22, %v40_v33  ;;  %v57_v37 = vmul.f32 %v316_v22, %v34_v34  ;;  %79 = vadd.xlane.f32.xlu2 %v78_v35  ;;  %v28_v38 = vpop.xlane.xlu0 %27 }
  0x80   :  { %v55_v40 = vmul.f32 %v316_v22, %v28_v38 }
  0x81   :  { %v334_v41 = vsub.f32 %v19_v6, %v59_v36  ;;  %v336_v42 = vsub.f32 %v17_v7, %v57_v37  ;;  %v384_v37 = vld [vmem:[%s472_s1] ss:$0 sm:$0xff] }
  0x82   :  { %v338_v43 = vsub.f32 %v15_v8, %v55_v40 }
  0x83   :  { %v75_v44 = vmul.f32 %v334_v41, %v334_v41  ;;  %v73_v45 = vmul.f32 %v336_v42, %v336_v42 }
  0x84   :  { %v71_v47 = vmul.f32 %v338_v43, %v338_v43 }
  0x85   :  { %v93_v48 = vsel %vm22_vm0, %v75_v44, 0.0  ;;  %v87_v49 = vsel %vm22_vm0, %v73_v45, 0.0 }
  0x86   :  { %94 = vadd.xlane.f32.xlu1 %v93_v48  ;;  %v81_v50 = vsel %vm22_vm0, %v71_v47, 0.0  ;;  %v46_v51 = vpop.xlane.xlu1 %45  ;;  %v394_v48 = vld [vmem:[%s473_s2] ss:$0 sm:$0xff] }
  0x87   :  { %88 = vadd.xlane.f32.xlu2 %v87_v49  ;;  %82 = vadd.xlane.f32.xlu0 %v81_v50  ;;  %v43_v52 = vpop.xlane.xlu0 %42  ;;  %v61_v54 = vmul.f32 %v316_v22, %v46_v51 }
  0x88   :  { %v60_v53 = vmul.f32 %v316_v22, %v43_v52 }
  0x89   :  { %v357_v57 = vsub.f32 %v21_v12, %v61_v54 }
  0x8a   :  { %v355_v56 = vsub.f32 %v20_v13, %v60_v53 }
  0x8b   :  { %v77_v61 = vmul.f32 %v357_v57, %v357_v57 }
  0x8c   :  { %v76_v59 = vmul.f32 %v355_v56, %v355_v56 }
  0x8d   :  { %v99_v62 = vsel %vm22_vm0, %v77_v61, 0.0 }
  0x8e   :  { %v96_v60 = vsel %vm22_vm0, %v76_v59, 0.0 }
  0x8f   :  { %91 = vadd.xlane.f32.xlu0 %v90_v58  ;;  %97 = vadd.xlane.f32.xlu2 %v96_v60 }
  0x97   :  { %100 = vadd.xlane.f32.xlu0 %v99_v62 }
  0xf1   :  { %v86_v63 = vpop.xlane.xlu1 %85 }
  0xf2   :  { %v104_v0 = vmul.f32 %v86_v63, %v316_v22  ;;  %v80_v1 = vpop.xlane.xlu2 %79 }
  0xf3   :  { %v102_v2 = vmul.f32 %v80_v1, %v316_v22 }
  0xf4   :  { %v112_v3 = vadd.f32 1e-05, %v104_v0 }
  0xf5   :  { %v110_v4 = vadd.f32 1e-05, %v102_v2 }
  0xf6   :  { %247 = vrsqrt.f32 %v112_v3  ;;  %vm144_vm2 = vweird.f32 %v112_v3 }
  0xf7   :  { %249 = vrsqrt.f32 %v110_v4  ;;  %vm124_vm6 = vweird.f32 %v110_v4 }
  0xf9   :  { %v95_v5 = vpop.xlane.xlu1 %94 }
  0xfa   :  { %v107_v6 = vmul.f32 %v95_v5, %v316_v22  ;;  %v89_v7 = vpop.xlane.xlu2 %88  ;;  %v83_v8 = vpop.xlane.xlu0 %82 }
  0xfb   :  { %v105_v9 = vmul.f32 %v89_v7, %v316_v22  ;;  %v103_v10 = vmul.f32 %v83_v8, %v316_v22 }
  0xfc   :  { %v248_v11 = vpop.eup %247  ;;  %v115_v12 = vadd.f32 1e-05, %v107_v6 }
  0xfd   :  { %v250_v13 = vpop.eup %249  ;;  %v139_v14 = vmul.f32 %v248_v11, %v112_v3  ;;  %v371_v15 = vadd.f32 1e-05, %v105_v9  ;;  %v373_v16 = vadd.f32 1e-05, %v103_v10  ;;  %vm145_vm3 = vweird.f32 %v248_v11 }
  0xfe   :  { %v119_v17 = vmul.f32 %v250_v13, %v110_v4  ;;  %251 = vrsqrt.f32 %v115_v12  ;;  %vm125_vm4 = vweird.f32 %v250_v13  ;;  %vm146_vm5 = vmor %vm144_vm2, %vm145_vm3  ;;  %vm174_vm8 = vweird.f32 %v115_v12 }
  0xff   :  { %v140_v18 = vmul.f32 %v248_v11, %v139_v14  ;;  %253 = vrsqrt.f32 %v371_v15  ;;  %vm126_vm7 = vmor %vm124_vm6, %vm125_vm4  ;;  %vm154_vm10 = vweird.f32 %v371_v15  ;;  %vm134_vm15 = vweird.f32 %v373_v16 }
 0x100   :  { %v120_v19 = vmul.f32 %v250_v13, %v119_v17  ;;  %255 = vrsqrt.f32 %v373_v16 }
 0x101   :  { %v141_v20 = vmul.f32 0.5, %v140_v18 }
 0x102   :  { %v121_v21 = vmul.f32 0.5, %v120_v19  ;;  %v98_v23 = vpop.xlane.xlu2 %97  ;;  %v92_v24 = vpop.xlane.xlu0 %91 }
 0x103   :  { %v142_v25 = vsub.f32 1.5, %v141_v20  ;;  %v108_v26 = vmul.f32 %v98_v23, %v316_v22  ;;  %v106_v27 = vmul.f32 %v92_v24, %v316_v22 }
 0x104   :  { %v252_v30 = vpop.eup %251  ;;  %v122_v31 = vsub.f32 1.5, %v121_v21 }
 0x105   :  { %v254_v32 = vpop.eup %253  ;;  %v143_v33 = vmul.f32 %v248_v11, %v142_v25  ;;  %v169_v34 = vmul.f32 %v252_v30, %v115_v12  ;;  %v379_v35 = vadd.f32 1e-05, %v108_v26  ;;  %v388_v40 = vadd.f32 1e-05, %v106_v27 }
 0x106   :  { %v256_v36 = vpop.eup %255  ;;  %v123_v38 = vmul.f32 %v250_v13, %v122_v31  ;;  %v149_v39 = vmul.f32 %v254_v32, %v371_v15  ;;  %vm175_vm9 = vweird.f32 %v252_v30  ;;  %vm155_vm12 = vweird.f32 %v254_v32 }
 0x107   :  { %v147_v44 = vsel %vm146_vm5, %v248_v11, %v143_v33  ;;  %v170_v45 = vmul.f32 %v252_v30, %v169_v34  ;;  %v129_v47 = vmul.f32 %v256_v36, %v373_v16  ;;  %257 = vrsqrt.f32 %v379_v35  ;;  %vm406_vm11 = vmor %vm174_vm8, %vm175_vm9 }
 0x108   :  { %v200_v49 = vmul.f32 %v147_v44, %v320_v28  ;;  %v127_v50 = vsel %vm126_vm7, %v250_v13, %v123_v38  ;;  %v150_v51 = vmul.f32 %v254_v32, %v149_v39  ;;  %259 = vrsqrt.f32 %v388_v40  ;;  %vm156_vm14 = vmor %vm154_vm10, %vm155_vm12 }
 0x109   :  { %v198_v52 = vmul.f32 %v127_v50, %v322_v29  ;;  %v171_v53 = vmul.f32 0.5, %v170_v45  ;;  %v130_v54 = vmul.f32 %v256_v36, %v129_v47  ;;  %vm135_vm13 = vweird.f32 %v256_v36 }
 0x10a   :  { %v212_v55 = vmul.f32 %v384_v37, %v200_v49  ;;  %v151_v58 = vmul.f32 0.5, %v150_v51  ;;  %v101_v59 = vpop.xlane.xlu0 %100  ;;  %vm136_vm1 = vmor %vm134_vm15, %vm135_vm13  ;;  %vm184_vm2 = vweird.f32 %v379_v35  ;;  %vm164_vm6 = vweird.f32 %v388_v40 }
 0x10b   :  { %v210_v60 = vmul.f32 %v384_v37, %v198_v52  ;;  %v172_v28 = vsub.f32 1.5, %v171_v53  ;;  %v131_v61 = vmul.f32 0.5, %v130_v54  ;;  %v109_v62 = vmul.f32 %v101_v59, %v316_v22 }
 0x10c   :  { %v224_v63 = vadd.f32 %v394_v48, %v212_v55  ;;  %v152_v0 = vsub.f32 1.5, %v151_v58 }
 0x10d   :  { %v222_v1 = vadd.f32 %v394_v48, %v210_v60  ;;  %v173_v2 = vmul.f32 %v252_v30, %v172_v28  ;;  %v132_v3 = vsub.f32 1.5, %v131_v61  ;;  %v117_v4 = vadd.f32 1e-05, %v109_v62  ;;  %v258_v5 = vpop.eup %257 }
 0x10e   :  { %232 = vst.msk [vmem:[%s474_s3 + $0x10] sm:$0xff] %vm22_vm0, %v224_v63  ;;  %v153_v22 = vmul.f32 %v254_v32, %v152_v0  ;;  %v179_v8 = vmul.f32 %v258_v5, %v379_v35  ;;  %v260_v9 = vpop.eup %259  ;;  %vm185_vm3 = vweird.f32 %v258_v5 }
 0x10f   :  { %230 = vst.msk [vmem:[%s474_s3] sm:$0xff] %vm22_vm0, %v222_v1  ;;  %v177_v6 = vsel %vm406_vm11, %v252_v30, %v173_v2  ;;  %v133_v7 = vmul.f32 %v256_v36, %v132_v3  ;;  %261 = vrsqrt.f32 %v117_v4  ;;  %v159_v17 = vmul.f32 %v260_v9, %v388_v40  ;;  %vm186_vm5 = vmor %vm184_vm2, %vm185_vm3 }
 0x110   :  { %v203_v10 = vmul.f32 %v177_v6, %v334_v41  ;;  %v157_v11 = vsel %vm156_vm14, %v254_v32, %v153_v22  ;;  %v180_v14 = vmul.f32 %v258_v5, %v179_v8  ;;  %vm165_vm4 = vweird.f32 %v260_v9 }
 0x111   :  { %v201_v12 = vmul.f32 %v157_v11, %v336_v42  ;;  %v137_v13 = vsel %vm136_vm1, %v256_v36, %v133_v7  ;;  %v160_v20 = vmul.f32 %v260_v9, %v159_v17  ;;  %vm166_vm7 = vmor %vm164_vm6, %vm165_vm4  ;;  %vm194_vm9 = vweird.f32 %v117_v4 }
 0x112   :  { %v215_v15 = vmul.f32 %v384_v37, %v203_v10  ;;  %v199_v18 = vmul.f32 %v137_v13, %v338_v43  ;;  %v181_v19 = vmul.f32 0.5, %v180_v14 }
 0x113   :  { %v213_v16 = vmul.f32 %v384_v37, %v201_v12  ;;  %v161_v24 = vmul.f32 0.5, %v160_v20 }
 0x114   :  { %v227_v41 = vadd.f32 %v394_v48, %v215_v15  ;;  %v211_v21 = vmul.f32 %v384_v37, %v199_v18  ;;  %v182_v23 = vsub.f32 1.5, %v181_v19 }
 0x115   :  { %v225_v42 = vadd.f32 %v394_v48, %v213_v16  ;;  %v262_v25 = vpop.eup %261  ;;  %v162_v27 = vsub.f32 1.5, %v161_v24 }
 0x116   :  { %235 = vst.msk [vmem:[%s474_s3 + $0x28] sm:$0xff] %vm22_vm0, %v227_v41  ;;  %v223_v43 = vadd.f32 %v394_v48, %v211_v21  ;;  %v183_v26 = vmul.f32 %v258_v5, %v182_v23  ;;  %v189_v30 = vmul.f32 %v262_v25, %v117_v4  ;;  %vm195_vm8 = vweird.f32 %v262_v25 }
 0x117   :  { %233 = vst.msk [vmem:[%s474_s3 + $0x18] sm:$0xff] %vm22_vm0, %v225_v42  ;;  %v163_v32 = vmul.f32 %v260_v9, %v162_v27  ;;  %vm196_vm10 = vmor %vm194_vm9, %vm195_vm8 }
 0x118   :  { %231 = vst.msk [vmem:[%s474_s3 + $0x8] sm:$0xff] %vm22_vm0, %v223_v43  ;;  %v187_v31 = vsel %vm186_vm5, %v258_v5, %v183_v26  ;;  %v190_v33 = vmul.f32 %v262_v25, %v189_v30 }
 0x119   :  { %v204_v34 = vmul.f32 %v187_v31, %v355_v56  ;;  %v167_v35 = vsel %vm166_vm7, %v260_v9, %v163_v32 }
 0x11a   :  { %v191_v36 = vmul.f32 0.5, %v190_v33  ;;  %v202_v39 = vmul.f32 %v167_v35, %v344_v46 }
 0x11b   :  { %v216_v38 = vmul.f32 %v384_v37, %v204_v34 }
 0x11c   :  { %v192_v44 = vsub.f32 1.5, %v191_v36  ;;  %v214_v47 = vmul.f32 %v384_v37, %v202_v39 }
 0x11d   :  { %v228_v45 = vadd.f32 %v394_v48, %v216_v38 }
 0x11e   :  { %v193_v49 = vmul.f32 %v262_v25, %v192_v44  ;;  %v226_v56 = vadd.f32 %v394_v48, %v214_v47 }
 0x11f   :  { %236 = vst.msk [vmem:[%s474_s3 + $0x30] sm:$0xff] %vm22_vm0, %v228_v45 }
 0x120   :  { %v197_v40 = vsel %vm196_vm10, %v262_v25, %v193_v49  ;;  %234 = vst.msk [vmem:[%s474_s3 + $0x20] sm:$0xff] %vm22_vm0, %v226_v56 }
 0x121   :  { %v205_v46 = vmul.f32 %v197_v40, %v357_v57 }
 0x123   :  { %v217_v50 = vmul.f32 %v384_v37, %v205_v46 }
 0x125   :  { %v229_v51 = vadd.f32 %v394_v48, %v217_v50 }
 0x127   :  { %237 = vst.msk [vmem:[%s474_s3 + $0x38] sm:$0xff] %vm22_vm0, %v229_v51 }

// kernel: seq_classifier_forward.38
= control target key start
LH: loop header
LB: loop body
LE: loop exit
PB: predicated region body
PF: predicated region fallthrough
CT: control target
= control target key end

     0   :  { %vm23_vm0 = vcmask 261120   ;;  %s96_s1 = inlined_call_operand.vmem [shape: f32[32,128], index: 1, kind: input, shape index: {}]   ;;  %s97_s2 = inlined_call_operand.vmem [shape: f32[1,128], index: 2, kind: input, shape index: {}]   ;;  %s98_s0 = inlined_call_operand.vmem [shape: f32[2,32], index: 0, kind: input, shape index: {}]   ;;  %s99_s3 = inlined_call_operand.vmem [shape: f32[2,128], index: 3, kind: output, shape index: {}]  }
   0x1   :  { %v18_v0 = vld [vmem:[%s96_s1 + $0x18] sm:$0xff]  ;;  %v17_v1 = vld [vmem:[%s96_s1 + $0x10] sm:$0xff]  ;;  %v16_v2 = vld [vmem:[%s96_s1 + $0x8] sm:$0xff] }
   0x2   :  { %39 = vmatpush.msra.mxu0 %v18_v0  ;;  %v15_v3 = vld [vmem:[%s96_s1] sm:$0xff] }
   0x3   :  { %v14_v4 = vld [vmem:[%s98_s0] sm:$0x3] }
   0x4   :  { %40 = vmatpush.msra.mxu0 %v17_v1  ;;  %v54_v5 = vld [vmem:[%s97_s2] ss:$0 sm:$0xff] }
   0x6   :  { %41 = vmatpush.msra.mxu0 %v16_v2 }
   0x8   :  { %42 = vmatpush.msra.mxu0 %v15_v3 }
   0x9   :  { %53 = vmatmul.msk.f32.vlgmr.msra.gmra.mxu0 %vm23_vm0, %v14_v4 }
  0x86   :  { %v44_v6 = vpop.f32.mrf.mxu0 }
  0x87   :  { %v45_v7 = vadd.f32 %v54_v5, %v44_v6 }
  0x89   :  { %v47_v8 = vmax.f32 %v45_v7, 0.0 }
  0x8b   :  { %48 = vst [vmem:[%s99_s3] sm:$0x3] %v47_v8 }

// kernel: seq_classifier_forward.39
= control target key start
LH: loop header
LB: loop body
LE: loop exit
PB: predicated region body
PF: predicated region fallthrough
CT: control target
= control target key end

     0   :  { %s180_s0 = inlined_call_operand.vmem [shape: f32[2,128], index: 0, kind: input, shape index: {}]   ;;  %s181_s1 = inlined_call_operand.vmem [shape: f32[128,5], index: 1, kind: input, shape index: {}]   ;;  %s182_s2 = inlined_call_operand.vmem [shape: f32[1,5], index: 2, kind: input, shape index: {}]   ;;  %s183_s3 = inlined_call_operand.hbm [shape: f32[2,5], index: 3, kind: output, shape index: {}]  }
   0x1   :  { %v31_v0 = vld [vmem:[%s181_s1 + $0x78] sm:$0xff]  ;;  %v30_v1 = vld [vmem:[%s181_s1 + $0x70] sm:$0xff]  ;;  %v29_v2 = vld [vmem:[%s181_s1 + $0x68] sm:$0xff] }
   0x2   :  { %36 = vmatpush.msra.mxu0 %v31_v0  ;;  %v28_v3 = vld [vmem:[%s181_s1 + $0x60] sm:$0xff]  ;;  %v27_v4 = vld [vmem:[%s181_s1 + $0x58] sm:$0xff] }
   0x4   :  { %37 = vmatpush.msra.mxu0 %v30_v1 }
   0x6   :  { %38 = vmatpush.msra.mxu0 %v29_v2 }
   0x7   :  { %8 = vsyncpa [#allocation3], 0  ;;  %v26_v5 = vld [vmem:[%s181_s1 + $0x50] sm:$0xff]  ;;  %v25_v6 = vld [vmem:[%s181_s1 + $0x48] sm:$0xff]  ;;  %s102_s21 = smov [#allocation2]   ;;  %s65_s25 = sshll.u32 %s183_s3, 4  ;;  %s66_s25 = int_to_ptr.hbm [resolvable:$true] %s65_s25 }
   0x8   :  { %39 = vmatpush.msra.mxu0 %v28_v3  ;;  %v24_v7 = vld [vmem:[%s181_s1 + $0x40] sm:$0xff]  ;;  %v23_v8 = vld [vmem:[%s181_s1 + $0x38] sm:$0xff]  ;;  %v22_v9 = vld [vmem:[%s181_s1 + $0x30] sm:$0xff]  ;;  %s63_s22 = sshll.u32 %s102_s21, 4  ;;  %vm56_vm0 = vcmask 33792   ;;  %s64_s22 = int_to_ptr.vmem [resolvable:$true] %s63_s22 }
   0x9   :  { %v21_v10 = vld [vmem:[%s181_s1 + $0x28] sm:$0xff]  ;;  %v20_v11 = vld [vmem:[%s181_s1 + $0x20] sm:$0xff]  ;;  %v19_v12 = vld [vmem:[%s181_s1 + $0x18] sm:$0xff] }
   0xa   :  { %40 = vmatpush.msra.mxu0 %v27_v4  ;;  %v18_v13 = vld [vmem:[%s181_s1 + $0x10] sm:$0xff]  ;;  %v17_v14 = vld [vmem:[%s181_s1 + $0x8] sm:$0xff]  ;;  %v16_v15 = vld [vmem:[%s181_s1] sm:$0xff] }
   0xb   :  { %v15_v16 = vld [vmem:[%s180_s0] sm:$0x3] }
   0xc   :  { %41 = vmatpush.msra.mxu0 %v26_v5  ;;  %v75_v17 = vld [vmem:[%s182_s2] ss:$0 sm:$0xff] }
   0xe   :  { %42 = vmatpush.msra.mxu0 %v25_v6 }
  0x10   :  { %43 = vmatpush.msra.mxu0 %v24_v7 }
  0x12   :  { %44 = vmatpush.msra.mxu0 %v23_v8 }
  0x14   :  { %45 = vmatpush.msra.mxu0 %v22_v9 }
  0x16   :  { %46 = vmatpush.msra.mxu0 %v21_v10 }
  0x18   :  { %47 = vmatpush.msra.mxu0 %v20_v11 }
  0x1a   :  { %48 = vmatpush.msra.mxu0 %v19_v12 }
  0x1c   :  { %49 = vmatpush.msra.mxu0 %v18_v13 }
  0x1e   :  { %50 = vmatpush.msra.mxu0 %v17_v14 }
  0x20   :  { %51 = vmatpush.msra.mxu0 %v16_v15 }
  0x21   :  { %52 = vmatmul.f32.vlgmr.msra.gmra.mxu0 %v15_v16 }
  0x9e   :  { %v53_v18 = vpop.f32.mrf.mxu0 }
  0x9f   :  { %v54_v19 = vadd.f32 %v75_v17, %v53_v18 }
  0xa1   :  { %57 = vst.msk [vmem:[#allocation2] sm:$0x3] %vm56_vm0, %v54_v19 }
  0xa2   :  { %68 = dma.vmem_to_hbm [thread:$0]  %s64_s22, 32, %s66_s25, [#allocation3]  }
  0xa3   :  { %100 = dma.done.wait [#allocation3], 32  }
  0xa4   :  { %101 = vsyncadd [#allocation3], 4294967264 }
  0xa5   :  { %73 = vsyncpa [#allocation3], 1 }

// kernel: seq_classifier_forward.37
= control target key start
LH: loop header
LB: loop body
LE: loop exit
PB: predicated region body
PF: predicated region fallthrough
CT: control target
= control target key end

     0   :  { %vm85_vm0 = vcmask 7168   ;;  %s274_s1 = inlined_call_operand.vmem [shape: f32[128,1], index: 1, kind: input, shape index: {}]   ;;  %s275_s2 = inlined_call_operand.<no memory space> [shape: f32[1,1], index: 2, kind: input, shape index: {}]   ;;  %s276_s0 = inlined_call_operand.vmem [shape: f32[64,128], index: 0, kind: input, shape index: {}]   ;;  %s277_s3 = inlined_call_operand.vmem [shape: f32[64,1], index: 3, kind: output, shape index: {}]  }
   0x1   :  { %v39_v0 = vld [vmem:[%s274_s1 + $0x78] sm:$0xff]  ;;  %v38_v1 = vld [vmem:[%s274_s1 + $0x70] sm:$0xff]  ;;  %v37_v2 = vld [vmem:[%s274_s1 + $0x68] sm:$0xff]  ;;  %v8_v7 = vstv %s275_s2 }
   0x2   :  { %99 = vmatpush.msra.mxu2 %v39_v0  ;;  %100 = vmatpush.msra.mxu3 %v39_v0  ;;  %v36_v3 = vld [vmem:[%s274_s1 + $0x60] sm:$0xff]  ;;  %v35_v4 = vld [vmem:[%s274_s1 + $0x58] sm:$0xff]  ;;  %v34_v5 = vld [vmem:[%s274_s1 + $0x50] sm:$0xff]  ;;  %9 = vst [vmem:[#allocation2] sm:$0x1] %v8_v7 }
   0x3   :  { %44 = vmatpush.msra.mxu0 %v39_v0  ;;  %98 = vmatpush.msra.mxu1 %v39_v0  ;;  %v33_v6 = vld [vmem:[%s274_s1 + $0x48] sm:$0xff]  ;;  %v32_v8 = vld [vmem:[%s274_s1 + $0x40] sm:$0xff]  ;;  %v31_v9 = vld [vmem:[%s274_s1 + $0x38] sm:$0xff] }
   0x4   :  { %102 = vmatpush.msra.mxu2 %v38_v1  ;;  %103 = vmatpush.msra.mxu3 %v38_v1  ;;  %v30_v10 = vld [vmem:[%s274_s1 + $0x30] sm:$0xff]  ;;  %v29_v11 = vld [vmem:[%s274_s1 + $0x28] sm:$0xff]  ;;  %v28_v12 = vld [vmem:[%s274_s1 + $0x20] sm:$0xff] }
   0x5   :  { %45 = vmatpush.msra.mxu0 %v38_v1  ;;  %101 = vmatpush.msra.mxu1 %v38_v1  ;;  %v27_v13 = vld [vmem:[%s274_s1 + $0x18] sm:$0xff]  ;;  %v26_v14 = vld [vmem:[%s274_s1 + $0x10] sm:$0xff]  ;;  %v25_v15 = vld [vmem:[%s274_s1 + $0x8] sm:$0xff] }
   0x6   :  { %105 = vmatpush.msra.mxu2 %v37_v2  ;;  %106 = vmatpush.msra.mxu3 %v37_v2  ;;  %v24_v16 = vld [vmem:[%s274_s1] sm:$0xff]  ;;  %v22_v18 = vld [vmem:[%s276_s0 + $0x30] sm:$0xff]  ;;  %v21_v21 = vld [vmem:[%s276_s0 + $0x28] sm:$0xff] }
   0x7   :  { %46 = vmatpush.msra.mxu0 %v37_v2  ;;  %104 = vmatpush.msra.mxu1 %v37_v2  ;;  %v20_v17 = vld [vmem:[%s276_s0 + $0x20] sm:$0xff]  ;;  %v18_v20 = vld [vmem:[%s276_s0 + $0x10] sm:$0xff]  ;;  %v23_v22 = vld [vmem:[%s276_s0 + $0x38] sm:$0xff] }
   0x8   :  { %108 = vmatpush.msra.mxu2 %v36_v3  ;;  %109 = vmatpush.msra.mxu3 %v36_v3  ;;  %v16_v19 = vld [vmem:[%s276_s0] sm:$0xff]  ;;  %v17_v23 = vld [vmem:[%s276_s0 + $0x8] sm:$0xff]  ;;  %v19_v24 = vld [vmem:[%s276_s0 + $0x18] sm:$0xff] }
   0x9   :  { %47 = vmatpush.msra.mxu0 %v36_v3  ;;  %107 = vmatpush.msra.mxu1 %v36_v3  ;;  %v146_v25 = vld [vmem:[#allocation2] ss:$0 sm:$0xff] }
   0xa   :  { %111 = vmatpush.msra.mxu2 %v35_v4  ;;  %112 = vmatpush.msra.mxu3 %v35_v4 }
   0xb   :  { %48 = vmatpush.msra.mxu0 %v35_v4  ;;  %110 = vmatpush.msra.mxu1 %v35_v4 }
   0xc   :  { %114 = vmatpush.msra.mxu2 %v34_v5  ;;  %115 = vmatpush.msra.mxu3 %v34_v5 }
   0xd   :  { %49 = vmatpush.msra.mxu0 %v34_v5  ;;  %113 = vmatpush.msra.mxu1 %v34_v5 }
   0xe   :  { %117 = vmatpush.msra.mxu2 %v33_v6  ;;  %118 = vmatpush.msra.mxu3 %v33_v6 }
   0xf   :  { %50 = vmatpush.msra.mxu0 %v33_v6  ;;  %116 = vmatpush.msra.mxu1 %v33_v6 }
  0x10   :  { %120 = vmatpush.msra.mxu2 %v32_v8  ;;  %121 = vmatpush.msra.mxu3 %v32_v8 }
  0x11   :  { %51 = vmatpush.msra.mxu0 %v32_v8  ;;  %119 = vmatpush.msra.mxu1 %v32_v8 }
  0x12   :  { %123 = vmatpush.msra.mxu2 %v31_v9  ;;  %124 = vmatpush.msra.mxu3 %v31_v9 }
  0x13   :  { %52 = vmatpush.msra.mxu0 %v31_v9  ;;  %122 = vmatpush.msra.mxu1 %v31_v9 }
  0x14   :  { %126 = vmatpush.msra.mxu2 %v30_v10  ;;  %127 = vmatpush.msra.mxu3 %v30_v10 }
  0x15   :  { %53 = vmatpush.msra.mxu0 %v30_v10  ;;  %125 = vmatpush.msra.mxu1 %v30_v10 }
  0x16   :  { %129 = vmatpush.msra.mxu2 %v29_v11  ;;  %130 = vmatpush.msra.mxu3 %v29_v11 }
  0x17   :  { %54 = vmatpush.msra.mxu0 %v29_v11  ;;  %128 = vmatpush.msra.mxu1 %v29_v11 }
  0x18   :  { %132 = vmatpush.msra.mxu2 %v28_v12  ;;  %133 = vmatpush.msra.mxu3 %v28_v12 }
  0x19   :  { %55 = vmatpush.msra.mxu0 %v28_v12  ;;  %131 = vmatpush.msra.mxu1 %v28_v12 }
  0x1a   :  { %135 = vmatpush.msra.mxu2 %v27_v13  ;;  %136 = vmatpush.msra.mxu3 %v27_v13 }
  0x1b   :  { %56 = vmatpush.msra.mxu0 %v27_v13  ;;  %134 = vmatpush.msra.mxu1 %v27_v13 }
  0x1c   :  { %138 = vmatpush.msra.mxu2 %v26_v14  ;;  %139 = vmatpush.msra.mxu3 %v26_v14 }
  0x1d   :  { %57 = vmatpush.msra.mxu0 %v26_v14  ;;  %137 = vmatpush.msra.mxu1 %v26_v14 }
  0x1e   :  { %141 = vmatpush.msra.mxu2 %v25_v15  ;;  %142 = vmatpush.msra.mxu3 %v25_v15 }
  0x1f   :  { %58 = vmatpush.msra.mxu0 %v25_v15  ;;  %140 = vmatpush.msra.mxu1 %v25_v15 }
  0x20   :  { %144 = vmatpush.msra.mxu2 %v24_v16  ;;  %145 = vmatpush.msra.mxu3 %v24_v16 }
  0x21   :  { %72 = vmatmul.f32.vlgmr.msra.gmra.mxu2 %v20_v17  ;;  %78 = vmatmul.f32.vlgmr.msra.gmra.mxu3 %v22_v18 }
  0x22   :  { %59 = vmatpush.msra.mxu0 %v24_v16  ;;  %143 = vmatpush.msra.mxu1 %v24_v16 }
  0x23   :  { %60 = vmatmul.f32.vlgmr.msra.gmra.mxu0 %v16_v19  ;;  %66 = vmatmul.f32.vlgmr.msra.gmra.mxu1 %v18_v20 }
  0x29   :  { %75 = vmatmul.f32.gmra.mxu2 %v21_v21  ;;  %81 = vmatmul.f32.gmra.mxu3 %v23_v22 }
  0x2b   :  { %63 = vmatmul.f32.gmra.mxu0 %v17_v23  ;;  %69 = vmatmul.f32.gmra.mxu1 %v19_v24 }
  0xa0   :  { %v61_v26 = vpop.f32.mrf.mxu0  ;;  %v67_v27 = vpop.f32.mrf.mxu1 }
  0xa1   :  { %v62_v28 = vadd.f32 %v146_v25, %v61_v26  ;;  %v68_v29 = vadd.f32 %v146_v25, %v67_v27 }
  0xa3   :  { %86 = vst.msk [vmem:[%s277_s3] sm:$0xff] %vm85_vm0, %v62_v28 }
  0xa4   :  { %88 = vst.msk [vmem:[%s277_s3 + $0x10] sm:$0xff] %vm85_vm0, %v68_v29  ;;  %v73_v30 = vpop.f32.mrf.mxu2  ;;  %v79_v31 = vpop.f32.mrf.mxu3 }
  0xa5   :  { %v74_v32 = vadd.f32 %v146_v25, %v73_v30  ;;  %v80_v33 = vadd.f32 %v146_v25, %v79_v31 }
  0xa7   :  { %90 = vst.msk [vmem:[%s277_s3 + $0x20] sm:$0xff] %vm85_vm0, %v74_v32 }
  0xa8   :  { %92 = vst.msk [vmem:[%s277_s3 + $0x30] sm:$0xff] %vm85_vm0, %v80_v33  ;;  %v64_v34 = vpop.f32.mrf.mxu0  ;;  %v70_v35 = vpop.f32.mrf.mxu1 }
  0xa9   :  { %v65_v36 = vadd.f32 %v146_v25, %v64_v34  ;;  %v71_v37 = vadd.f32 %v146_v25, %v70_v35 }
  0xab   :  { %87 = vst.msk [vmem:[%s277_s3 + $0x8] sm:$0xff] %vm85_vm0, %v65_v36 }
  0xac   :  { %89 = vst.msk [vmem:[%s277_s3 + $0x18] sm:$0xff] %vm85_vm0, %v71_v37  ;;  %v76_v38 = vpop.f32.mrf.mxu2  ;;  %v82_v39 = vpop.f32.mrf.mxu3 }
  0xad   :  { %v77_v40 = vadd.f32 %v146_v25, %v76_v38  ;;  %v83_v41 = vadd.f32 %v146_v25, %v82_v39 }
  0xaf   :  { %91 = vst.msk [vmem:[%s277_s3 + $0x28] sm:$0xff] %vm85_vm0, %v77_v40 }
  0xb0   :  { %93 = vst.msk [vmem:[%s277_s3 + $0x38] sm:$0xff] %vm85_vm0, %v83_v41 }

</bundles_post_ra>
